<compile_context>
chip_gen: v7x
topology: tpu7x:2x2x1
jax: 0.10.0
libtpu: 0.0.40
codegen_flags: <defaults>
</compile_context>

<pallas_src>
import jax
import jax.numpy as jnp
from jax import lax
from jax.experimental import pallas as pl
from jax.experimental.pallas import tpu as pltpu

# ---- scaled-down module hyper-parameters (PyTorch originals in comments) ----
T = 3             # sequence length
B = 2             # batch
NC = 64           # resnet34 layer4 channels           (512 in the original)
K = 16            # resnet34 logit classes             (1000)
MS = 16           # convMS output channels             (100)
MEM = 32          # mem_size                           (512)
NUM_CLASSES = 12  # num_classes                        (61)
H = W = 7
P = H * W         # 49 spatial positions (fixed 7x7, as in the module)
Q = P             # MSfc output size for regression=True (1 * 7 * 7)
QP = 64           # Q padded to a lane-friendly width
XH = 128          # packed [x(64) | h(32) | 0(32)] lane width for the ConvLSTM plane
CW = 2 * NC + QP  # 192 lanes: fconv | fnbn | Mpre
RVALID = 61       # contiguous span of padded-9x9 rows r in [10, 71) covering all 49 valid
WBASE = 32        # scratch row of padded position r = 10 (plane base row = WBASE - 10)
SCR_ROWS = 104    # >= WBASE - 10 + 81 + margin
OUTW = 64         # packed output lane width
TAPS = [(dy, dx) for dy in (-1, 0, 1) for dx in (-1, 0, 1)]  # k = (dy+1)*3 + (dx+1)

# const-slab row layout (single lane-dense (CONST_ROWS, 128) f32 input)
ROW_WSM = 0       # rows [0, 16)  : weight_softmax (K, NC)
ROW_BXX = 16      # row 16        : ConvLSTM conv_xx biases (1, 4*MEM)
ROW_B8 = 17       # row 17        : fused convMS+MSfc bias (1, Q) (zero-padded to QP)
ROW_BCLS = 18     # row 18        : classifier bias (1, NUM_CLASSES)
ROW_WCLS = 24     # rows [24, 56) : classifier weight^T (MEM, NUM_CLASSES)
CONST_ROWS = 56


def _sigmoid(x):
    # single-EUP form (one tanh) instead of exp + exact reciprocal on the VPU
    return 0.5 * jnp.tanh(0.5 * x) + 0.5


# ----------------------------- the Pallas kernel -----------------------------
def _attention_kernel(feat_ref, logit_ref, wg_ref, const_ref, out_ref, xh_ref):
    # feat_ref : (1, T, RVALID, CW)  f32   [fconv | fnbn | Mpre] on padded-9x9 span rows
    # logit_ref: (1, T, K)           f32   resnet logits
    # wg_ref   : (9*XH, 4*MEM)       bf16  ConvLSTM im2col weight (taps x [x|h|0] -> i,f,c,o)
    # const_ref: (CONST_ROWS, 128)   f32   packed small constants (see ROW_* layout)
    # out_ref  : (1, T+1, OUTW)      f32   rows [0,T): MSfeat (Q padded), row T: feats1|feats
    # xh_ref   : (SCR_ROWS, XH)      f32   zero-padded 9x9 [x | h | 0] plane (this batch el.)

    # scratch persists across grid steps; re-zero so 9x9 border rows / tail lanes are true 0.
    xh_ref[...] = jnp.zeros_like(xh_ref)

    # validity mask for the 61 span rows (padded index r = j + 10, valid iff x_pad in [1,7])
    r = lax.broadcasted_iota(jnp.int32, (RVALID, 1), 0) + 10
    ypad = jnp.zeros((RVALID, 1), jnp.int32)
    for m in range(1, 8):                                 # r // 9 without integer division
        ypad = ypad + (r >= 9 * m).astype(jnp.int32)
    xpad = r - 9 * ypad
    mask = ((xpad >= 1) & (xpad <= 7)).astype(jnp.float32)          # (RVALID, 1)

    # loop-invariant small constants (static sub-slices of the packed slab)
    wsm = const_ref[ROW_WSM:ROW_WSM + K, 0:NC]                      # (K, NC)
    bxx = const_ref[ROW_BXX:ROW_BXX + 1, 0:4 * MEM]                 # (1, 4*MEM)
    b8 = const_ref[ROW_B8:ROW_B8 + 1, 0:QP]                         # (1, QP)

    # ConvLSTM state lives in registers across the (unrolled) time loop.
    h = jnp.zeros((RVALID, MEM), jnp.float32)
    c = jnp.zeros((RVALID, MEM), jnp.float32)

    for t in range(T):
        fconv = feat_ref[0, t, :, 0:NC]                             # (RVALID, NC)
        fnbn = feat_ref[0, t, :, NC:2 * NC]                         # (RVALID, NC)
        mpre = feat_ref[0, t, :, 2 * NC:2 * NC + QP]                # (RVALID, QP)
        lgt = logit_ref[:, t, :]                                    # (1, K)

        # ---- top-1 class (torch: logit.sort(1, True); idxs[:, 0]) -> weight_softmax row
        col = lax.broadcasted_iota(jnp.int32, (1, K), 1)
        mx = jnp.max(lgt, axis=-1, keepdims=True)
        fidx = jnp.min(jnp.where(lgt == mx, col, K), axis=-1, keepdims=True)   # (1, 1)
        onehot = (lax.broadcasted_iota(jnp.int32, (K, 1), 0) == fidx).astype(jnp.float32)
        w_sel = jnp.sum(wsm * onehot, axis=0, keepdims=True)        # (1, NC)

        # ---- CAM (torch.bmm) + masked spatial softmax over the padded span
        cam = jnp.sum(fconv * w_sel, axis=-1, keepdims=True)        # (RVALID, 1)
        cam = cam - (1.0 - mask) * 1e30                             # exclude border rows
        e = jnp.exp(cam - jnp.max(cam, axis=0, keepdims=True))
        att = e * pl.reciprocal(jnp.sum(e, axis=0, keepdims=True), approx=True)

        # ---- convMS + MSfc (fused in wrapper into Mpre): msf = att . Mpre + b8
        out_ref[:, t, :] = jnp.sum(mpre * att, axis=0, keepdims=True) + b8

        # ---- MyConvLSTMCell(attentionFeat, (h, c)) ----
        attfeat = fnbn * att                                        # (RVALID, NC)

        # write x and (masked) h into the padded plane; border rows / tail lanes stay zero
        xh_ref[WBASE:WBASE + RVALID, 0:NC] = attfeat
        xh_ref[WBASE:WBASE + RVALID, NC:NC + MEM] = h * mask

        # 3x3 convs (x and h, all 4 gates) = ONE im2col matmul; 9-wide layout -> no masks
        pieces = []
        for dy, dx in TAPS:
            s = 9 * dy + dx
            pieces.append(
                xh_ref[WBASE + s:WBASE + s + RVALID, :].astype(jnp.bfloat16))
        im2col = jnp.concatenate(pieces, axis=-1)                   # (RVALID, 9*XH)
        gates = jnp.dot(im2col, wg_ref[...],
                        preferred_element_type=jnp.float32) + bxx   # (RVALID, 4*MEM)

        it = _sigmoid(gates[:, 0 * MEM:1 * MEM])
        ft = _sigmoid(gates[:, 1 * MEM:2 * MEM])
        gt = jnp.tanh(gates[:, 2 * MEM:3 * MEM])
        ot = _sigmoid(gates[:, 3 * MEM:4 * MEM])
        c = gt * it + c * ft
        h = ot * jnp.tanh(c)

    # ---- final: avgpool(7) over the 49 valid positions of the cell state + classifier ----
    # TODO(synk): Dropout(0.7) is treated as eval-mode identity (no RNG drop mask).
    feats1 = jnp.sum(c * mask, axis=0, keepdims=True) * (1.0 / P)   # (1, MEM)
    wcls = const_ref[ROW_WCLS:ROW_WCLS + MEM, 0:NUM_CLASSES]        # (MEM, NUM_CLASSES)
    bcls = const_ref[ROW_BCLS:ROW_BCLS + 1, 0:NUM_CLASSES]          # (1, NUM_CLASSES)
    feats = jnp.dot(feats1, wcls, preferred_element_type=jnp.float32) + bcls

    out_ref[:, T, :] = jnp.zeros((1, OUTW), jnp.float32)
    out_ref[:, T, 0:MEM] = feats1
    out_ref[:, T, MEM:MEM + NUM_CLASSES] = feats


# ------------------------------ glue / wrapper --------------------------------
def init_params(key):
    ks = list(jax.random.split(key, 24))

    def nrm(shape, scale):
        return scale * jax.random.normal(ks.pop(), shape, jnp.float32)

    p = {}
    # synthetic backbone stand-in (see TODO below)
    p["backbone_w"] = nrm((NC, 3), 0.5)
    p["backbone_b"] = nrm((NC,), 0.1)
    p["bn_gamma"] = 1.0 + nrm((NC,), 0.1)
    p["bn_beta"] = nrm((NC,), 0.1)
    # resNet.fc -> weight_softmax
    p["fc_resnet_w"] = nrm((K, NC), 1.0 / NC ** 0.5)
    p["fc_resnet_b"] = nrm((K,), 0.05)
    # convMS = Conv2d(NC -> MS, kernel 1)
    p["convMS_w"] = nrm((MS, NC), 1.0 / NC ** 0.5)
    p["convMS_b"] = nrm((MS,), 0.05)
    # MSfc = Linear(MS*49 -> 49)   (regression=True)
    p["MSfc_w"] = nrm((Q, MS * P), 1.0 / (MS * P) ** 0.5)
    p["MSfc_b"] = nrm((Q,), 0.05)
    # MyConvLSTMCell(NC, MEM): per gate (i,f,c,o): conv_xx (bias), conv_hh (no bias), 3x3 pad 1
    for g in ("i", "f", "c", "o"):
        p[f"lstm_{g}_xx_w"] = nrm((MEM, NC, 3, 3), 1.0 / (NC * 9) ** 0.5)
        p[f"lstm_{g}_xx_b"] = nrm((MEM,), 0.05)
        p[f"lstm_{g}_hh_w"] = nrm((MEM, MEM, 3, 3), 1.0 / (MEM * 9) ** 0.5)
    # classifier fc = Linear(MEM -> NUM_CLASSES)
    p["cls_w"] = nrm((NUM_CLASSES, MEM), 1.0 / MEM ** 0.5)
    p["cls_b"] = nrm((NUM_CLASSES,), 0.05)
    return p


def _conv3x3_to_taps(w):
    """(O, I, 3, 3) torch conv weight -> (9, I, O), tap index k = ky*3 + kx."""
    o, i = w.shape[0], w.shape[1]
    return jnp.transpose(w, (2, 3, 1, 0)).reshape(9, i, o)


def _to_padded_span(a):
    """(T, B, P, C): 7x7 row-major -> zero-padded 9x9, rows [10, 71) -> (B, T, RVALID, C)."""
    tt, bb, _, cc = a.shape
    g = a.reshape(tt, bb, H, W, cc)
    g = jnp.pad(g, ((0, 0), (0, 0), (1, 1), (1, 1), (0, 0)))
    g = g.reshape(tt, bb, 81, cc)[:, :, 10:10 + RVALID, :]
    return jnp.transpose(g, (1, 0, 2, 3))


def attention_model_forward(x, p):
    """x: (T, B, 3, 7, 7) float32 (stand-in for the (T, B, 3, 224, 224) frames)."""
    # -------- glue: synthetic resnet34 stand-in ------------------------------
    # TODO(synk): the resnet34 backbone has no compact Pallas equivalent; it is replaced
    # by a deterministic stand-in (1x1 projection + BN/ReLU + GAP + fc) producing the
    # same interface: (logit, feature_conv, feature_convNBN).
    feat_nbn = (jnp.einsum('tbiyx,ni->tbnyx', x, p["backbone_w"])
                + p["backbone_b"][None, None, :, None, None])
    feat_conv = jax.nn.relu(feat_nbn * p["bn_gamma"][None, None, :, None, None]
                            + p["bn_beta"][None, None, :, None, None])
    pooled = feat_conv.mean(axis=(-2, -1))                               # (T, B, NC)
    logits = jnp.einsum('tbn,kn->tbk', pooled, p["fc_resnet_w"]) + p["fc_resnet_b"]

    # NCHW -> channel-last, spatial flattened row-major p = y*7 + x
    fconv_nat = feat_conv.reshape(T, B, NC, P).transpose(0, 1, 3, 2)     # (T, B, P, NC)
    fnbn_nat = feat_nbn.reshape(T, B, NC, P).transpose(0, 1, 3, 2)       # (T, B, P, NC)

    # -------- glue: fuse convMS (1x1) + MSfc and pre-contract with relu(fnbn) ---------
    # torch flattens the convMS output channel-major (m, p); w3r[p, m, q] = MSfc_w[q, m*P+p]
    w3r = p["MSfc_w"].reshape(Q, MS, P).transpose(2, 1, 0)               # (P, MS, Q)
    w8 = jnp.einsum('cm,pmq->pcq', p["convMS_w"].T, w3r)                 # (P, NC, Q)
    b8 = p["MSfc_b"] + jnp.einsum('m,pmq->q', p["convMS_b"], w3r)        # (Q,)
    # attmap >= 0  =>  relu(fnbn * attmap) == attmap * relu(fnbn), so precompute Mpre
    mpre = jnp.einsum('tbpc,pcq->tbpq', jax.nn.relu(fnbn_nat), w8)       # (T, B, P, Q)
    mpre = jnp.pad(mpre, ((0, 0), (0, 0), (0, 0), (0, QP - Q)))          # pad Q -> QP

    # one lane-dense feature slab per (b, t): [fconv | fnbn | Mpre] on padded-9x9 span rows
    bigfeat = jnp.concatenate(
        [_to_padded_span(fconv_nat), _to_padded_span(fnbn_nat), _to_padded_span(mpre)],
        axis=-1)                                                         # (B, T, RVALID, CW)
    logits_bt = jnp.transpose(logits, (1, 0, 2))                         # (B, T, K)

    # ConvLSTM: 3x3 convs as one im2col matmul; per-tap rows are [x(64) | h(32) | 0(32)]
    wxx = jnp.concatenate([_conv3x3_to_taps(p[f"lstm_{g}_xx_w"]) for g in "ifco"],
                          axis=-1)                                       # (9, NC, 4*MEM)
    whh = jnp.concatenate([_conv3x3_to_taps(p[f"lstm_{g}_hh_w"]) for g in "ifco"],
                          axis=-1)                                       # (9, MEM, 4*MEM)
    wg = jnp.concatenate(
        [wxx, whh, jnp.zeros((9, XH - NC - MEM, 4 * MEM), jnp.float32)], axis=1)
    wg = wg.reshape(9 * XH, 4 * MEM).astype(jnp.bfloat16)                # (1152, 128)
    bxx = jnp.concatenate([p[f"lstm_{g}_xx_b"] for g in "ifco"])         # (4*MEM,)

    # all small constants packed into ONE lane-dense slab (single DMA descriptor)
    const = jnp.zeros((CONST_ROWS, 128), jnp.float32)
    const = const.at[ROW_WSM:ROW_WSM + K, 0:NC].set(p["fc_resnet_w"])
    const = const.at[ROW_BXX, 0:4 * MEM].set(bxx)
    const = const.at[ROW_B8, 0:Q].set(b8)
    const = const.at[ROW_BCLS, 0:NUM_CLASSES].set(p["cls_b"])
    const = const.at[ROW_WCLS:ROW_WCLS + MEM, 0:NUM_CLASSES].set(p["cls_w"].T)

    grid_spec = pltpu.PrefetchScalarGridSpec(
        num_scalar_prefetch=0,
        grid=(B,),   # one program per batch element; T unrolled in-kernel, state in regs
        in_specs=[
            pl.BlockSpec((1, T, RVALID, CW), lambda b: (b, 0, 0, 0)),    # features + Mpre
            pl.BlockSpec((1, T, K), lambda b: (b, 0, 0)),                # logits
            pl.BlockSpec((9 * XH, 4 * MEM), lambda b: (0, 0)),           # ConvLSTM im2col W
            pl.BlockSpec((CONST_ROWS, 128), lambda b: (0, 0)),           # packed constants
        ],
        out_specs=pl.BlockSpec((1, T + 1, OUTW), lambda b: (b, 0, 0)),   # MSfeat | feats1|feats
        scratch_shapes=[pltpu.VMEM((SCR_ROWS, XH), jnp.float32)],        # padded x||h plane
    )
    out = pl.pallas_call(
        _attention_kernel,
        out_shape=jax.ShapeDtypeStruct((B, T + 1, OUTW), jnp.float32),
        grid_spec=grid_spec,
        # per-batch work is fully independent -> on v7x the two TensorCores each take one
        # batch element; on v5e/v6e this is a 2-step sequential loop with pipelined DMA.
        compiler_params=pltpu.CompilerParams(dimension_semantics=("parallel",)),
    )(bigfeat, logits_bt, wg, const)

    msfeats = jnp.transpose(out[:, :T, :Q], (1, 0, 2))                   # (T, B, Q)
    feats1 = out[:, T, 0:MEM]                                            # (B, MEM)
    feats = out[:, T, MEM:MEM + NUM_CLASSES]                             # (B, NUM_CLASSES)
    # Same return signature as the torch module: (feats, feats1, MSfeats)
    return feats, feats1, msfeats


if __name__ == "__main__":
    root = jax.random.PRNGKey(0)
    kx, kp = jax.random.split(root)
    x = jax.random.normal(kx, (T, B, 3, H, W), jnp.float32)
    params = init_params(kp)

    fwd = jax.jit(attention_model_forward)
    feats, feats1, msfeats = fwd(x, params)
    jax.block_until_ready((feats, feats1, msfeats))

    assert feats.shape == (B, NUM_CLASSES)
    assert feats1.shape == (B, MEM)
    assert msfeats.shape == (T, B, Q)
    assert bool(jnp.isfinite(feats).all()
                & jnp.isfinite(feats1).all()
                & jnp.isfinite(msfeats).all())
    print("KERNEL_OK")
</pallas_src>

<mosaic_0001>
module attributes {stable_mosaic.version = 11 : i64} {
  func.func @_attention_kernel(%arg0: i32, %arg1: memref<1x3x61x192xf32, #tpu.memory_space<vmem>>, %arg2: memref<1x3x16xf32, #tpu.memory_space<vmem>>, %arg3: memref<1152x128xbf16, #tpu.memory_space<vmem>>, %arg4: memref<56x128xf32, #tpu.memory_space<vmem>>, %arg5: memref<1x4x64xf32, #tpu.memory_space<vmem>>, %arg6: memref<104x128xf32, #tpu.memory_space<vmem>>) attributes {dimension_semantics = [#tpu.dimension_semantics<parallel>], iteration_bounds = array<i64: 2>, scalar_prefetch = 0 : i64, scratch_operands = 1 : i64, tpu.core_type = #tpu.core_type<tc>, window_params = [{transform_indices = @transform_0, window_bounds = array<i64: 1, 3, 61, 192>}, {transform_indices = @transform_1, window_bounds = array<i64: 1, 3, 16>}, {pipeline_mode = #tpu.pipeline_mode<synchronous>, transform_indices = @transform_2, window_bounds = array<i64: 1152, 128>}, {pipeline_mode = #tpu.pipeline_mode<synchronous>, transform_indices = @transform_3, window_bounds = array<i64: 56, 128>}, {transform_indices = @transform_4, window_bounds = array<i64: 1, 4, 64>}]} {
    %cst = arith.constant 0.000000e+00 : f32
    %0 = vector.broadcast %cst : f32 to vector<104x128xf32>
    %c0 = arith.constant 0 : index
    %c0_0 = arith.constant 0 : index
    %1 = vector.load %arg6[%c0, %c0_0] : memref<104x128xf32, #tpu.memory_space<vmem>>, vector<104x128xf32>
    tpu.vector_store %arg6[%c0, %c0_0], %0 {strides = array<i32>} : memref<104x128xf32, #tpu.memory_space<vmem>>, vector<104x128xf32>,
    %2 = tpu.iota {dimensions = array<i32: 0>} : vector<61x1xi32>
    %c10_i32 = arith.constant 10 : i32
    %3 = vector.broadcast %c10_i32 : i32 to vector<61x1xi32>
    %4 = arith.addi %2, %3 : vector<61x1xi32>
    %c0_i32 = arith.constant 0 : i32
    %5 = vector.broadcast %c0_i32 : i32 to vector<61x1xi32>
    %c9_i32 = arith.constant 9 : i32
    %6 = vector.broadcast %c9_i32 : i32 to vector<61x1xi32>
    %7 = arith.cmpi sge, %4, %6 : vector<61x1xi32>
    %8 = arith.extui %7 : vector<61x1xi1> to vector<61x1xi32>
    %9 = arith.addi %5, %8 : vector<61x1xi32>
    %c18_i32 = arith.constant 18 : i32
    %10 = vector.broadcast %c18_i32 : i32 to vector<61x1xi32>
    %11 = arith.cmpi sge, %4, %10 : vector<61x1xi32>
    %12 = arith.extui %11 : vector<61x1xi1> to vector<61x1xi32>
    %13 = arith.addi %9, %12 : vector<61x1xi32>
    %c27_i32 = arith.constant 27 : i32
    %14 = vector.broadcast %c27_i32 : i32 to vector<61x1xi32>
    %15 = arith.cmpi sge, %4, %14 : vector<61x1xi32>
    %16 = arith.extui %15 : vector<61x1xi1> to vector<61x1xi32>
    %17 = arith.addi %13, %16 : vector<61x1xi32>
    %c36_i32 = arith.constant 36 : i32
    %18 = vector.broadcast %c36_i32 : i32 to vector<61x1xi32>
    %19 = arith.cmpi sge, %4, %18 : vector<61x1xi32>
    %20 = arith.extui %19 : vector<61x1xi1> to vector<61x1xi32>
    %21 = arith.addi %17, %20 : vector<61x1xi32>
    %c45_i32 = arith.constant 45 : i32
    %22 = vector.broadcast %c45_i32 : i32 to vector<61x1xi32>
    %23 = arith.cmpi sge, %4, %22 : vector<61x1xi32>
    %24 = arith.extui %23 : vector<61x1xi1> to vector<61x1xi32>
    %25 = arith.addi %21, %24 : vector<61x1xi32>
    %c54_i32 = arith.constant 54 : i32
    %26 = vector.broadcast %c54_i32 : i32 to vector<61x1xi32>
    %27 = arith.cmpi sge, %4, %26 : vector<61x1xi32>
    %28 = arith.extui %27 : vector<61x1xi1> to vector<61x1xi32>
    %29 = arith.addi %25, %28 : vector<61x1xi32>
    %c63_i32 = arith.constant 63 : i32
    %30 = vector.broadcast %c63_i32 : i32 to vector<61x1xi32>
    %31 = arith.cmpi sge, %4, %30 : vector<61x1xi32>
    %32 = arith.extui %31 : vector<61x1xi1> to vector<61x1xi32>
    %33 = arith.addi %29, %32 : vector<61x1xi32>
    %c9_i32_1 = arith.constant 9 : i32
    %34 = vector.broadcast %c9_i32_1 : i32 to vector<61x1xi32>
    %35 = arith.muli %34, %33 : vector<61x1xi32>
    %36 = arith.subi %4, %35 : vector<61x1xi32>
    %c1_i32 = arith.constant 1 : i32
    %37 = vector.broadcast %c1_i32 : i32 to vector<61x1xi32>
    %38 = arith.cmpi sge, %36, %37 : vector<61x1xi32>
    %c7_i32 = arith.constant 7 : i32
    %39 = vector.broadcast %c7_i32 : i32 to vector<61x1xi32>
    %40 = arith.cmpi sle, %36, %39 : vector<61x1xi32>
    %41 = arith.andi %38, %40 : vector<61x1xi1>
    %42 = arith.extui %41 : vector<61x1xi1> to vector<61x1xi32>
    %43 = arith.sitofp %42 : vector<61x1xi32> to vector<61x1xf32>
    %c0_2 = arith.constant 0 : index
    %c0_3 = arith.constant 0 : index
    %44 = vector.load %arg4[%c0_2, %c0_3] : memref<56x128xf32, #tpu.memory_space<vmem>>, vector<16x64xf32>
    %c16 = arith.constant 16 : index
    %c0_4 = arith.constant 0 : index
    %45 = vector.load %arg4[%c16, %c0_4] : memref<56x128xf32, #tpu.memory_space<vmem>>, vector<1x128xf32>
    %c17 = arith.constant 17 : index
    %c0_5 = arith.constant 0 : index
    %46 = vector.load %arg4[%c17, %c0_5] : memref<56x128xf32, #tpu.memory_space<vmem>>, vector<1x64xf32>
    %cst_6 = arith.constant 0.000000e+00 : f32
    %47 = vector.broadcast %cst_6 : f32 to vector<61x32xf32>
    %cst_7 = arith.constant 0.000000e+00 : f32
    %48 = vector.broadcast %cst_7 : f32 to vector<61x32xf32>
    %c0_8 = arith.constant 0 : index
    %c0_9 = arith.constant 0 : index
    %c0_10 = arith.constant 0 : index
    %c0_11 = arith.constant 0 : index
    %49 = vector.load %arg1[%c0_8, %c0_9, %c0_10, %c0_11] : memref<1x3x61x192xf32, #tpu.memory_space<vmem>>, vector<1x1x61x64xf32>
    %50 = vector.shape_cast %49 : vector<1x1x61x64xf32> to vector<61x64xf32>
    %c0_12 = arith.constant 0 : index
    %c0_13 = arith.constant 0 : index
    %c0_14 = arith.constant 0 : index
    %c64 = arith.constant 64 : index
    %51 = vector.load %arg1[%c0_12, %c0_13, %c0_14, %c64] : memref<1x3x61x192xf32, #tpu.memory_space<vmem>>, vector<1x1x61x64xf32>
    %52 = vector.shape_cast %51 : vector<1x1x61x64xf32> to vector<61x64xf32>
    %c0_15 = arith.constant 0 : index
    %c0_16 = arith.constant 0 : index
    %c0_17 = arith.constant 0 : index
    %c128 = arith.constant 128 : index
    %53 = vector.load %arg1[%c0_15, %c0_16, %c0_17, %c128] : memref<1x3x61x192xf32, #tpu.memory_space<vmem>>, vector<1x1x61x64xf32>
    %54 = vector.shape_cast %53 : vector<1x1x61x64xf32> to vector<61x64xf32>
    %c0_18 = arith.constant 0 : index
    %c0_19 = arith.constant 0 : index
    %c0_20 = arith.constant 0 : index
    %55 = vector.load %arg2[%c0_18, %c0_19, %c0_20] : memref<1x3x16xf32, #tpu.memory_space<vmem>>, vector<1x1x16xf32>
    %56 = vector.shape_cast %55 : vector<1x1x16xf32> to vector<1x16xf32>
    %57 = tpu.iota {dimensions = array<i32: 1>} : vector<1x16xi32>
    %cst_21 = arith.constant dense<0xFF800000> : vector<1xf32>
    %58 = vector.multi_reduction <maximumf>, %56, %cst_21 [1] : vector<1x16xf32> to vector<1xf32>
    %59 = vector.shape_cast %58 : vector<1xf32> to vector<1x1xf32>
    %60 = vector.broadcast %59 : vector<1x1xf32> to vector<1x16xf32>
    %61 = arith.cmpf oeq, %56, %60 : vector<1x16xf32>
    %c16_i32 = arith.constant 16 : i32
    %62 = vector.broadcast %c16_i32 : i32 to vector<1x16xi32>
    %63 = arith.select %61, %57, %62 : vector<1x16xi1>, vector<1x16xi32>
    %cst_22 = arith.constant dense<2147483647> : vector<1xi32>
    %64 = vector.multi_reduction <minsi>, %63, %cst_22 [1] : vector<1x16xi32> to vector<1xi32>
    %65 = vector.shape_cast %64 : vector<1xi32> to vector<1x1xi32>
    %66 = tpu.iota {dimensions = array<i32: 0>} : vector<16x1xi32>
    %67 = vector.broadcast %65 : vector<1x1xi32> to vector<16x1xi32>
    %68 = arith.cmpi eq, %66, %67 : vector<16x1xi32>
    %69 = arith.extui %68 : vector<16x1xi1> to vector<16x1xi32>
    %70 = arith.sitofp %69 : vector<16x1xi32> to vector<16x1xf32>
    %71 = vector.broadcast %70 : vector<16x1xf32> to vector<16x64xf32>
    %72 = arith.mulf %44, %71 : vector<16x64xf32>
    %cst_23 = arith.constant dense<0.000000e+00> : vector<64xf32>
    %73 = vector.multi_reduction <add>, %72, %cst_23 [0] : vector<16x64xf32> to vector<64xf32>
    %74 = vector.shape_cast %73 : vector<64xf32> to vector<1x64xf32>
    %75 = vector.broadcast %74 : vector<1x64xf32> to vector<61x64xf32>
    %76 = arith.mulf %50, %75 : vector<61x64xf32>
    %cst_24 = arith.constant dense<0.000000e+00> : vector<61xf32>
    %77 = vector.multi_reduction <add>, %76, %cst_24 [1] : vector<61x64xf32> to vector<61xf32>
    %78 = vector.shape_cast %77 : vector<61xf32> to vector<61x1xf32>
    %cst_25 = arith.constant 1.000000e+00 : f32
    %79 = vector.broadcast %cst_25 : f32 to vector<61x1xf32>
    %80 = arith.subf %79, %43 : vector<61x1xf32>
    %cst_26 = arith.constant 1.000000e+30 : f32
    %81 = vector.broadcast %cst_26 : f32 to vector<61x1xf32>
    %82 = arith.mulf %80, %81 : vector<61x1xf32>
    %83 = arith.subf %78, %82 : vector<61x1xf32>
    %cst_27 = arith.constant dense<0xFF800000> : vector<1xf32>
    %84 = vector.multi_reduction <maximumf>, %83, %cst_27 [0] : vector<61x1xf32> to vector<1xf32>
    %85 = vector.shape_cast %84 : vector<1xf32> to vector<1x1xf32>
    %86 = vector.broadcast %85 : vector<1x1xf32> to vector<61x1xf32>
    %87 = arith.subf %83, %86 : vector<61x1xf32>
    %88 = math.exp %87 : vector<61x1xf32>
    %cst_28 = arith.constant dense<0.000000e+00> : vector<1xf32>
    %89 = vector.multi_reduction <add>, %88, %cst_28 [0] : vector<61x1xf32> to vector<1xf32>
    %90 = vector.shape_cast %89 : vector<1xf32> to vector<1x1xf32>
    %91 = tpu.reciprocal %90 {approx = true} : vector<1x1xf32> -> vector<1x1xf32>
    %92 = vector.broadcast %91 : vector<1x1xf32> to vector<61x1xf32>
    %93 = arith.mulf %88, %92 : vector<61x1xf32>
    %94 = vector.broadcast %93 : vector<61x1xf32> to vector<61x64xf32>
    %95 = arith.mulf %54, %94 : vector<61x64xf32>
    %cst_29 = arith.constant dense<0.000000e+00> : vector<64xf32>
    %96 = vector.multi_reduction <add>, %95, %cst_29 [0] : vector<61x64xf32> to vector<64xf32>
    %97 = vector.shape_cast %96 : vector<64xf32> to vector<1x64xf32>
    %98 = arith.addf %97, %46 : vector<1x64xf32>
    %c0_30 = arith.constant 0 : index
    %c0_31 = arith.constant 0 : index
    %c0_32 = arith.constant 0 : index
    %99 = vector.load %arg5[%c0_30, %c0_31, %c0_32] : memref<1x4x64xf32, #tpu.memory_space<vmem>>, vector<1x1x64xf32>
    %100 = vector.shape_cast %99 : vector<1x1x64xf32> to vector<1x64xf32>
    %101 = vector.shape_cast %98 : vector<1x64xf32> to vector<1x1x64xf32>
    tpu.vector_store %arg5[%c0_30, %c0_31, %c0_32], %101 {strides = array<i32>} : memref<1x4x64xf32, #tpu.memory_space<vmem>>, vector<1x1x64xf32>,
    %102 = vector.broadcast %93 : vector<61x1xf32> to vector<61x64xf32>
    %103 = arith.mulf %52, %102 : vector<61x64xf32>
    %c32 = arith.constant 32 : index
    %c0_33 = arith.constant 0 : index
    %104 = vector.load %arg6[%c32, %c0_33] : memref<104x128xf32, #tpu.memory_space<vmem>>, vector<61x64xf32>
    tpu.vector_store %arg6[%c32, %c0_33], %103 {strides = array<i32>} : memref<104x128xf32, #tpu.memory_space<vmem>>, vector<61x64xf32>,
    %105 = vector.broadcast %43 : vector<61x1xf32> to vector<61x32xf32>
    %106 = arith.mulf %47, %105 : vector<61x32xf32>
    %c32_34 = arith.constant 32 : index
    %c64_35 = arith.constant 64 : index
    %107 = vector.load %arg6[%c32_34, %c64_35] : memref<104x128xf32, #tpu.memory_space<vmem>>, vector<61x32xf32>
    tpu.vector_store %arg6[%c32_34, %c64_35], %106 {strides = array<i32>} : memref<104x128xf32, #tpu.memory_space<vmem>>, vector<61x32xf32>,
    %c22 = arith.constant 22 : index
    %c0_36 = arith.constant 0 : index
    %108 = vector.load %arg6[%c22, %c0_36] : memref<104x128xf32, #tpu.memory_space<vmem>>, vector<61x128xf32>
    %109 = arith.truncf %108 : vector<61x128xf32> to vector<61x128xbf16>
    %c23 = arith.constant 23 : index
    %c0_37 = arith.constant 0 : index
    %110 = vector.load %arg6[%c23, %c0_37] : memref<104x128xf32, #tpu.memory_space<vmem>>, vector<61x128xf32>
    %111 = arith.truncf %110 : vector<61x128xf32> to vector<61x128xbf16>
    %c24 = arith.constant 24 : index
    %c0_38 = arith.constant 0 : index
    %112 = vector.load %arg6[%c24, %c0_38] : memref<104x128xf32, #tpu.memory_space<vmem>>, vector<61x128xf32>
    %113 = arith.truncf %112 : vector<61x128xf32> to vector<61x128xbf16>
    %c31 = arith.constant 31 : index
    %c0_39 = arith.constant 0 : index
    %114 = vector.load %arg6[%c31, %c0_39] : memref<104x128xf32, #tpu.memory_space<vmem>>, vector<61x128xf32>
    %115 = arith.truncf %114 : vector<61x128xf32> to vector<61x128xbf16>
    %c32_40 = arith.constant 32 : index
    %c0_41 = arith.constant 0 : index
    %116 = vector.load %arg6[%c32_40, %c0_41] : memref<104x128xf32, #tpu.memory_space<vmem>>, vector<61x128xf32>
    %117 = arith.truncf %116 : vector<61x128xf32> to vector<61x128xbf16>
    %c33 = arith.constant 33 : index
    %c0_42 = arith.constant 0 : index
    %118 = vector.load %arg6[%c33, %c0_42] : memref<104x128xf32, #tpu.memory_space<vmem>>, vector<61x128xf32>
    %119 = arith.truncf %118 : vector<61x128xf32> to vector<61x128xbf16>
    %c40 = arith.constant 40 : index
    %c0_43 = arith.constant 0 : index
    %120 = vector.load %arg6[%c40, %c0_43] : memref<104x128xf32, #tpu.memory_space<vmem>>, vector<61x128xf32>
    %121 = arith.truncf %120 : vector<61x128xf32> to vector<61x128xbf16>
    %c41 = arith.constant 41 : index
    %c0_44 = arith.constant 0 : index
    %122 = vector.load %arg6[%c41, %c0_44] : memref<104x128xf32, #tpu.memory_space<vmem>>, vector<61x128xf32>
    %123 = arith.truncf %122 : vector<61x128xf32> to vector<61x128xbf16>
    %c42 = arith.constant 42 : index
    %c0_45 = arith.constant 0 : index
    %124 = vector.load %arg6[%c42, %c0_45] : memref<104x128xf32, #tpu.memory_space<vmem>>, vector<61x128xf32>
    %125 = arith.truncf %124 : vector<61x128xf32> to vector<61x128xbf16>
    %126 = tpu.concatenate %109, %111, %113, %115, %117, %119, %121, %123, %125 in 1 : vector<61x128xbf16>, vector<61x128xbf16>, vector<61x128xbf16>, vector<61x128xbf16>, vector<61x128xbf16>, vector<61x128xbf16>, vector<61x128xbf16>, vector<61x128xbf16>, vector<61x128xbf16> -> vector<61x1152xbf16>
    %c0_46 = arith.constant 0 : index
    %c0_47 = arith.constant 0 : index
    %127 = vector.load %arg3[%c0_46, %c0_47] : memref<1152x128xbf16, #tpu.memory_space<vmem>>, vector<1152x128xbf16>
    %cst_48 = arith.constant dense<0.000000e+00> : vector<61x128xf32>
    %128 = tpu.matmul %126, %127, %cst_48 {dimension_numbers = #tpu.dot_dimension_numbers<[1], [0], [0], [1], [0, 0, 1, 1], [], []>} : vector<61x1152xbf16>, vector<1152x128xbf16>, vector<61x128xf32> -> vector<61x128xf32>
    %129 = vector.broadcast %45 : vector<1x128xf32> to vector<61x128xf32>
    %130 = arith.addf %128, %129 : vector<61x128xf32>
    %131 = vector.extract_strided_slice %130 {offsets = [0, 0], sizes = [61, 32], strides = [1, 1]} : vector<61x128xf32> to vector<61x32xf32>
    %cst_49 = arith.constant 5.000000e-01 : f32
    %132 = vector.broadcast %cst_49 : f32 to vector<61x32xf32>
    %133 = arith.mulf %132, %131 : vector<61x32xf32>
    %134 = math.tanh %133 : vector<61x32xf32>
    %cst_50 = arith.constant 5.000000e-01 : f32
    %135 = vector.broadcast %cst_50 : f32 to vector<61x32xf32>
    %136 = arith.mulf %135, %134 : vector<61x32xf32>
    %cst_51 = arith.constant 5.000000e-01 : f32
    %137 = vector.broadcast %cst_51 : f32 to vector<61x32xf32>
    %138 = arith.addf %136, %137 : vector<61x32xf32>
    %139 = vector.extract_strided_slice %130 {offsets = [0, 32], sizes = [61, 32], strides = [1, 1]} : vector<61x128xf32> to vector<61x32xf32>
    %cst_52 = arith.constant 5.000000e-01 : f32
    %140 = vector.broadcast %cst_52 : f32 to vector<61x32xf32>
    %141 = arith.mulf %140, %139 : vector<61x32xf32>
    %142 = math.tanh %141 : vector<61x32xf32>
    %cst_53 = arith.constant 5.000000e-01 : f32
    %143 = vector.broadcast %cst_53 : f32 to vector<61x32xf32>
    %144 = arith.mulf %143, %142 : vector<61x32xf32>
    %cst_54 = arith.constant 5.000000e-01 : f32
    %145 = vector.broadcast %cst_54 : f32 to vector<61x32xf32>
    %146 = arith.addf %144, %145 : vector<61x32xf32>
    %147 = vector.extract_strided_slice %130 {offsets = [0, 64], sizes = [61, 32], strides = [1, 1]} : vector<61x128xf32> to vector<61x32xf32>
    %148 = math.tanh %147 : vector<61x32xf32>
    %149 = vector.extract_strided_slice %130 {offsets = [0, 96], sizes = [61, 32], strides = [1, 1]} : vector<61x128xf32> to vector<61x32xf32>
    %cst_55 = arith.constant 5.000000e-01 : f32
    %150 = vector.broadcast %cst_55 : f32 to vector<61x32xf32>
    %151 = arith.mulf %150, %149 : vector<61x32xf32>
    %152 = math.tanh %151 : vector<61x32xf32>
    %cst_56 = arith.constant 5.000000e-01 : f32
    %153 = vector.broadcast %cst_56 : f32 to vector<61x32xf32>
    %154 = arith.mulf %153, %152 : vector<61x32xf32>
    %cst_57 = arith.constant 5.000000e-01 : f32
    %155 = vector.broadcast %cst_57 : f32 to vector<61x32xf32>
    %156 = arith.addf %154, %155 : vector<61x32xf32>
    %157 = arith.mulf %148, %138 : vector<61x32xf32>
    %158 = arith.mulf %48, %146 : vector<61x32xf32>
    %159 = arith.addf %157, %158 : vector<61x32xf32>
    %160 = math.tanh %159 : vector<61x32xf32>
    %161 = arith.mulf %156, %160 : vector<61x32xf32>
    %c0_58 = arith.constant 0 : index
    %c1 = arith.constant 1 : index
    %c0_59 = arith.constant 0 : index
    %c0_60 = arith.constant 0 : index
    %162 = vector.load %arg1[%c0_58, %c1, %c0_59, %c0_60] : memref<1x3x61x192xf32, #tpu.memory_space<vmem>>, vector<1x1x61x64xf32>
    %163 = vector.shape_cast %162 : vector<1x1x61x64xf32> to vector<61x64xf32>
    %c0_61 = arith.constant 0 : index
    %c1_62 = arith.constant 1 : index
    %c0_63 = arith.constant 0 : index
    %c64_64 = arith.constant 64 : index
    %164 = vector.load %arg1[%c0_61, %c1_62, %c0_63, %c64_64] : memref<1x3x61x192xf32, #tpu.memory_space<vmem>>, vector<1x1x61x64xf32>
    %165 = vector.shape_cast %164 : vector<1x1x61x64xf32> to vector<61x64xf32>
    %c0_65 = arith.constant 0 : index
    %c1_66 = arith.constant 1 : index
    %c0_67 = arith.constant 0 : index
    %c128_68 = arith.constant 128 : index
    %166 = vector.load %arg1[%c0_65, %c1_66, %c0_67, %c128_68] : memref<1x3x61x192xf32, #tpu.memory_space<vmem>>, vector<1x1x61x64xf32>
    %167 = vector.shape_cast %166 : vector<1x1x61x64xf32> to vector<61x64xf32>
    %c0_69 = arith.constant 0 : index
    %c1_70 = arith.constant 1 : index
    %c0_71 = arith.constant 0 : index
    %168 = vector.load %arg2[%c0_69, %c1_70, %c0_71] : memref<1x3x16xf32, #tpu.memory_space<vmem>>, vector<1x1x16xf32>
    %169 = vector.shape_cast %168 : vector<1x1x16xf32> to vector<1x16xf32>
    %170 = tpu.iota {dimensions = array<i32: 1>} : vector<1x16xi32>
    %cst_72 = arith.constant dense<0xFF800000> : vector<1xf32>
    %171 = vector.multi_reduction <maximumf>, %169, %cst_72 [1] : vector<1x16xf32> to vector<1xf32>
    %172 = vector.shape_cast %171 : vector<1xf32> to vector<1x1xf32>
    %173 = vector.broadcast %172 : vector<1x1xf32> to vector<1x16xf32>
    %174 = arith.cmpf oeq, %169, %173 : vector<1x16xf32>
    %c16_i32_73 = arith.constant 16 : i32
    %175 = vector.broadcast %c16_i32_73 : i32 to vector<1x16xi32>
    %176 = arith.select %174, %170, %175 : vector<1x16xi1>, vector<1x16xi32>
    %cst_74 = arith.constant dense<2147483647> : vector<1xi32>
    %177 = vector.multi_reduction <minsi>, %176, %cst_74 [1] : vector<1x16xi32> to vector<1xi32>
    %178 = vector.shape_cast %177 : vector<1xi32> to vector<1x1xi32>
    %179 = tpu.iota {dimensions = array<i32: 0>} : vector<16x1xi32>
    %180 = vector.broadcast %178 : vector<1x1xi32> to vector<16x1xi32>
    %181 = arith.cmpi eq, %179, %180 : vector<16x1xi32>
    %182 = arith.extui %181 : vector<16x1xi1> to vector<16x1xi32>
    %183 = arith.sitofp %182 : vector<16x1xi32> to vector<16x1xf32>
    %184 = vector.broadcast %183 : vector<16x1xf32> to vector<16x64xf32>
    %185 = arith.mulf %44, %184 : vector<16x64xf32>
    %cst_75 = arith.constant dense<0.000000e+00> : vector<64xf32>
    %186 = vector.multi_reduction <add>, %185, %cst_75 [0] : vector<16x64xf32> to vector<64xf32>
    %187 = vector.shape_cast %186 : vector<64xf32> to vector<1x64xf32>
    %188 = vector.broadcast %187 : vector<1x64xf32> to vector<61x64xf32>
    %189 = arith.mulf %163, %188 : vector<61x64xf32>
    %cst_76 = arith.constant dense<0.000000e+00> : vector<61xf32>
    %190 = vector.multi_reduction <add>, %189, %cst_76 [1] : vector<61x64xf32> to vector<61xf32>
    %191 = vector.shape_cast %190 : vector<61xf32> to vector<61x1xf32>
    %cst_77 = arith.constant 1.000000e+00 : f32
    %192 = vector.broadcast %cst_77 : f32 to vector<61x1xf32>
    %193 = arith.subf %192, %43 : vector<61x1xf32>
    %cst_78 = arith.constant 1.000000e+30 : f32
    %194 = vector.broadcast %cst_78 : f32 to vector<61x1xf32>
    %195 = arith.mulf %193, %194 : vector<61x1xf32>
    %196 = arith.subf %191, %195 : vector<61x1xf32>
    %cst_79 = arith.constant dense<0xFF800000> : vector<1xf32>
    %197 = vector.multi_reduction <maximumf>, %196, %cst_79 [0] : vector<61x1xf32> to vector<1xf32>
    %198 = vector.shape_cast %197 : vector<1xf32> to vector<1x1xf32>
    %199 = vector.broadcast %198 : vector<1x1xf32> to vector<61x1xf32>
    %200 = arith.subf %196, %199 : vector<61x1xf32>
    %201 = math.exp %200 : vector<61x1xf32>
    %cst_80 = arith.constant dense<0.000000e+00> : vector<1xf32>
    %202 = vector.multi_reduction <add>, %201, %cst_80 [0] : vector<61x1xf32> to vector<1xf32>
    %203 = vector.shape_cast %202 : vector<1xf32> to vector<1x1xf32>
    %204 = tpu.reciprocal %203 {approx = true} : vector<1x1xf32> -> vector<1x1xf32>
    %205 = vector.broadcast %204 : vector<1x1xf32> to vector<61x1xf32>
    %206 = arith.mulf %201, %205 : vector<61x1xf32>
    %207 = vector.broadcast %206 : vector<61x1xf32> to vector<61x64xf32>
    %208 = arith.mulf %167, %207 : vector<61x64xf32>
    %cst_81 = arith.constant dense<0.000000e+00> : vector<64xf32>
    %209 = vector.multi_reduction <add>, %208, %cst_81 [0] : vector<61x64xf32> to vector<64xf32>
    %210 = vector.shape_cast %209 : vector<64xf32> to vector<1x64xf32>
    %211 = arith.addf %210, %46 : vector<1x64xf32>
    %c0_82 = arith.constant 0 : index
    %c1_83 = arith.constant 1 : index
    %c0_84 = arith.constant 0 : index
    %212 = vector.load %arg5[%c0_82, %c1_83, %c0_84] : memref<1x4x64xf32, #tpu.memory_space<vmem>>, vector<1x1x64xf32>
    %213 = vector.shape_cast %212 : vector<1x1x64xf32> to vector<1x64xf32>
    %214 = vector.shape_cast %211 : vector<1x64xf32> to vector<1x1x64xf32>
    tpu.vector_store %arg5[%c0_82, %c1_83, %c0_84], %214 {strides = array<i32>} : memref<1x4x64xf32, #tpu.memory_space<vmem>>, vector<1x1x64xf32>,
    %215 = vector.broadcast %206 : vector<61x1xf32> to vector<61x64xf32>
    %216 = arith.mulf %165, %215 : vector<61x64xf32>
    %c32_85 = arith.constant 32 : index
    %c0_86 = arith.constant 0 : index
    %217 = vector.load %arg6[%c32_85, %c0_86] : memref<104x128xf32, #tpu.memory_space<vmem>>, vector<61x64xf32>
    tpu.vector_store %arg6[%c32_85, %c0_86], %216 {strides = array<i32>} : memref<104x128xf32, #tpu.memory_space<vmem>>, vector<61x64xf32>,
    %218 = vector.broadcast %43 : vector<61x1xf32> to vector<61x32xf32>
    %219 = arith.mulf %161, %218 : vector<61x32xf32>
    %c32_87 = arith.constant 32 : index
    %c64_88 = arith.constant 64 : index
    %220 = vector.load %arg6[%c32_87, %c64_88] : memref<104x128xf32, #tpu.memory_space<vmem>>, vector<61x32xf32>
    tpu.vector_store %arg6[%c32_87, %c64_88], %219 {strides = array<i32>} : memref<104x128xf32, #tpu.memory_space<vmem>>, vector<61x32xf32>,
    %c22_89 = arith.constant 22 : index
    %c0_90 = arith.constant 0 : index
    %221 = vector.load %arg6[%c22_89, %c0_90] : memref<104x128xf32, #tpu.memory_space<vmem>>, vector<61x128xf32>
    %222 = arith.truncf %221 : vector<61x128xf32> to vector<61x128xbf16>
    %c23_91 = arith.constant 23 : index
    %c0_92 = arith.constant 0 : index
    %223 = vector.load %arg6[%c23_91, %c0_92] : memref<104x128xf32, #tpu.memory_space<vmem>>, vector<61x128xf32>
    %224 = arith.truncf %223 : vector<61x128xf32> to vector<61x128xbf16>
    %c24_93 = arith.constant 24 : index
    %c0_94 = arith.constant 0 : index
    %225 = vector.load %arg6[%c24_93, %c0_94] : memref<104x128xf32, #tpu.memory_space<vmem>>, vector<61x128xf32>
    %226 = arith.truncf %225 : vector<61x128xf32> to vector<61x128xbf16>
    %c31_95 = arith.constant 31 : index
    %c0_96 = arith.constant 0 : index
    %227 = vector.load %arg6[%c31_95, %c0_96] : memref<104x128xf32, #tpu.memory_space<vmem>>, vector<61x128xf32>
    %228 = arith.truncf %227 : vector<61x128xf32> to vector<61x128xbf16>
    %c32_97 = arith.constant 32 : index
    %c0_98 = arith.constant 0 : index
    %229 = vector.load %arg6[%c32_97, %c0_98] : memref<104x128xf32, #tpu.memory_space<vmem>>, vector<61x128xf32>
    %230 = arith.truncf %229 : vector<61x128xf32> to vector<61x128xbf16>
    %c33_99 = arith.constant 33 : index
    %c0_100 = arith.constant 0 : index
    %231 = vector.load %arg6[%c33_99, %c0_100] : memref<104x128xf32, #tpu.memory_space<vmem>>, vector<61x128xf32>
    %232 = arith.truncf %231 : vector<61x128xf32> to vector<61x128xbf16>
    %c40_101 = arith.constant 40 : index
    %c0_102 = arith.constant 0 : index
    %233 = vector.load %arg6[%c40_101, %c0_102] : memref<104x128xf32, #tpu.memory_space<vmem>>, vector<61x128xf32>
    %234 = arith.truncf %233 : vector<61x128xf32> to vector<61x128xbf16>
    %c41_103 = arith.constant 41 : index
    %c0_104 = arith.constant 0 : index
    %235 = vector.load %arg6[%c41_103, %c0_104] : memref<104x128xf32, #tpu.memory_space<vmem>>, vector<61x128xf32>
    %236 = arith.truncf %235 : vector<61x128xf32> to vector<61x128xbf16>
    %c42_105 = arith.constant 42 : index
    %c0_106 = arith.constant 0 : index
    %237 = vector.load %arg6[%c42_105, %c0_106] : memref<104x128xf32, #tpu.memory_space<vmem>>, vector<61x128xf32>
    %238 = arith.truncf %237 : vector<61x128xf32> to vector<61x128xbf16>
    %239 = tpu.concatenate %222, %224, %226, %228, %230, %232, %234, %236, %238 in 1 : vector<61x128xbf16>, vector<61x128xbf16>, vector<61x128xbf16>, vector<61x128xbf16>, vector<61x128xbf16>, vector<61x128xbf16>, vector<61x128xbf16>, vector<61x128xbf16>, vector<61x128xbf16> -> vector<61x1152xbf16>
    %c0_107 = arith.constant 0 : index
    %c0_108 = arith.constant 0 : index
    %240 = vector.load %arg3[%c0_107, %c0_108] : memref<1152x128xbf16, #tpu.memory_space<vmem>>, vector<1152x128xbf16>
    %cst_109 = arith.constant dense<0.000000e+00> : vector<61x128xf32>
    %241 = tpu.matmul %239, %240, %cst_109 {dimension_numbers = #tpu.dot_dimension_numbers<[1], [0], [0], [1], [0, 0, 1, 1], [], []>} : vector<61x1152xbf16>, vector<1152x128xbf16>, vector<61x128xf32> -> vector<61x128xf32>
    %242 = vector.broadcast %45 : vector<1x128xf32> to vector<61x128xf32>
    %243 = arith.addf %241, %242 : vector<61x128xf32>
    %244 = vector.extract_strided_slice %243 {offsets = [0, 0], sizes = [61, 32], strides = [1, 1]} : vector<61x128xf32> to vector<61x32xf32>
    %cst_110 = arith.constant 5.000000e-01 : f32
    %245 = vector.broadcast %cst_110 : f32 to vector<61x32xf32>
    %246 = arith.mulf %245, %244 : vector<61x32xf32>
    %247 = math.tanh %246 : vector<61x32xf32>
    %cst_111 = arith.constant 5.000000e-01 : f32
    %248 = vector.broadcast %cst_111 : f32 to vector<61x32xf32>
    %249 = arith.mulf %248, %247 : vector<61x32xf32>
    %cst_112 = arith.constant 5.000000e-01 : f32
    %250 = vector.broadcast %cst_112 : f32 to vector<61x32xf32>
    %251 = arith.addf %249, %250 : vector<61x32xf32>
    %252 = vector.extract_strided_slice %243 {offsets = [0, 32], sizes = [61, 32], strides = [1, 1]} : vector<61x128xf32> to vector<61x32xf32>
    %cst_113 = arith.constant 5.000000e-01 : f32
    %253 = vector.broadcast %cst_113 : f32 to vector<61x32xf32>
    %254 = arith.mulf %253, %252 : vector<61x32xf32>
    %255 = math.tanh %254 : vector<61x32xf32>
    %cst_114 = arith.constant 5.000000e-01 : f32
    %256 = vector.broadcast %cst_114 : f32 to vector<61x32xf32>
    %257 = arith.mulf %256, %255 : vector<61x32xf32>
    %cst_115 = arith.constant 5.000000e-01 : f32
    %258 = vector.broadcast %cst_115 : f32 to vector<61x32xf32>
    %259 = arith.addf %257, %258 : vector<61x32xf32>
    %260 = vector.extract_strided_slice %243 {offsets = [0, 64], sizes = [61, 32], strides = [1, 1]} : vector<61x128xf32> to vector<61x32xf32>
    %261 = math.tanh %260 : vector<61x32xf32>
    %262 = vector.extract_strided_slice %243 {offsets = [0, 96], sizes = [61, 32], strides = [1, 1]} : vector<61x128xf32> to vector<61x32xf32>
    %cst_116 = arith.constant 5.000000e-01 : f32
    %263 = vector.broadcast %cst_116 : f32 to vector<61x32xf32>
    %264 = arith.mulf %263, %262 : vector<61x32xf32>
    %265 = math.tanh %264 : vector<61x32xf32>
    %cst_117 = arith.constant 5.000000e-01 : f32
    %266 = vector.broadcast %cst_117 : f32 to vector<61x32xf32>
    %267 = arith.mulf %266, %265 : vector<61x32xf32>
    %cst_118 = arith.constant 5.000000e-01 : f32
    %268 = vector.broadcast %cst_118 : f32 to vector<61x32xf32>
    %269 = arith.addf %267, %268 : vector<61x32xf32>
    %270 = arith.mulf %261, %251 : vector<61x32xf32>
    %271 = arith.mulf %159, %259 : vector<61x32xf32>
    %272 = arith.addf %270, %271 : vector<61x32xf32>
    %273 = math.tanh %272 : vector<61x32xf32>
    %274 = arith.mulf %269, %273 : vector<61x32xf32>
    %c0_119 = arith.constant 0 : index
    %c2 = arith.constant 2 : index
    %c0_120 = arith.constant 0 : index
    %c0_121 = arith.constant 0 : index
    %275 = vector.load %arg1[%c0_119, %c2, %c0_120, %c0_121] : memref<1x3x61x192xf32, #tpu.memory_space<vmem>>, vector<1x1x61x64xf32>
    %276 = vector.shape_cast %275 : vector<1x1x61x64xf32> to vector<61x64xf32>
    %c0_122 = arith.constant 0 : index
    %c2_123 = arith.constant 2 : index
    %c0_124 = arith.constant 0 : index
    %c64_125 = arith.constant 64 : index
    %277 = vector.load %arg1[%c0_122, %c2_123, %c0_124, %c64_125] : memref<1x3x61x192xf32, #tpu.memory_space<vmem>>, vector<1x1x61x64xf32>
    %278 = vector.shape_cast %277 : vector<1x1x61x64xf32> to vector<61x64xf32>
    %c0_126 = arith.constant 0 : index
    %c2_127 = arith.constant 2 : index
    %c0_128 = arith.constant 0 : index
    %c128_129 = arith.constant 128 : index
    %279 = vector.load %arg1[%c0_126, %c2_127, %c0_128, %c128_129] : memref<1x3x61x192xf32, #tpu.memory_space<vmem>>, vector<1x1x61x64xf32>
    %280 = vector.shape_cast %279 : vector<1x1x61x64xf32> to vector<61x64xf32>
    %c0_130 = arith.constant 0 : index
    %c2_131 = arith.constant 2 : index
    %c0_132 = arith.constant 0 : index
    %281 = vector.load %arg2[%c0_130, %c2_131, %c0_132] : memref<1x3x16xf32, #tpu.memory_space<vmem>>, vector<1x1x16xf32>
    %282 = vector.shape_cast %281 : vector<1x1x16xf32> to vector<1x16xf32>
    %283 = tpu.iota {dimensions = array<i32: 1>} : vector<1x16xi32>
    %cst_133 = arith.constant dense<0xFF800000> : vector<1xf32>
    %284 = vector.multi_reduction <maximumf>, %282, %cst_133 [1] : vector<1x16xf32> to vector<1xf32>
    %285 = vector.shape_cast %284 : vector<1xf32> to vector<1x1xf32>
    %286 = vector.broadcast %285 : vector<1x1xf32> to vector<1x16xf32>
    %287 = arith.cmpf oeq, %282, %286 : vector<1x16xf32>
    %c16_i32_134 = arith.constant 16 : i32
    %288 = vector.broadcast %c16_i32_134 : i32 to vector<1x16xi32>
    %289 = arith.select %287, %283, %288 : vector<1x16xi1>, vector<1x16xi32>
    %cst_135 = arith.constant dense<2147483647> : vector<1xi32>
    %290 = vector.multi_reduction <minsi>, %289, %cst_135 [1] : vector<1x16xi32> to vector<1xi32>
    %291 = vector.shape_cast %290 : vector<1xi32> to vector<1x1xi32>
    %292 = tpu.iota {dimensions = array<i32: 0>} : vector<16x1xi32>
    %293 = vector.broadcast %291 : vector<1x1xi32> to vector<16x1xi32>
    %294 = arith.cmpi eq, %292, %293 : vector<16x1xi32>
    %295 = arith.extui %294 : vector<16x1xi1> to vector<16x1xi32>
    %296 = arith.sitofp %295 : vector<16x1xi32> to vector<16x1xf32>
    %297 = vector.broadcast %296 : vector<16x1xf32> to vector<16x64xf32>
    %298 = arith.mulf %44, %297 : vector<16x64xf32>
    %cst_136 = arith.constant dense<0.000000e+00> : vector<64xf32>
    %299 = vector.multi_reduction <add>, %298, %cst_136 [0] : vector<16x64xf32> to vector<64xf32>
    %300 = vector.shape_cast %299 : vector<64xf32> to vector<1x64xf32>
    %301 = vector.broadcast %300 : vector<1x64xf32> to vector<61x64xf32>
    %302 = arith.mulf %276, %301 : vector<61x64xf32>
    %cst_137 = arith.constant dense<0.000000e+00> : vector<61xf32>
    %303 = vector.multi_reduction <add>, %302, %cst_137 [1] : vector<61x64xf32> to vector<61xf32>
    %304 = vector.shape_cast %303 : vector<61xf32> to vector<61x1xf32>
    %cst_138 = arith.constant 1.000000e+00 : f32
    %305 = vector.broadcast %cst_138 : f32 to vector<61x1xf32>
    %306 = arith.subf %305, %43 : vector<61x1xf32>
    %cst_139 = arith.constant 1.000000e+30 : f32
    %307 = vector.broadcast %cst_139 : f32 to vector<61x1xf32>
    %308 = arith.mulf %306, %307 : vector<61x1xf32>
    %309 = arith.subf %304, %308 : vector<61x1xf32>
    %cst_140 = arith.constant dense<0xFF800000> : vector<1xf32>
    %310 = vector.multi_reduction <maximumf>, %309, %cst_140 [0] : vector<61x1xf32> to vector<1xf32>
    %311 = vector.shape_cast %310 : vector<1xf32> to vector<1x1xf32>
    %312 = vector.broadcast %311 : vector<1x1xf32> to vector<61x1xf32>
    %313 = arith.subf %309, %312 : vector<61x1xf32>
    %314 = math.exp %313 : vector<61x1xf32>
    %cst_141 = arith.constant dense<0.000000e+00> : vector<1xf32>
    %315 = vector.multi_reduction <add>, %314, %cst_141 [0] : vector<61x1xf32> to vector<1xf32>
    %316 = vector.shape_cast %315 : vector<1xf32> to vector<1x1xf32>
    %317 = tpu.reciprocal %316 {approx = true} : vector<1x1xf32> -> vector<1x1xf32>
    %318 = vector.broadcast %317 : vector<1x1xf32> to vector<61x1xf32>
    %319 = arith.mulf %314, %318 : vector<61x1xf32>
    %320 = vector.broadcast %319 : vector<61x1xf32> to vector<61x64xf32>
    %321 = arith.mulf %280, %320 : vector<61x64xf32>
    %cst_142 = arith.constant dense<0.000000e+00> : vector<64xf32>
    %322 = vector.multi_reduction <add>, %321, %cst_142 [0] : vector<61x64xf32> to vector<64xf32>
    %323 = vector.shape_cast %322 : vector<64xf32> to vector<1x64xf32>
    %324 = arith.addf %323, %46 : vector<1x64xf32>
    %c0_143 = arith.constant 0 : index
    %c2_144 = arith.constant 2 : index
    %c0_145 = arith.constant 0 : index
    %325 = vector.load %arg5[%c0_143, %c2_144, %c0_145] : memref<1x4x64xf32, #tpu.memory_space<vmem>>, vector<1x1x64xf32>
    %326 = vector.shape_cast %325 : vector<1x1x64xf32> to vector<1x64xf32>
    %327 = vector.shape_cast %324 : vector<1x64xf32> to vector<1x1x64xf32>
    tpu.vector_store %arg5[%c0_143, %c2_144, %c0_145], %327 {strides = array<i32>} : memref<1x4x64xf32, #tpu.memory_space<vmem>>, vector<1x1x64xf32>,
    %328 = vector.broadcast %319 : vector<61x1xf32> to vector<61x64xf32>
    %329 = arith.mulf %278, %328 : vector<61x64xf32>
    %c32_146 = arith.constant 32 : index
    %c0_147 = arith.constant 0 : index
    %330 = vector.load %arg6[%c32_146, %c0_147] : memref<104x128xf32, #tpu.memory_space<vmem>>, vector<61x64xf32>
    tpu.vector_store %arg6[%c32_146, %c0_147], %329 {strides = array<i32>} : memref<104x128xf32, #tpu.memory_space<vmem>>, vector<61x64xf32>,
    %331 = vector.broadcast %43 : vector<61x1xf32> to vector<61x32xf32>
    %332 = arith.mulf %274, %331 : vector<61x32xf32>
    %c32_148 = arith.constant 32 : index
    %c64_149 = arith.constant 64 : index
    %333 = vector.load %arg6[%c32_148, %c64_149] : memref<104x128xf32, #tpu.memory_space<vmem>>, vector<61x32xf32>
    tpu.vector_store %arg6[%c32_148, %c64_149], %332 {strides = array<i32>} : memref<104x128xf32, #tpu.memory_space<vmem>>, vector<61x32xf32>,
    %c22_150 = arith.constant 22 : index
    %c0_151 = arith.constant 0 : index
    %334 = vector.load %arg6[%c22_150, %c0_151] : memref<104x128xf32, #tpu.memory_space<vmem>>, vector<61x128xf32>
    %335 = arith.truncf %334 : vector<61x128xf32> to vector<61x128xbf16>
    %c23_152 = arith.constant 23 : index
    %c0_153 = arith.constant 0 : index
    %336 = vector.load %arg6[%c23_152, %c0_153] : memref<104x128xf32, #tpu.memory_space<vmem>>, vector<61x128xf32>
    %337 = arith.truncf %336 : vector<61x128xf32> to vector<61x128xbf16>
    %c24_154 = arith.constant 24 : index
    %c0_155 = arith.constant 0 : index
    %338 = vector.load %arg6[%c24_154, %c0_155] : memref<104x128xf32, #tpu.memory_space<vmem>>, vector<61x128xf32>
    %339 = arith.truncf %338 : vector<61x128xf32> to vector<61x128xbf16>
    %c31_156 = arith.constant 31 : index
    %c0_157 = arith.constant 0 : index
    %340 = vector.load %arg6[%c31_156, %c0_157] : memref<104x128xf32, #tpu.memory_space<vmem>>, vector<61x128xf32>
    %341 = arith.truncf %340 : vector<61x128xf32> to vector<61x128xbf16>
    %c32_158 = arith.constant 32 : index
    %c0_159 = arith.constant 0 : index
    %342 = vector.load %arg6[%c32_158, %c0_159] : memref<104x128xf32, #tpu.memory_space<vmem>>, vector<61x128xf32>
    %343 = arith.truncf %342 : vector<61x128xf32> to vector<61x128xbf16>
    %c33_160 = arith.constant 33 : index
    %c0_161 = arith.constant 0 : index
    %344 = vector.load %arg6[%c33_160, %c0_161] : memref<104x128xf32, #tpu.memory_space<vmem>>, vector<61x128xf32>
    %345 = arith.truncf %344 : vector<61x128xf32> to vector<61x128xbf16>
    %c40_162 = arith.constant 40 : index
    %c0_163 = arith.constant 0 : index
    %346 = vector.load %arg6[%c40_162, %c0_163] : memref<104x128xf32, #tpu.memory_space<vmem>>, vector<61x128xf32>
    %347 = arith.truncf %346 : vector<61x128xf32> to vector<61x128xbf16>
    %c41_164 = arith.constant 41 : index
    %c0_165 = arith.constant 0 : index
    %348 = vector.load %arg6[%c41_164, %c0_165] : memref<104x128xf32, #tpu.memory_space<vmem>>, vector<61x128xf32>
    %349 = arith.truncf %348 : vector<61x128xf32> to vector<61x128xbf16>
    %c42_166 = arith.constant 42 : index
    %c0_167 = arith.constant 0 : index
    %350 = vector.load %arg6[%c42_166, %c0_167] : memref<104x128xf32, #tpu.memory_space<vmem>>, vector<61x128xf32>
    %351 = arith.truncf %350 : vector<61x128xf32> to vector<61x128xbf16>
    %352 = tpu.concatenate %335, %337, %339, %341, %343, %345, %347, %349, %351 in 1 : vector<61x128xbf16>, vector<61x128xbf16>, vector<61x128xbf16>, vector<61x128xbf16>, vector<61x128xbf16>, vector<61x128xbf16>, vector<61x128xbf16>, vector<61x128xbf16>, vector<61x128xbf16> -> vector<61x1152xbf16>
    %c0_168 = arith.constant 0 : index
    %c0_169 = arith.constant 0 : index
    %353 = vector.load %arg3[%c0_168, %c0_169] : memref<1152x128xbf16, #tpu.memory_space<vmem>>, vector<1152x128xbf16>
    %cst_170 = arith.constant dense<0.000000e+00> : vector<61x128xf32>
    %354 = tpu.matmul %352, %353, %cst_170 {dimension_numbers = #tpu.dot_dimension_numbers<[1], [0], [0], [1], [0, 0, 1, 1], [], []>} : vector<61x1152xbf16>, vector<1152x128xbf16>, vector<61x128xf32> -> vector<61x128xf32>
    %355 = vector.broadcast %45 : vector<1x128xf32> to vector<61x128xf32>
    %356 = arith.addf %354, %355 : vector<61x128xf32>
    %357 = vector.extract_strided_slice %356 {offsets = [0, 0], sizes = [61, 32], strides = [1, 1]} : vector<61x128xf32> to vector<61x32xf32>
    %cst_171 = arith.constant 5.000000e-01 : f32
    %358 = vector.broadcast %cst_171 : f32 to vector<61x32xf32>
    %359 = arith.mulf %358, %357 : vector<61x32xf32>
    %360 = math.tanh %359 : vector<61x32xf32>
    %cst_172 = arith.constant 5.000000e-01 : f32
    %361 = vector.broadcast %cst_172 : f32 to vector<61x32xf32>
    %362 = arith.mulf %361, %360 : vector<61x32xf32>
    %cst_173 = arith.constant 5.000000e-01 : f32
    %363 = vector.broadcast %cst_173 : f32 to vector<61x32xf32>
    %364 = arith.addf %362, %363 : vector<61x32xf32>
    %365 = vector.extract_strided_slice %356 {offsets = [0, 32], sizes = [61, 32], strides = [1, 1]} : vector<61x128xf32> to vector<61x32xf32>
    %cst_174 = arith.constant 5.000000e-01 : f32
    %366 = vector.broadcast %cst_174 : f32 to vector<61x32xf32>
    %367 = arith.mulf %366, %365 : vector<61x32xf32>
    %368 = math.tanh %367 : vector<61x32xf32>
    %cst_175 = arith.constant 5.000000e-01 : f32
    %369 = vector.broadcast %cst_175 : f32 to vector<61x32xf32>
    %370 = arith.mulf %369, %368 : vector<61x32xf32>
    %cst_176 = arith.constant 5.000000e-01 : f32
    %371 = vector.broadcast %cst_176 : f32 to vector<61x32xf32>
    %372 = arith.addf %370, %371 : vector<61x32xf32>
    %373 = vector.extract_strided_slice %356 {offsets = [0, 64], sizes = [61, 32], strides = [1, 1]} : vector<61x128xf32> to vector<61x32xf32>
    %374 = math.tanh %373 : vector<61x32xf32>
    %375 = arith.mulf %374, %364 : vector<61x32xf32>
    %376 = arith.mulf %272, %372 : vector<61x32xf32>
    %377 = arith.addf %375, %376 : vector<61x32xf32>
    %378 = vector.broadcast %43 : vector<61x1xf32> to vector<61x32xf32>
    %379 = arith.mulf %377, %378 : vector<61x32xf32>
    %cst_177 = arith.constant dense<0.000000e+00> : vector<32xf32>
    %380 = vector.multi_reduction <add>, %379, %cst_177 [0] : vector<61x32xf32> to vector<32xf32>
    %381 = vector.shape_cast %380 : vector<32xf32> to vector<1x32xf32>
    %cst_178 = arith.constant 0.0204081628 : f32
    %382 = vector.broadcast %cst_178 : f32 to vector<1x32xf32>
    %383 = arith.mulf %381, %382 : vector<1x32xf32>
    %c24_179 = arith.constant 24 : index
    %c0_180 = arith.constant 0 : index
    %384 = vector.load %arg4[%c24_179, %c0_180] : memref<56x128xf32, #tpu.memory_space<vmem>>, vector<32x12xf32>
    %c18 = arith.constant 18 : index
    %c0_181 = arith.constant 0 : index
    %385 = vector.load %arg4[%c18, %c0_181] : memref<56x128xf32, #tpu.memory_space<vmem>>, vector<1x12xf32>
    %cst_182 = arith.constant dense<0.000000e+00> : vector<1x12xf32>
    %386 = tpu.matmul %383, %384, %cst_182 {dimension_numbers = #tpu.dot_dimension_numbers<[1], [0], [0], [1], [0, 0, 1, 1], [], []>} : vector<1x32xf32>, vector<32x12xf32>, vector<1x12xf32> -> vector<1x12xf32>
    %387 = arith.addf %386, %385 : vector<1x12xf32>
    %cst_183 = arith.constant 0.000000e+00 : f32
    %388 = vector.broadcast %cst_183 : f32 to vector<1x64xf32>
    %c0_184 = arith.constant 0 : index
    %c3 = arith.constant 3 : index
    %c0_185 = arith.constant 0 : index
    %389 = vector.load %arg5[%c0_184, %c3, %c0_185] : memref<1x4x64xf32, #tpu.memory_space<vmem>>, vector<1x1x64xf32>
    %390 = vector.shape_cast %389 : vector<1x1x64xf32> to vector<1x64xf32>
    %391 = vector.shape_cast %388 : vector<1x64xf32> to vector<1x1x64xf32>
    tpu.vector_store %arg5[%c0_184, %c3, %c0_185], %391 {strides = array<i32>} : memref<1x4x64xf32, #tpu.memory_space<vmem>>, vector<1x1x64xf32>,
    %c0_186 = arith.constant 0 : index
    %c3_187 = arith.constant 3 : index
    %c0_188 = arith.constant 0 : index
    %392 = vector.load %arg5[%c0_186, %c3_187, %c0_188] : memref<1x4x64xf32, #tpu.memory_space<vmem>>, vector<1x1x32xf32>
    %393 = vector.shape_cast %392 : vector<1x1x32xf32> to vector<1x32xf32>
    %394 = vector.shape_cast %383 : vector<1x32xf32> to vector<1x1x32xf32>
    tpu.vector_store %arg5[%c0_186, %c3_187, %c0_188], %394 {strides = array<i32>} : memref<1x4x64xf32, #tpu.memory_space<vmem>>, vector<1x1x32xf32>,
    %c0_189 = arith.constant 0 : index
    %c3_190 = arith.constant 3 : index
    %c32_191 = arith.constant 32 : index
    %395 = vector.load %arg5[%c0_189, %c3_190, %c32_191] : memref<1x4x64xf32, #tpu.memory_space<vmem>>, vector<1x1x12xf32>
    %396 = vector.shape_cast %395 : vector<1x1x12xf32> to vector<1x12xf32>
    %397 = vector.shape_cast %387 : vector<1x12xf32> to vector<1x1x12xf32>
    tpu.vector_store %arg5[%c0_189, %c3_190, %c32_191], %397 {strides = array<i32>} : memref<1x4x64xf32, #tpu.memory_space<vmem>>, vector<1x1x12xf32>,
    return
  }
  func.func @transform_0(%arg0: i32) -> (i32, i32, i32, i32) {
    %c0_i32 = arith.constant 0 : i32
    %c0_i32_0 = arith.constant 0 : i32
    %c0_i32_1 = arith.constant 0 : i32
    %c0_i32_2 = arith.constant 0 : i32
    return %arg0, %c0_i32, %c0_i32_0, %c0_i32_1 : i32, i32, i32, i32
  }
  func.func @transform_1(%arg0: i32) -> (i32, i32, i32) {
    %c0_i32 = arith.constant 0 : i32
    %c0_i32_0 = arith.constant 0 : i32
    %c0_i32_1 = arith.constant 0 : i32
    return %arg0, %c0_i32, %c0_i32_0 : i32, i32, i32
  }
  func.func @transform_2(%arg0: i32) -> (i32, i32) {
    %c0_i32 = arith.constant 0 : i32
    %c0_i32_0 = arith.constant 0 : i32
    %c0_i32_1 = arith.constant 0 : i32
    return %c0_i32, %c0_i32_0 : i32, i32
  }
  func.func @transform_3(%arg0: i32) -> (i32, i32) {
    %c0_i32 = arith.constant 0 : i32
    %c0_i32_0 = arith.constant 0 : i32
    %c0_i32_1 = arith.constant 0 : i32
    return %c0_i32, %c0_i32_0 : i32, i32
  }
  func.func @transform_4(%arg0: i32) -> (i32, i32, i32) {
    %c0_i32 = arith.constant 0 : i32
    %c0_i32_0 = arith.constant 0 : i32
    %c0_i32_1 = arith.constant 0 : i32
    return %arg0, %c0_i32, %c0_i32_0 : i32, i32, i32
  }
}

</mosaic_0001>

<bundles_post_ra>
// kernel: attention_model_forward.1
= control target key start
LH: loop header
LB: loop body
LE: loop exit
PB: predicated region body
PF: predicated region fallthrough
CT: control target
= control target key end

     0   :  { %s6288_s15 = smov 0   ;;  %s8044_s0 = inlined_call_operand.vmem [shape: f32[2,3,61,192], index: 0, kind: input, shape index: {}]   ;;  %s8045_s1 = inlined_call_operand.vmem [shape: f32[2,3,16], index: 1, kind: input, shape index: {}]   ;;  %s8046_s2 = inlined_call_operand.vmem [shape: bf16[1152,128], index: 2, kind: input, shape index: {}]   ;;  %s8047_s3 = inlined_call_operand.vmem [shape: f32[56,128], index: 3, kind: input, shape index: {}]   ;;  %s8048_s4 = inlined_call_operand.vmem [shape: f32[2,4,64], index: 4, kind: output, shape index: {}]  }
   0x1 LB: > { %s4920_s16 = sadd.s32 4294967295, %s6254_s15   ;;  %p4924_p0 = scmp.ge.s32.totalorder %s6254_s15, 1  ;;  %s6254_s15 = sphi %s6288_s15, %s14_s15  }
   0x2   : > { %p171_p1 = scmp.lt.s32.totalorder %s6254_s15, 3 }
   0x4   : > { %p172_p2 = pnand %p4924_p0, %p171_p1 }
   0x6   : > { %175 = sbr.rel (%p172_p2) target bundleno = 3374 (0xd2e), region = 36 }
   0xd   : > { %p200_p3 = scmp.lt.s32.totalorder %s4920_s16, 1  ;;  %vm8049_vm0 = vcmask 122880   ;;  %v227_v2 = vlaneseq  ;;  %v6256_v9 = vmov 0.0   ;;  %v460_v23 = vld [vmem:[%s8047_s3] sm:$0xff]  ;;  %v461_v24 = vld [vmem:[%s8047_s3 + $0x8] sm:$0xff]  ;;  %vm8051_vm5 = vcmask 523264  }
   0xe   : > { %214 = vst [vmem:[#allocation2] sm:$0xff] %v6256_v9  ;;  %216 = vst [vmem:[#allocation2 + $0x10] sm:$0xff] %v6256_v9  ;;  %vm8050_vm6 = vcmask 520192   ;;  %s6258_s6 = smov 64   ;;  %s6259_s12 = smov 32  }
   0xf   : > { %s8159_s16 = smov (!%p200_p3, %s4920_s16), 1  ;;  %v6308_v3 = vand.u32 127, %v227_v2  ;;  %217 = vst [vmem:[#allocation2 + $0x18] sm:$0xff] %v6256_v9  ;;  %218 = vst [vmem:[#allocation2 + $0x20] sm:$0xff] %v6256_v9  ;;  %v6324_v14 = vshrl.u32 %v227_v2, 7  ;;  %s6260_s18 = smov 96  }
  0x10   : > { %s4926_s17 = sshll.u32 %s8159_s16, 2  ;;  %219 = vst [vmem:[#allocation2 + $0x28] sm:$0xff] %v6256_v9  ;;  %220 = vst [vmem:[#allocation2 + $0x30] sm:$0xff] %v6256_v9  ;;  %s5823_s25 = smul.u32 384, %s8159_s16 }
  0x11   : > { %s6304_s20 = scalar_lea.vmem %s8045_s1, %s4926_s17  ;;  %221 = vst [vmem:[#allocation2 + $0x38] sm:$0xff] %v6256_v9  ;;  %222 = vst [vmem:[#allocation2 + $0x40] sm:$0xff] %v6256_v9  ;;  %v6327_v18 = vsub.s32 0, %v6324_v14  ;;  %v6330_v20 = vadd.s32 8, %v6324_v14  ;;  %v230_v62 = vadd.s32 16, %v6324_v14  ;;  %v231_v63 = vadd.s32 24, %v6324_v14  ;;  %s6417_s5 = scalar_lea.vmem %s8048_s4, %s4926_s17 }
  0x12   : > { %v480_v0 = vld [vmem:[%s6304_s20] sm:$0x1]  ;;  %223 = vst [vmem:[#allocation2 + $0x48] sm:$0xff] %v6256_v9  ;;  %224 = vst [vmem:[#allocation2 + $0x50] sm:$0xff] %v6256_v9  ;;  %s6349_s28 = scalar_lea.vmem %s8044_s0, %s5823_s25 }
  0x13   : > { %v484_v1 = vsel %vm8049_vm0, %v480_v0, -inf  ;;  %225 = vst [vmem:[#allocation2 + $0x58] sm:$0xff] %v6256_v9  ;;  %226 = vst [vmem:[#allocation2 + $0x60] sm:$0xff] %v6256_v9  ;;  %v6352_v37 = vld [vmem:[%s6349_s28 + $0x70] sm:$0x1f]  ;;  %v6355_v38 = vld [vmem:[%s6349_s28] sm:$0xff] }
  0x14   : > { %485 = vmax.xlane.f32.xlu0 %v484_v1  ;;  %v6358_v40 = vld [vmem:[%s6349_s28 + $0x10] sm:$0xff]  ;;  %v6361_v41 = vld [vmem:[%s6349_s28 + $0x20] sm:$0xff]  ;;  %v233_v1 = vadd.s32 40, %v6324_v14  ;;  %v238_v2 = vadd.s32 10, %v230_v62 }
  0x15   : > { %v6370_v48 = vld [vmem:[%s6349_s28 + $0x30] sm:$0xff]  ;;  %v6373_v49 = vld [vmem:[%s6349_s28 + $0x40] sm:$0xff] }
  0x16   : > { %v6380_v54 = vld [vmem:[%s6349_s28 + $0x50] sm:$0xff]  ;;  %v6383_v55 = vld [vmem:[%s6349_s28 + $0x60] sm:$0xff]  ;;  %vm286_vm7 = vcmp.ge.s32.totalorder %v238_v2, 27 }
  0xa1   : > { %v486_v4 = vpop.xlane.xlu0 %485 }
  0xa2   : > { %vm487_vm1 = vcmp.eq.f32.partialorder %v480_v0, %v486_v4  ;;  %v232_v0 = vadd.s32 32, %v6324_v14  ;;  %v234_v4 = vadd.s32 48, %v6324_v14 }
  0xa3   : > { %v488_v5 = vsel %vm487_vm1, %v6308_v3, 16 }
  0xa4   : > { %v489_v6 = vsel %vm8049_vm0, %v488_v5, 2147483647  ;;  %v239_v5 = vadd.s32 10, %v231_v63 }
  0xa5   : > { %v491_v7 = vshra.s32 %v489_v6, 16  ;;  %v490_v10 = vand.u32 65535, %v489_v6  ;;  %v240_v6 = vadd.s32 10, %v232_v0 }
  0xa6   : > { %vm311_vm8 = vcmp.ge.s32.totalorder %v239_v5, 36 }
  0xa7   : > { %v493_v8 = vcvt.s32.f32 %v491_v7  ;;  %v492_v12 = vcvt.s32.f32 %v490_v10  ;;  %v241_v7 = vadd.s32 10, %v233_v1  ;;  %vm336_vm9 = vcmp.ge.s32.totalorder %v240_v6, 45 }
  0xa8   : > { %v6257_v10 = vmov 0  }
  0xa9   : > { %494 = vmin.xlane.f32.xlu0 %v493_v8  ;;  %vm361_vm10 = vcmp.ge.s32.totalorder %v241_v7, 54 }
 0x136   : > { %v495_v11 = vpop.xlane.xlu0 %494 }
 0x137   : > { %vm496_vm2 = vcmp.eq.f32.partialorder %v493_v8, %v495_v11  ;;  %v501_v15 = vcvt.f32.s32 %v495_v11  ;;  %v242_v8 = vadd.s32 10, %v234_v4  ;;  %v294_v11 = vsel %vm286_vm7, 1, %v6257_v10 }
 0x138   : > { %v497_v13 = vsel %vm496_vm2, %v492_v12, inf  ;;  %v319_v12 = vsel %vm311_vm8, 1, %v6257_v10 }
 0x139   : > { %498 = vmin.xlane.f32.xlu1 %v497_v13  ;;  %v502_v17 = vshll.u32 %v501_v15, 16  ;;  %vm386_vm11 = vcmp.ge.s32.totalorder %v242_v8, 63  ;;  %v344_v13 = vsel %vm336_vm9, 1, %v6257_v10  ;;  %v302_v15 = vadd.s32 2, %v294_v11 }
 0x1c6   : > { %v499_v16 = vpop.xlane.xlu1 %498 }
 0x1c7   : > { %v500_v19 = vcvt.f32.s32 %v499_v16  ;;  %v369_v16 = vsel %vm361_vm10, 1, %v6257_v10 }
 0x1c9   : > { %v503_v21 = vadd.s32 %v502_v17, %v500_v19  ;;  %v327_v17 = vadd.s32 3, %v319_v12  ;;  %v394_v19 = vsel %vm386_vm11, 1, %v6257_v10 }
 0x1cb   : > { %v507_v22 = vrot.slane %v503_v21, %v6327_v18  ;;  %v352_v21 = vadd.s32 4, %v344_v13 }
 0x1cd   : > { %vm508_vm3 = vcmp.eq.s32.totalorder %v6324_v14, %v507_v22  ;;  %vm509_vm4 = vcmp.eq.s32.totalorder %v6330_v20, %v507_v22  ;;  %v377_v22 = vadd.s32 5, %v369_v16 }
 0x1ce   : > { %v4939_v25 = vsel %vm508_vm3, 1.0, %v6256_v9  ;;  %v4940_v26 = vsel %vm509_vm4, 1.0, %v6256_v9 }
 0x1cf   : > { %v514_v27 = vmul.f32 %v4939_v25, %v460_v23  ;;  %v515_v28 = vmul.f32 %v4940_v26, %v461_v24  ;;  %v235_v23 = vadd.s32 56, %v6324_v14  ;;  %v406_v24 = vmul.u32 9, %v302_v15 }
 0x1d0   : > { %v402_v25 = vadd.s32 6, %v394_v19  ;;  %v407_v26 = vmul.u32 9, %v327_v17 }
 0x1d1   : > { %v517_v29 = vsel %vm8051_vm5, %v514_v27, 0.0  ;;  %v518_v30 = vsel %vm8051_vm5, %v515_v28, 0.0  ;;  %v408_v27 = vmul.u32 9, %v352_v21  ;;  %v409_v28 = vmul.u32 9, %v377_v22 }
 0x1d2   : > { %v519_v31 = vadd.f32 %v518_v30, %v517_v29  ;;  %v243_v29 = vadd.s32 10, %v235_v23  ;;  %v414_v30 = vsub.s32 %v238_v2, %v406_v24 }
 0x1d4   : > { %v520_v32 = vrot.slane %v519_v31, 4  ;;  %vm422_vm12 = vcmp.ge.s32.totalorder %v414_v30, 1  ;;  %vm430_vm13 = vcmp.le.s32.totalorder %v414_v30, 7 }
 0x1d5   : > { %vm6399_vm3 = vmand %vm422_vm12, %vm430_vm13 }
 0x1d6   : > { %v521_v33 = vadd.f32 %v520_v32, %v519_v31  ;;  %v410_v31 = vmul.u32 9, %v402_v25  ;;  %v415_v32 = vsub.s32 %v239_v5, %v407_v26 }
 0x1d8   : > { %v522_v34 = vrot.slane %v521_v33, 2  ;;  %vm423_vm14 = vcmp.ge.s32.totalorder %v415_v32, 1  ;;  %vm431_vm15 = vcmp.le.s32.totalorder %v415_v32, 7 }
 0x1d9   : > { %vm439_vm9 = vmand %vm423_vm14, %vm431_vm15  ;;  %vm675_vm14 = vcmask 516096  }
 0x1da   : > { %v523_v35 = vadd.f32 %v522_v34, %v521_v33  ;;  %v236_v33 = vadd.s32 10, %v6324_v14  ;;  %v237_v34 = vadd.s32 10, %v6330_v20  ;;  %4845 = vst.msk [vmem:[%s6417_s5 + $0x3] sm:$0x1] %vm675_vm14, %v6256_v9 }
 0x1dc   : > { %v524_v36 = vrot.slane %v523_v35, 1 }
 0x1de   : > { %v525_v39 = vadd.f32 %v524_v36, %v523_v35  ;;  %v416_v35 = vsub.s32 %v240_v6, %v408_v27  ;;  %v417_v36 = vsub.s32 %v241_v7, %v409_v28 }
 0x1e0   : > { %v533_v42 = vmul.f32 %v525_v39, %v6352_v37  ;;  %v526_v43 = vmul.f32 %v525_v39, %v6355_v38  ;;  %v527_v46 = vmul.f32 %v525_v39, %v6358_v40  ;;  %v528_v47 = vmul.f32 %v525_v39, %v6361_v41 }
 0x1e1   : > { %v529_v52 = vmul.f32 %v525_v39, %v6370_v48  ;;  %v530_v53 = vmul.f32 %v525_v39, %v6373_v49  ;;  %v531_v58 = vmul.f32 %v525_v39, %v6380_v54  ;;  %v532_v59 = vmul.f32 %v525_v39, %v6383_v55 }
 0x1e2   : > { %v556_v44 = vsel %vm8050_vm6, %v533_v42, 0.0  ;;  %v534_v45 = vsel %vm8051_vm5, %v526_v43, 0.0  ;;  %v537_v50 = vsel %vm8051_vm5, %v527_v46, 0.0  ;;  %v540_v51 = vsel %vm8051_vm5, %v528_v47, 0.0 }
 0x1e3   : > { %557 = vadd.xlane.f32.xlu1 %v556_v44  ;;  %535 = vadd.xlane.f32.xlu0 %v534_v45  ;;  %v543_v56 = vsel %vm8051_vm5, %v529_v52, 0.0  ;;  %v546_v57 = vsel %vm8051_vm5, %v530_v53, 0.0  ;;  %v549_v60 = vsel %vm8051_vm5, %v531_v58, 0.0  ;;  %v552_v61 = vsel %vm8051_vm5, %v532_v59, 0.0 }
 0x1e4   : > { %v4930_v39 = vadd.s32 4294967233, %v243_v29  ;;  %v418_v42 = vsub.s32 %v242_v8, %v410_v31  ;;  %v4928_v43 = vadd.s32 4294967287, %v236_v33  ;;  %v4929_v44 = vadd.s32 4294967278, %v237_v34 }
 0x1e5   : > { %vm424_vm1 = vcmp.ge.s32.totalorder %v416_v35, 1  ;;  %vm432_vm2 = vcmp.le.s32.totalorder %v416_v35, 7  ;;  %vm425_vm4 = vcmp.ge.s32.totalorder %v417_v36, 1  ;;  %vm433_vm7 = vcmp.le.s32.totalorder %v417_v36, 7 }
 0x1e6   : > { %vm435_vm8 = vcmp.le.s32.totalorder %v4930_v39, 7  ;;  %vm426_vm10 = vcmp.ge.s32.totalorder %v418_v42, 1  ;;  %vm434_vm11 = vcmp.le.s32.totalorder %v418_v42, 7  ;;  %vm440_vm0 = vmand %vm424_vm1, %vm432_vm2  ;;  %vm428_vm6 = vcmp.le.s32.totalorder %v4928_v43, 7 }
 0x1e7   : > { %538 = vadd.xlane.f32.xlu1 %v537_v50  ;;  %541 = vadd.xlane.f32.xlu0 %v540_v51  ;;  %vm421_vm5 = vcmp.ge.s32.totalorder %v4929_v44, 1  ;;  %vm441_vm12 = vmand %vm425_vm4, %vm433_vm7  ;;  %v6404_v46 = vsel %vm435_vm8, 1.0, %v6256_v9  ;;  %v6407_v51 = vsel %vm439_vm9, 1.0, %v6256_v9  ;;  %v6410_v52 = vsel %vm440_vm0, 1.0, %v6256_v9 }
 0x1e8   : > { %8067 = vst [vmem:[#allocation3_spill] sm:$0xff] %v6404_v46  ;;  %vm442_vm13 = vmand %vm426_vm10, %vm434_vm11  ;;  %v6420_v53 = vsel %vm428_vm6, 1.0, %v6256_v9  ;;  %v6429_v58 = vsel %vm6399_vm3, 1.0, %v6256_v9  ;;  %v6432_v59 = vsel %vm441_vm12, 1.0, %v6256_v9  ;;  %v563_v62 = vsub.f32 1.0, %v6410_v52 }
 0x1e9   : > { %v559_v63 = vsub.f32 1.0, %v6420_v53  ;;  %v561_v4 = vsub.f32 1.0, %v6429_v58  ;;  %v564_v5 = vsub.f32 1.0, %v6432_v59  ;;  %vm586_vm0 = vcmask 1044480  }
 0x1ea   : > { %v6451_v10 = vmul.f32 1e+30, %v563_v62  ;;  %vm8083_vm7 = vcmask 520192   ;;  %vm8084_vm8 = vcmask 122880   ;;  %vm733_vm9 = vcmask 785920  }
 0x1eb   : > { %544 = vadd.xlane.f32.xlu1 %v543_v56  ;;  %547 = vadd.xlane.f32.xlu0 %v546_v57  ;;  %v6423_v56 = vsel %vm421_vm5, 1.0, %v6256_v9  ;;  %v566_v57 = vsub.f32 1.0, %v6404_v46  ;;  %v6453_v11 = vmul.f32 1e+30, %v559_v63  ;;  %v6457_v16 = vmul.f32 1e+30, %v561_v4 }
 0x1ec   : > { %v560_v0 = vsub.f32 1.0, %v6423_v56  ;;  %8070 = vst [vmem:[#allocation6_spill] sm:$0xff] %v6451_v10  ;;  %v6459_v17 = vmul.f32 1e+30, %v564_v5  ;;  %vm8076_vm5 = vcmask 523264  }
 0x1ed   : > { %v6447_v7 = vmul.f32 1e+30, %v566_v57  ;;  %8071 = vst [vmem:[#allocation7_spill] sm:$0xff] %v6453_v11  ;;  %8073 = vst [vmem:[#allocation9_spill] sm:$0xff] %v6457_v16 }
 0x1ee   : > { %v6455_v12 = vmul.f32 1e+30, %v560_v0  ;;  %8074 = vst [vmem:[#allocation10_spill] sm:$0xff] %v6459_v17  ;;  %vm8077_vm6 = vmmov %vm8076_vm5 }
 0x1ef   : > { %550 = vadd.xlane.f32.xlu1 %v549_v60  ;;  %553 = vadd.xlane.f32.xlu0 %v552_v61  ;;  %v6435_v60 = vsel %vm442_vm13, 1.0, %v6256_v9  ;;  %v562_v61 = vsub.f32 1.0, %v6407_v51  ;;  %8068 = vst [vmem:[#allocation4_spill] sm:$0xff] %v6447_v7  ;;  %vm8078_vm15 = vmmov %vm8076_vm5 }
 0x1f0   : > { %v565_v6 = vsub.f32 1.0, %v6435_v60  ;;  %8072 = vst [vmem:[#allocation8_spill] sm:$0xff] %v6455_v12  ;;  %vm8079_vm1 = vmmov %vm8076_vm5 }
 0x1f1   : > { %v6449_v8 = vmul.f32 1e+30, %v562_v61  ;;  %vm8080_vm2 = vmmov %vm8079_vm1 }
 0x1f2   : > { %v6461_v19 = vmul.f32 1e+30, %v565_v6  ;;  %vm8081_vm3 = vmmov %vm8079_vm1 }
 0x1f3   : > { %8069 = vst [vmem:[#allocation5_spill] sm:$0xff] %v6449_v8  ;;  %vm8082_vm4 = vmmov %vm8079_vm1 }
 0x1f4   : > { %8075 = vst [vmem:[#allocation11_spill] sm:$0xff] %v6461_v19  ;;  %vm8085_vm10 = vmmov %vm8079_vm1 }
 0x1f5   : > { %vm8086_vm11 = vmmov %vm8079_vm1 }
 0x1f6   : > { %vm8087_vm12 = vmmov %vm8079_vm1 }
 0x1f7   : > { %vm8088_vm13 = vmmov %vm8079_vm1 }
 0x270   : > { %v558_v47 = vpop.xlane.xlu1 %557  ;;  %v536_v50 = vpop.xlane.xlu0 %535 }
 0x271   : > { %v582_v21 = vsub.f32 %v558_v47, %v6447_v7  ;;  %v575_v24 = vsub.f32 %v536_v50, %v6453_v11 }
 0x273   : > { %v587_v31 = vsel %vm586_vm0, %v582_v21, -inf }
 0x274   : > { %v539_v1 = vpop.xlane.xlu1 %538  ;;  %v542_v2 = vpop.xlane.xlu0 %541 }
 0x275   : > { %v576_v27 = vsub.f32 %v539_v1, %v6455_v12  ;;  %v577_v28 = vsub.f32 %v542_v2, %v6457_v16 }
 0x278   : > { %v545_v13 = vpop.xlane.xlu1 %544  ;;  %v548_v15 = vpop.xlane.xlu0 %547 }
 0x279   : > { %v578_v22 = vsub.f32 %v545_v13, %v6449_v8  ;;  %v579_v23 = vsub.f32 %v548_v15, %v6451_v10 }
 0x27b   : > { %v588_v32 = vmax.f32 %v578_v22, %v587_v31  ;;  %v583_v33 = vmax.f32 %v575_v24, %v579_v23 }
 0x27c   : > { %v551_v25 = vpop.xlane.xlu1 %550  ;;  %v554_v26 = vpop.xlane.xlu0 %553 }
 0x27d   : > { %v580_v29 = vsub.f32 %v551_v25, %v6459_v17  ;;  %v581_v30 = vsub.f32 %v554_v26, %v6461_v19 }
 0x27f   : > { %v584_v34 = vmax.f32 %v576_v27, %v580_v29  ;;  %v585_v35 = vmax.f32 %v577_v28, %v581_v30 }
 0x281   : > { %v589_v36 = vmax.f32 %v583_v33, %v584_v34  ;;  %v590_v39 = vmax.f32 %v585_v35, %v588_v32 }
 0x283   : > { %v591_v42 = vmax.f32 %v589_v36, %v590_v39 }
 0x285   : > { %v592_v43 = vrot.slane %v591_v42, 4 }
 0x287   : > { %v593_v44 = vmax.f32 %v591_v42, %v592_v43 }
 0x289   : > { %v594_v45 = vrot.slane %v593_v44, 2 }
 0x28b   : > { %v595_v47 = vmax.f32 %v593_v44, %v594_v45 }
 0x28d   : > { %v596_v50 = vrot.slane %v595_v47, 1 }
 0x28f   : > { %v597_v57 = vmax.f32 %v595_v47, %v596_v50 }
 0x291   : > { %v598_v61 = vsub.f32 %v575_v24, %v597_v57  ;;  %v599_v62 = vsub.f32 %v576_v27, %v597_v57  ;;  %v600_v63 = vsub.f32 %v577_v28, %v597_v57  ;;  %v601_v0 = vsub.f32 %v578_v22, %v597_v57 }
 0x292   : > { %v602_v4 = vsub.f32 %v579_v23, %v597_v57  ;;  %v603_v6 = vsub.f32 %v580_v29, %v597_v57  ;;  %v605_v15 = vsub.f32 %v582_v21, %v597_v57  ;;  %v604_v25 = vsub.f32 %v581_v30, %v597_v57 }
 0x293   : > { %v606_v1 = vmul.f32 1.442695, %v598_v61  ;;  %v608_v2 = vmul.f32 1.442695, %v599_v62  ;;  %v610_v5 = vmul.f32 1.442695, %v600_v63 }
 0x294   : > { %v612_v13 = vmul.f32 1.442695, %v601_v0  ;;  %v614_v26 = vmul.f32 1.442695, %v602_v4  ;;  %v616_v31 = vmul.f32 1.442695, %v603_v6 }
 0x295   : > { %6055 = vpow2.f32 %v606_v1  ;;  %v620_v32 = vmul.f32 1.442695, %v605_v15  ;;  %v618_v24 = vmul.f32 1.442695, %v604_v25  ;;  %v473_v1 = vld [vmem:[%s6349_s28 + $0x18] sm:$0xff]  ;;  %v474_v6 = vld [vmem:[%s6349_s28 + $0x28] sm:$0xff] }
 0x296   : > { %6057 = vpow2.f32 %v608_v2  ;;  %v472_v2 = vld [vmem:[%s6349_s28 + $0x8] sm:$0xff] }
 0x297   : > { %6059 = vpow2.f32 %v610_v5 }
 0x298   : > { %6061 = vpow2.f32 %v612_v13 }
 0x299   : > { %6063 = vpow2.f32 %v614_v26 }
 0x29a   : > { %6065 = vpow2.f32 %v616_v31 }
 0x29b   : > { %6067 = vpow2.f32 %v620_v32 }
 0x29c   : > { %6069 = vpow2.f32 %v618_v24 }
 0x29f   : > { %v6056_v27 = vpop.eup %6055 }
 0x2a0   : > { %v6058_v22 = vpop.eup %6057 }
 0x2a1   : > { %v622_v23 = vadd.f32 %v6058_v22, %v6056_v27  ;;  %v6060_v28 = vpop.eup %6059 }
 0x2a2   : > { %v6062_v29 = vpop.eup %6061 }
 0x2a3   : > { %v623_v33 = vadd.f32 %v6060_v28, %v622_v23  ;;  %v6064_v35 = vpop.eup %6063 }
 0x2a4   : > { %v6066_v30 = vpop.eup %6065 }
 0x2a5   : > { %v624_v34 = vadd.f32 %v6062_v29, %v623_v33  ;;  %v6068_v36 = vpop.eup %6067  ;;  %v475_v33 = vld [vmem:[%s6349_s28 + $0x38] sm:$0xff] }
 0x2a6   : > { %v6070_v42 = vpop.eup %6069  ;;  %v628_v44 = vsel %vm586_vm0, %v6068_v36, 0.0 }
 0x2a7   : > { %v625_v21 = vadd.f32 %v6064_v35, %v624_v34 }
 0x2a9   : > { %v626_v39 = vadd.f32 %v6066_v30, %v625_v21  ;;  %v476_v21 = vld [vmem:[%s6349_s28 + $0x48] sm:$0xff] }
 0x2ab   : > { %v627_v43 = vadd.f32 %v6070_v42, %v626_v39 }
 0x2ad   : > { %v629_v45 = vadd.f32 %v628_v44, %v627_v43 }
 0x2af   : > { %v630_v47 = vrot.slane %v629_v45, 4 }
 0x2b1   : > { %v631_v50 = vadd.f32 %v630_v47, %v629_v45  ;;  %v478_v47 = vld [vmem:[%s6349_s28 + $0x68] sm:$0xff] }
 0x2b3   : > { %v632_v57 = vrot.slane %v631_v50, 2 }
 0x2b5   : > { %v633_v61 = vadd.f32 %v632_v57, %v631_v50 }
 0x2b7   : > { %v634_v62 = vrot.slane %v633_v61, 1 }
 0x2b9   : > { %v635_v63 = vadd.f32 %v634_v62, %v633_v61  ;;  %v5841_v61 = vld [vmem:[%s8046_s2 + $0x48] sm:$0xff]  }
 0x2bb   : > { %6071 = vrcp.f32 %v635_v63 }
 0x2c5   : > { %v6072_v0 = vpop.eup %6071 }
 0x2c6   : > { %v638_v4 = vmul.f32 %v6072_v0, %v6058_v22  ;;  %v637_v5 = vmul.f32 %v6072_v0, %v6056_v27  ;;  %v639_v13 = vmul.f32 %v6072_v0, %v6060_v28  ;;  %v642_v15 = vmul.f32 %v6072_v0, %v6066_v30 }
 0x2c7   : > { %v640_v25 = vmul.f32 %v6072_v0, %v6062_v29  ;;  %v641_v26 = vmul.f32 %v6072_v0, %v6064_v35  ;;  %v477_v29 = vld [vmem:[%s6349_s28 + $0x58] sm:$0xff] }
 0x2c8   : > { %v678_v31 = vmul.f32 %v638_v4, %v6358_v40  ;;  %v646_v32 = vmul.f32 %v638_v4, %v473_v1  ;;  %v677_v24 = vmul.f32 %v637_v5, %v6355_v38  ;;  %v645_v23 = vmul.f32 %v637_v5, %v472_v2  ;;  %v5842_v4 = vld [vmem:[%s8046_s2 + $0x8] sm:$0xff]  }
 0x2c9   : > { %v647_v34 = vmul.f32 %v639_v13, %v474_v6  ;;  %v644_v40 = vmul.f32 %v6072_v0, %v6068_v36  ;;  %v648_v35 = vmul.f32 %v640_v25, %v475_v33  ;;  %v643_v38 = vmul.f32 %v6072_v0, %v6070_v42  ;;  %v5839_v36 = vld [vmem:[%s8046_s2 + $0x40] sm:$0xff]   ;;  %v479_v42 = vld [vmem:[%s6349_s28 + $0x78] sm:$0x1f] }
 0x2ca   : > { %695 = vrot.lane.b32.xlu0 %v678_v31, %s6258_s6  ;;  %v654_v27 = vsel %vm8076_vm5, %v646_v32, 0.0  ;;  %693 = vrot.lane.b32.xlu1 %v677_v24, %s6258_s6  ;;  %v653_v22 = vsel %vm8077_vm6, %v645_v23, 0.0  ;;  %v682_v30 = vmul.f32 %v642_v15, %v6380_v54  ;;  %v679_v43 = vmul.f32 %v639_v13, %v6361_v41  ;;  %v5840_v54 = vld [vmem:[%s8046_s2] sm:$0xff]   ;;  %v5844_v31 = vld [vmem:[%s8046_s2 + $0x10] sm:$0xff]   ;;  %vm8089_vm6 = vmmov %vm8083_vm7 }
 0x2cb   : > { %v655_v28 = vadd.f32 %v654_v27, %v653_v22  ;;  %v656_v39 = vsel %vm8078_vm15, %v647_v34, 0.0  ;;  %v649_v44 = vmul.f32 %v641_v26, %v476_v21  ;;  %v650_v50 = vmul.f32 %v642_v15, %v477_v29  ;;  %5197 = vmatprep.subr.bf16.mxu0 %v5839_v36  ;;  %v5845_v24 = vld [vmem:[%s8046_s2 + $0x58] sm:$0xff]   ;;  %v5847_v34 = vld [vmem:[%s8046_s2 + $0x60] sm:$0xff]   ;;  %v463_v29 = vld [vmem:[%s8047_s3 + $0x11] sm:$0x1] }
 0x2cc   : > { %v658_v57 = vsel %vm8079_vm1, %v648_v35, 0.0  ;;  %v684_v62 = vmul.f32 %v644_v40, %v6352_v37  ;;  %v680_v63 = vmul.f32 %v640_v25, %v6370_v48  ;;  %v651_v1 = vmul.f32 %v643_v38, %v478_v47  ;;  %5198 = vmatpush3.bf16.msra.mxu0 %v5840_v54  ;;  %v5843_v37 = vld [vmem:[%s8046_s2 + $0x50] sm:$0xff]   ;;  %v5846_v33 = vld [vmem:[%s8046_s2 + $0x18] sm:$0xff]   ;;  %v5856_v36 = vld [vmem:[%s8046_s2 + $0x80] sm:$0xff]  }
 0x2cd   : > { %v657_v45 = vadd.f32 %v656_v39, %v655_v28  ;;  %v660_v0 = vsel %vm8080_vm2, %v649_v44, 0.0  ;;  %v662_v5 = vsel %vm8081_vm3, %v650_v50, 0.0  ;;  %v652_v6 = vmul.f32 %v644_v40, %v479_v42  ;;  %5199 = vmatprep.subr.bf16.mxu0 %v5841_v61  ;;  %v5849_v39 = vld [vmem:[%s8046_s2 + $0x68] sm:$0xff]   ;;  %v5851_v44 = vld [vmem:[%s8046_s2 + $0x70] sm:$0xff]   ;;  %v5853_v47 = vld [vmem:[%s8046_s2 + $0x78] sm:$0xff]  }
 0x2ce   : > { %703 = vrot.lane.b32.xlu0 %v682_v30, %s6258_s6  ;;  %697 = vrot.lane.b32.xlu1 %v679_v43, %s6258_s6  ;;  %v681_v13 = vmul.f32 %v641_v26, %v6373_v49  ;;  %v664_v15 = vsel %vm8082_vm4, %v651_v1, 0.0  ;;  %v683_v49 = vmul.f32 %v643_v38, %v6383_v55  ;;  %v5848_v55 = vld [vmem:[%s8046_s2 + $0x20] sm:$0xff]   ;;  %v5850_v43 = vld [vmem:[%s8046_s2 + $0x28] sm:$0xff]   ;;  %vm741_vm5 = vcmask 782848   ;;  %vm8090_vm15 = vmmov %vm8079_vm1 }
 0x2cf   : > { %v659_v41 = vadd.f32 %v658_v57, %v657_v45  ;;  %v666_v32 = vsel %vm8083_vm7, %v652_v6, 0.0  ;;  %v6541_v38 = vld [vmem:[%s6304_s20 + $0x1] sm:$0x1]  ;;  %v5852_v45 = vld [vmem:[%s8046_s2 + $0x30] sm:$0xff]   ;;  %v5855_v57 = vld [vmem:[%s8046_s2 + $0x38] sm:$0xff]  }
 0x2d0   : > { %5200 = vmatpush3.bf16.msra.mxu0 %v5842_v4  ;;  %v1924_v30 = vsel %vm8084_vm8, %v6541_v38, -inf  ;;  %v5854_v50 = vld [vmem:[%s8046_s2 + $0xc0] sm:$0xff]   ;;  %v5857_v54 = vld [vmem:[%s8046_s2 + $0xc8] sm:$0xff]   ;;  %v5861_v61 = vld [vmem:[%s8046_s2 + $0xd0] sm:$0xff]  }
 0x2d1   : > { %v661_v2 = vadd.f32 %v660_v0, %v659_v41  ;;  %5201 = vmatprep.subr.bf16.mxu0 %v5843_v37  ;;  %5237 = vmatprep.subr.bf16.mxu1 %v5854_v50  ;;  %v5858_v42 = vld [vmem:[%s8046_s2 + $0x140] sm:$0xff]   ;;  %v5859_v41 = vld [vmem:[%s8046_s2 + $0x88] sm:$0xff]   ;;  %v5867_v0 = vld [vmem:[%s8046_s2 + $0x98] sm:$0xff]  }
 0x2d2   : > { %707 = vrot.lane.b32.xlu0 %v684_v62, %s6258_s6  ;;  %699 = vrot.lane.b32.xlu1 %v680_v63, %s6258_s6  ;;  %v5863_v62 = vld [vmem:[%s8046_s2 + $0x90] sm:$0xff]   ;;  %v5865_v63 = vld [vmem:[%s8046_s2 + $0xd8] sm:$0xff]   ;;  %vm8091_vm2 = vmmov %vm8079_vm1 }
 0x2d3   : > { %v663_v48 = vadd.f32 %v662_v5, %v661_v2  ;;  %5238 = vmatpush3.bf16.msra.mxu1 %v5856_v36  ;;  %v5869_v1 = vld [vmem:[%s8046_s2 + $0xe0] sm:$0xff]   ;;  %v5873_v4 = vld [vmem:[%s8046_s2 + $0xe8] sm:$0xff]   ;;  %v5877_v6 = vld [vmem:[%s8046_s2 + $0xf0] sm:$0xff]  }
 0x2d4   : > { %5202 = vmatpush3.bf16.msra.mxu0 %v5844_v31  ;;  %5239 = vmatprep.subr.bf16.mxu1 %v5857_v54  ;;  %v5871_v2 = vld [vmem:[%s8046_s2 + $0xa0] sm:$0xff]   ;;  %v5875_v5 = vld [vmem:[%s8046_s2 + $0xa8] sm:$0xff]   ;;  %v5879_v37 = vld [vmem:[%s8046_s2 + $0xb0] sm:$0xff]   ;;  %v725_v31 = vmul.f32 0.0, %v6420_v53 }
 0x2d5   : > { %v665_v25 = vadd.f32 %v664_v15, %v663_v48  ;;  %5203 = vmatprep.subr.bf16.mxu0 %v5845_v24  ;;  %v5881_v48 = vld [vmem:[%s8046_s2 + $0xf8] sm:$0xff]   ;;  %v5886_v15 = vld [vmem:[%s8046_s2 + $0x1c0] sm:$0xff]   ;;  %v5889_v54 = vld [vmem:[%s8046_s2 + $0x1c8] sm:$0xff]  }
 0x2d6   : > { %701 = vrot.lane.b32.xlu1 %v681_v13, %s6258_s6  ;;  %v5883_v13 = vld [vmem:[%s8046_s2 + $0xb8] sm:$0xff]   ;;  %v5888_v50 = vld [vmem:[%s8046_s2 + $0x180] sm:$0xff]   ;;  %vm8092_vm4 = vmmov %vm8084_vm8 }
 0x2d7   : > { %v667_v23 = vadd.f32 %v666_v32, %v665_v25  ;;  %5240 = vmatpush3.bf16.msra.mxu1 %v5859_v41  ;;  %v726_v25 = vmul.f32 0.0, %v6423_v56  ;;  %v5864_v41 = vld [vmem:[%s8046_s2 + $0x108] sm:$0xff]  }
 0x2d8   : > { %5204 = vmatpush3.bf16.msra.mxu0 %v5846_v33  ;;  %5241 = vmatprep.subr.bf16.mxu1 %v5861_v61 }
 0x2d9   : > { %v668_v26 = vrot.slane %v667_v23, 4  ;;  %5205 = vmatprep.subr.bf16.mxu0 %v5847_v34  ;;  %v732_v34 = vmul.f32 0.0, %v6404_v46 }
 0x2da   : > { %705 = vrot.lane.b32.xlu1 %v683_v49, %s6258_s6  ;;  %v727_v49 = vmul.f32 0.0, %v6429_v58 }
 0x2db   : > { %v669_v21 = vadd.f32 %v668_v26, %v667_v23  ;;  %5242 = vmatpush3.bf16.msra.mxu1 %v5863_v62  ;;  %v730_v23 = vmul.f32 0.0, %v6432_v59  ;;  %v731_v62 = vmul.f32 0.0, %v6435_v60 }
 0x2dc   : > { %5206 = vmatpush3.bf16.msra.mxu0 %v5848_v55  ;;  %5243 = vmatprep.subr.bf16.mxu1 %v5865_v63  ;;  %v743_v55 = vld [vmem:[#allocation2 + $0x16] sm:$0xff] }
 0x2dd   : > { %v670_v27 = vrot.slane %v669_v21, 2  ;;  %5207 = vmatprep.subr.bf16.mxu0 %v5849_v39 }
 0x2df   : > { %v671_v22 = vadd.f32 %v670_v27, %v669_v21  ;;  %5244 = vmatpush3.bf16.msra.mxu1 %v5867_v0  ;;  %v728_v21 = vmul.f32 0.0, %v6407_v51  ;;  %v755_v27 = vld [vmem:[#allocation2 + $0x17] sm:$0xff] }
 0x2e0   : > { %5208 = vmatpush3.bf16.msra.mxu0 %v5850_v43  ;;  %5245 = vmatprep.subr.bf16.mxu1 %v5869_v1 }
 0x2e1   : > { %v672_v28 = vrot.slane %v671_v22, 1  ;;  %5209 = vmatprep.subr.bf16.mxu0 %v5851_v44  ;;  %v5860_v44 = vld [vmem:[%s8046_s2 + $0x100] sm:$0xff]  }
 0x2e3   : > { %v673_v40 = vadd.f32 %v672_v28, %v671_v22  ;;  %5246 = vmatpush3.bf16.msra.mxu1 %v5871_v2 }
 0x2e4   : > { %5210 = vmatpush3.bf16.msra.mxu0 %v5852_v45  ;;  %5247 = vmatprep.subr.bf16.mxu1 %v5873_v4  ;;  %v5866_v4 = vld [vmem:[%s8046_s2 + $0x150] sm:$0xff]  }
 0x2e5   : > { %v674_v35 = vadd.f32 %v673_v40, %v463_v29  ;;  %5211 = vmatprep.subr.bf16.mxu0 %v5853_v47 }
 0x2e7   : > { %676 = vst.msk [vmem:[%s6417_s5] sm:$0x1] %vm675_vm14, %v674_v35  ;;  %5248 = vmatpush3.bf16.msra.mxu1 %v5875_v5  ;;  %v5892_v5 = vld [vmem:[%s8046_s2 + $0x1d0] sm:$0xff]  }
 0x2e8   : > { %5212 = vmatpush3.bf16.msra.mxu0 %v5855_v57  ;;  %5249 = vmatprep.subr.bf16.mxu1 %v5877_v6  ;;  %v5862_v57 = vld [vmem:[%s8046_s2 + $0x148] sm:$0xff]  }
 0x2e9   : > { %5277 = vmatprep.subr.bf16.mxu0 %v5858_v42 }
 0x2eb   : > { %5250 = vmatpush3.bf16.msra.mxu1 %v5879_v37 }
 0x2ec   : > { %5251 = vmatprep.subr.bf16.mxu1 %v5881_v48 }
 0x2ef   : > { %5252 = vmatpush3.bf16.msra.mxu1 %v5883_v13 }
 0x2f0   : > { %5317 = vmatprep.subr.bf16.mxu1 %v5886_v15 }
 0x2fe   : > { %1925 = vmax.xlane.f32.xlu1 %v1924_v30  ;;  %v729_v30 = vmul.f32 0.0, %v6410_v52 }
 0x33c   : > { %v696_v32 = vpop.permute.xlu0 %695  ;;  %v694_v24 = vpop.permute.xlu1 %693 }
 0x33d   : > { %718 = vst.msk [vmem:[#allocation2 + $0x28] sm:$0xff] %vm8085_vm10, %v696_v32  ;;  %v5894_v32 = vld [vmem:[%s8046_s2 + $0x190] sm:$0xff]  }
 0x33e   : > { %717 = vst.msk [vmem:[#allocation2 + $0x20] sm:$0xff] %vm8086_vm11, %v694_v24  ;;  %v5870_v24 = vld [vmem:[%s8046_s2 + $0x158] sm:$0xff]   ;;  %vm8093_vm11 = vmmov %vm8079_vm1 }
 0x33f   : > { %735 = vst.msk [vmem:[#allocation2 + $0x28] sm:$0xff] %vm733_vm9, %v726_v25  ;;  %734 = vst.msk [vmem:[#allocation2 + $0x20] sm:$0xff] %vm733_vm9, %v725_v31  ;;  %v5868_v25 = vld [vmem:[%s8046_s2 + $0x110] sm:$0xff]  }
 0x340   : > { %v704_v26 = vpop.permute.xlu0 %703  ;;  %v698_v33 = vpop.permute.xlu1 %697 }
 0x341   : > { %722 = vst.msk [vmem:[#allocation2 + $0x48] sm:$0xff] %vm8087_vm12, %v704_v26  ;;  %vm8094_vm12 = vmmov %vm8079_vm1 }
 0x342   : > { %719 = vst.msk [vmem:[#allocation2 + $0x30] sm:$0xff] %vm8088_vm13, %v698_v33  ;;  %vm8095_vm13 = vmmov %vm8089_vm6 }
 0x343   : > { %739 = vst.msk [vmem:[#allocation2 + $0x48] sm:$0xff] %vm733_vm9, %v730_v23  ;;  %736 = vst.msk [vmem:[#allocation2 + $0x30] sm:$0xff] %vm733_vm9, %v727_v49  ;;  %v5895_v23 = vld [vmem:[%s8046_s2 + $0x1d8] sm:$0xff]  }
 0x344   : > { %v708_v22 = vpop.permute.xlu0 %707  ;;  %v700_v28 = vpop.permute.xlu1 %699  ;;  %v5872_v49 = vld [vmem:[%s8046_s2 + $0x118] sm:$0xff]  }
 0x345   : > { %724 = vst.msk [vmem:[#allocation2 + $0x58] sm:$0x1f] %vm8089_vm6, %v708_v22  ;;  %vm8096_vm6 = vmmov %vm8079_vm1 }
 0x346   : > { %720 = vst.msk [vmem:[#allocation2 + $0x38] sm:$0xff] %vm8090_vm15, %v700_v28  ;;  %v756_v29 = vld [vmem:[#allocation2 + $0x1f] sm:$0xff]  ;;  %v757_v35 = vld [vmem:[#allocation2 + $0x27] sm:$0xff]  ;;  %vm8097_vm15 = vmmov %vm8079_vm1 }
 0x347   : > { %v744_v40 = vld [vmem:[#allocation2 + $0x1e] sm:$0xff]  ;;  %742 = vst.msk [vmem:[#allocation2 + $0x58] sm:$0x1f] %vm741_vm5, %v732_v34  ;;  %v763_v39 = vpack.c.bf16 %v756_v29, %v755_v27  ;;  %v781_v45 = vpack.c.bf16 %v757_v35, %v756_v29  ;;  %v745_v0 = vld [vmem:[#allocation2 + $0x26] sm:$0xff] }
 0x348   : > { %737 = vst.msk [vmem:[#allocation2 + $0x38] sm:$0xff] %vm733_vm9, %v728_v21  ;;  %v751_v43 = vpack.c.bf16 %v744_v40, %v743_v55  ;;  %v6639_v47 = vld [vmem:[#allocation2 + $0x20] sm:$0xff]  ;;  %v702_v42 = vpop.permute.xlu1 %701  ;;  %v6669_v37 = vld [vmem:[#allocation2 + $0x28] sm:$0xff]  ;;  %v5897_v34 = vld [vmem:[%s8046_s2 + $0x198] sm:$0xff]  }
 0x349   : > { %v775_v36 = vpack.c.bf16 %v6639_v47, %v6256_v9  ;;  %1437 = vmatprep.mubr.bf16.mxu0 %v763_v39  ;;  %1502 = vmatprep.mubr.bf16.mxu1 %v781_v45  ;;  %721 = vst.msk [vmem:[#allocation2 + $0x40] sm:$0xff] %vm8079_vm1, %v702_v42  ;;  %v5891_v9 = vld [vmem:[%s8046_s2 + $0x188] sm:$0xff]   ;;  %v5874_v29 = vld [vmem:[%s8046_s2 + $0x160] sm:$0xff]  }
 0x34a   : > { %1438 = vmatmul.mubr.bf16.vlgmr.msra.gmra.mrb[0].mxu0 %v751_v43  ;;  %v758_v61 = vld [vmem:[#allocation2 + $0x2f] sm:$0xff]  ;;  %738 = vst.msk [vmem:[#allocation2 + $0x40] sm:$0xff] %vm733_vm9, %v729_v30  ;;  %v5898_v40 = vld [vmem:[%s8046_s2 + $0x1e0] sm:$0xff]  }
 0x34b   : > { %1503 = vmatmul.mubr.bf16.vlgmr.msra.gmra.mrb[0].mxu1 %v775_v36  ;;  %5278 = vmatpush3.bf16.msra.mxu0 %v5860_v44  ;;  %v764_v63 = vpack.c.bf16 %v758_v61, %v757_v35  ;;  %v746_v1 = vld [vmem:[#allocation2 + $0x2e] sm:$0xff]  ;;  %v5876_v44 = vld [vmem:[%s8046_s2 + $0x120] sm:$0xff]  }
 0x34c   : > { %5318 = vmatpush3.bf16.msra.mxu1 %v5888_v50  ;;  %v6661_v2 = vld [vmem:[#allocation2 + $0x30] sm:$0xff]  ;;  %5279 = vmatprep.subr.bf16.mxu0 %v5862_v57  ;;  %v706_v6 = vpop.permute.xlu1 %705  ;;  %v752_v48 = vpack.c.bf16 %v746_v1, %v745_v0  ;;  %v5878_v36 = vld [vmem:[%s8046_s2 + $0x168] sm:$0xff]  }
 0x34d   : > { %5319 = vmatprep.subr.bf16.mxu1 %v5889_v54  ;;  %1445 = vmatprep.mubr.bf16.mxu0 %v764_v63  ;;  %723 = vst.msk [vmem:[#allocation2 + $0x50] sm:$0xff] %vm8091_vm2, %v706_v6  ;;  %v6674_v15 = vpack.c.bf16 %v6661_v2, %v6669_v37  ;;  %v5900_v54 = vld [vmem:[%s8046_s2 + $0x1a0] sm:$0xff]   ;;  %v5901_v42 = vld [vmem:[%s8046_s2 + $0x1e8] sm:$0xff]   ;;  %vm8098_vm2 = vmmov %vm8079_vm1 }
 0x34e   : > { %740 = vst.msk [vmem:[#allocation2 + $0x50] sm:$0xff] %vm733_vm9, %v731_v62  ;;  %v791_v1 = vld [vmem:[#allocation2 + $0x21] sm:$0xff] }
 0x34f   : > { %v759_v13 = vld [vmem:[#allocation2 + $0x37] sm:$0xff]  ;;  %5280 = vmatpush3.bf16.msra.mxu0 %v5864_v41  ;;  %v6732_v6 = vld [vmem:[#allocation2 + $0x48] sm:$0xff] }
 0x350   : > { %5320 = vmatpush3.bf16.msra.mxu1 %v5891_v9  ;;  %v782_v31 = vpack.c.bf16 %v759_v13, %v758_v61  ;;  %5281 = vmatprep.subr.bf16.mxu0 %v5866_v4  ;;  %v747_v27 = vld [vmem:[#allocation2 + $0x36] sm:$0xff]  ;;  %v5880_v61 = vld [vmem:[%s8046_s2 + $0x128] sm:$0xff]  }
 0x351   : > { %5321 = vmatprep.subr.bf16.mxu1 %v5892_v5  ;;  %v760_v26 = vld [vmem:[#allocation2 + $0x3f] sm:$0xff]  ;;  %v761_v33 = vld [vmem:[#allocation2 + $0x47] sm:$0xff]  ;;  %v5882_v9 = vld [vmem:[%s8046_s2 + $0x170] sm:$0xff]  }
 0x352   : > { %1510 = vmatprep.mubr.bf16.mxu1 %v782_v31  ;;  %1446 = vmatmul.mubr.bf16.gmra.mrb[4].mxu0 %v752_v48  ;;  %v765_v21 = vpack.c.bf16 %v760_v26, %v759_v13  ;;  %v748_v55 = vld [vmem:[#allocation2 + $0x3e] sm:$0xff]  ;;  %v783_v22 = vpack.c.bf16 %v761_v33, %v760_v26  ;;  %v749_v62 = vld [vmem:[#allocation2 + $0x46] sm:$0xff]  ;;  %v5904_v48 = vld [vmem:[%s8046_s2 + $0x1f0] sm:$0xff]  }
 0x353   : > { %1511 = vmatmul.mubr.bf16.gmra.mrb[4].mxu1 %v6674_v15  ;;  %5282 = vmatpush3.bf16.msra.mxu0 %v5868_v25  ;;  %v6696_v28 = vld [vmem:[#allocation2 + $0x40] sm:$0xff]  ;;  %v6704_v35 = vld [vmem:[#allocation2 + $0x38] sm:$0xff]  ;;  %v753_v30 = vpack.c.bf16 %v748_v55, %v747_v27  ;;  %v792_v4 = vld [vmem:[#allocation2 + $0x29] sm:$0xff] }
 0x354   : > { %5322 = vmatpush3.bf16.msra.mxu1 %v5894_v32  ;;  %5283 = vmatprep.subr.bf16.mxu0 %v5870_v24  ;;  %v6708_v43 = vpack.c.bf16 %v6696_v28, %v6704_v35  ;;  %v5903_v5 = vld [vmem:[%s8046_s2 + $0x1a8] sm:$0xff]   ;;  %v5884_v31 = vld [vmem:[%s8046_s2 + $0x130] sm:$0xff]   ;;  %v799_v32 = vpack.c.bf16 %v792_v4, %v791_v1  ;;  %v5885_v24 = vld [vmem:[%s8046_s2 + $0x178] sm:$0xff]  }
 0x355   : > { %5323 = vmatprep.subr.bf16.mxu1 %v5895_v23  ;;  %1453 = vmatprep.mubr.bf16.mxu0 %v765_v21  ;;  %v762_v39 = vld [vmem:[#allocation2 + $0x4f] sm:$0x1f]  ;;  %v780_v57 = vld [vmem:[#allocation2 + $0x57] sm:$0x1f]  ;;  %v5890_v21 = vld [vmem:[%s8046_s2 + $0x200] sm:$0xff]  }
 0x356   : > { %1518 = vmatprep.mubr.bf16.mxu1 %v783_v22  ;;  %v766_v45 = vpack.c.bf16 %v762_v39, %v761_v33  ;;  %v779_v50 = vld [vmem:[#allocation2 + $0x4f] sm:$0xff]  ;;  %v5907_v26 = vld [vmem:[%s8046_s2 + $0x1f8] sm:$0xff]   ;;  %v787_v22 = vpack.c.bf16 %v6669_v37, %v6639_v47  ;;  %v788_v47 = vpack.c.bf16 %v6704_v35, %v6661_v2  ;;  %v789_v2 = vpack.c.bf16 %v6732_v6, %v6696_v28 }
 0x357   : > { %5284 = vmatpush3.bf16.msra.mxu0 %v5872_v49  ;;  %v784_v41 = vpack.c.bf16 %v780_v57, %v779_v50  ;;  %v750_v63 = vld [vmem:[#allocation2 + $0x4e] sm:$0x1f]  ;;  %v794_v27 = vld [vmem:[#allocation2 + $0x39] sm:$0xff] }
 0x358   : > { %5324 = vmatpush3.bf16.msra.mxu1 %v5897_v34  ;;  %5285 = vmatprep.subr.bf16.mxu0 %v5874_v29  ;;  %v774_v0 = vld [vmem:[#allocation2 + $0x50] sm:$0x1f]  ;;  %v754_v13 = vpack.c.bf16 %v750_v63, %v749_v62  ;;  %v5887_v34 = vld [vmem:[%s8046_s2 + $0x138] sm:$0xff]  }
 0x359   : > { %5325 = vmatprep.subr.bf16.mxu1 %v5898_v40  ;;  %v778_v25 = vpack.c.bf16 %v774_v0, %v6732_v6  ;;  %v793_v23 = vld [vmem:[#allocation2 + $0x31] sm:$0xff]  ;;  %v5893_v40 = vld [vmem:[%s8046_s2 + $0x208] sm:$0xff]   ;;  %v807_v35 = vld [vmem:[#allocation2 + $0x59] sm:$0xff] }
 0x35a   : > { %1454 = vmatmul.mubr.bf16.gmra.mrb[8].mxu0 %v753_v30  ;;  %v5906_v49 = vld [vmem:[%s8046_s2 + $0x1b0] sm:$0xff]   ;;  %v809_v33 = vpack.c.bf16 %v793_v23, %v792_v4  ;;  %v5909_v55 = vld [vmem:[%s8046_s2 + $0x1b8] sm:$0xff]   ;;  %v800_v29 = vpack.c.bf16 %v794_v27, %v793_v23  ;;  %v795_v30 = vld [vmem:[#allocation2 + $0x41] sm:$0xff] }
 0x35b   : > { %1519 = vmatmul.mubr.bf16.gmra.mrb[8].mxu1 %v6708_v43  ;;  %5286 = vmatpush3.bf16.msra.mxu0 %v5876_v44  ;;  %v810_v39 = vpack.c.bf16 %v795_v30, %v794_v27  ;;  %v5896_v44 = vld [vmem:[%s8046_s2 + $0x210] sm:$0xff]   ;;  %v5899_v50 = vld [vmem:[%s8046_s2 + $0x218] sm:$0xff]  }
 0x35c   : > { %1461 = vmatprep.mubr.bf16.mxu0 %v766_v45  ;;  %5287 = vmatprep.subr.bf16.mxu0 %v5878_v36  ;;  %v796_v45 = vld [vmem:[#allocation2 + $0x49] sm:$0xff]  ;;  %v797_v57 = vld [vmem:[#allocation2 + $0x51] sm:$0xff] }
 0x35d   : > { %5326 = vmatpush3.bf16.msra.mxu1 %v5900_v54  ;;  %1526 = vmatprep.mubr.bf16.mxu1 %v784_v41  ;;  %v801_v37 = vpack.c.bf16 %v796_v45, %v795_v30  ;;  %v811_v36 = vpack.c.bf16 %v797_v57, %v796_v45  ;;  %v798_v54 = vld [vmem:[#allocation2 + $0x59] sm:$0x1f]  ;;  %v5908_v28 = vld [vmem:[%s8046_s2 + $0x230] sm:$0xff]  }
 0x35e   : > { %5327 = vmatprep.subr.bf16.mxu1 %v5901_v42  ;;  %v808_v42 = vld [vmem:[#allocation2 + $0x61] sm:$0x1f]  ;;  %v802_v41 = vpack.c.bf16 %v798_v54, %v797_v57  ;;  %v813_v0 = vld [vmem:[#allocation2 + $0x2a] sm:$0xff]  ;;  %v814_v1 = vld [vmem:[#allocation2 + $0x32] sm:$0xff] }
 0x35f   : > { %5288 = vmatpush3.bf16.msra.mxu0 %v5880_v61  ;;  %v785_v61 = vld [vmem:[#allocation2 + $0x50] sm:$0xff]  ;;  %v812_v63 = vpack.c.bf16 %v808_v42, %v807_v35  ;;  %v803_v4 = vld [vmem:[#allocation2 + $0x58] sm:$0xff] }
 0x360   : > { %5289 = vmatprep.subr.bf16.mxu0 %v5882_v9  ;;  %v5905_v9 = vld [vmem:[%s8046_s2 + $0x228] sm:$0xff]   ;;  %v805_v62 = vpack.c.bf16 %v785_v61, %v6732_v6  ;;  %v5910_v6 = vld [vmem:[%s8046_s2 + $0x238] sm:$0xff]   ;;  %v6795_v45 = vld [vmem:[%s8047_s3 + $0x10] ss:$0 sm:$0xff] }
 0x361   : > { %5328 = vmatpush3.bf16.msra.mxu1 %v5903_v5  ;;  %v804_v5 = vld [vmem:[#allocation2 + $0x60] sm:$0x1f]  ;;  %v818_v23 = vld [vmem:[#allocation2 + $0x52] sm:$0xff] }
 0x362   : > { %5329 = vmatprep.subr.bf16.mxu1 %v5904_v48  ;;  %1462 = vmatmul.mubr.bf16.gmra.mrb[12].mxu0 %v754_v13  ;;  %v821_v13 = vpack.c.bf16 %v814_v1, %v813_v0 }
 0x363   : > { %1527 = vmatmul.mubr.bf16.gmra.mrb[12].mxu1 %v778_v25  ;;  %5290 = vmatpush3.bf16.msra.mxu0 %v5884_v31  ;;  %v806_v25 = vpack.c.bf16 %v804_v5, %v803_v4  ;;  %v815_v31 = vld [vmem:[#allocation2 + $0x3a] sm:$0xff] }
 0x364   : > { %1567 = vmatprep.mubr.bf16.mxu0 %v799_v32  ;;  %5291 = vmatprep.subr.bf16.mxu0 %v5885_v24  ;;  %v816_v32 = vld [vmem:[#allocation2 + $0x42] sm:$0xff]  ;;  %v817_v24 = vld [vmem:[#allocation2 + $0x4a] sm:$0xff] }
 0x365   : > { %5330 = vmatpush3.bf16.msra.mxu1 %v5906_v49  ;;  %1632 = vmatprep.mubr.bf16.mxu1 %v809_v33  ;;  %v822_v49 = vpack.c.bf16 %v816_v32, %v815_v31  ;;  %v819_v33 = vld [vmem:[#allocation2 + $0x5a] sm:$0xff] }
 0x366   : > { %5331 = vmatprep.subr.bf16.mxu1 %v5907_v26  ;;  %v823_v26 = vpack.c.bf16 %v818_v23, %v817_v24 }
 0x367   : > { %5292 = vmatpush3.bf16.msra.mxu0 %v5887_v34  ;;  %v820_v34 = vld [vmem:[#allocation2 + $0x62] sm:$0x1f] }
 0x368   : > { %5718 = vmatprep.subr.bf16.mxu0 %v5890_v21 }
 0x369   : > { %5332 = vmatpush3.bf16.msra.mxu1 %v5909_v55  ;;  %v824_v55 = vpack.c.bf16 %v820_v34, %v819_v33 }
 0x36a   : > { %1568 = vmatmul.mubr.bf16.vlgmr.msra.gmra.mrb[16].mxu0 %v787_v22 }
 0x36b   : > { %5719 = vmatpush3.bf16.msra.mxu0 %v5890_v21  ;;  %1575 = vmatprep.mubr.bf16.mxu0 %v800_v29 }
 0x36c   : > { %5720 = vmatprep.subr.bf16.mxu0 %v5893_v40  ;;  %1633 = vmatmul.mubr.bf16.vlgmr.msra.gmra.mrb[16].mxu1 %v6674_v15  ;;  %v5902_v15 = vld [vmem:[%s8046_s2 + $0x220] sm:$0xff]  }
 0x36d   : > { %1640 = vmatprep.mubr.bf16.mxu1 %v810_v39 }
 0x36f   : > { %5721 = vmatpush3.bf16.msra.mxu0 %v5893_v40 }
 0x370   : > { %5722 = vmatprep.subr.bf16.mxu0 %v5896_v44 }
 0x372   : > { %1576 = vmatmul.mubr.bf16.gmra.mrb[20].mxu0 %v788_v47 }
 0x373   : > { %5723 = vmatpush3.bf16.msra.mxu0 %v5896_v44  ;;  %1583 = vmatprep.mubr.bf16.mxu0 %v801_v37 }
 0x374   : > { %5724 = vmatprep.subr.bf16.mxu0 %v5899_v50  ;;  %1641 = vmatmul.mubr.bf16.gmra.mrb[20].mxu1 %v6708_v43  ;;  %v786_v43 = vld [vmem:[#allocation2 + $0x58] sm:$0x1f] }
 0x375   : > { %1648 = vmatprep.mubr.bf16.mxu1 %v811_v36  ;;  %v790_v48 = vpack.c.bf16 %v786_v43, %v785_v61 }
 0x377   : > { %5725 = vmatpush3.bf16.msra.mxu0 %v5899_v50 }
 0x378   : > { %5726 = vmatprep.subr.bf16.mxu0 %v5902_v15 }
 0x37a   : > { %1584 = vmatmul.mubr.bf16.gmra.mrb[24].mxu0 %v789_v2 }
 0x37b   : > { %5727 = vmatpush3.bf16.msra.mxu0 %v5902_v15  ;;  %1591 = vmatprep.mubr.bf16.mxu0 %v802_v41 }
 0x37c   : > { %5728 = vmatprep.subr.bf16.mxu0 %v5905_v9  ;;  %1649 = vmatmul.mubr.bf16.gmra.mrb[24].mxu1 %v805_v62 }
 0x37d   : > { %1656 = vmatprep.mubr.bf16.mxu1 %v812_v63 }
 0x37f   : > { %5729 = vmatpush3.bf16.msra.mxu0 %v5905_v9 }
 0x380   : > { %5730 = vmatprep.subr.bf16.mxu0 %v5908_v28 }
 0x382   : > { %1592 = vmatmul.mubr.bf16.gmra.mrb[28].mxu0 %v790_v48 }
 0x383   : > { %5731 = vmatpush3.bf16.msra.mxu0 %v5908_v28  ;;  %5734 = vmatprep.mubr.bf16.mxu0 %v821_v13 }
 0x384   : > { %5732 = vmatprep.subr.bf16.mxu0 %v5910_v6  ;;  %1657 = vmatmul.mubr.bf16.gmra.mrb[28].mxu1 %v806_v25 }
 0x387   : > { %5733 = vmatpush3.bf16.msra.mxu0 %v5910_v6 }
 0x38a   : > { %5735 = vmatmul.mubr.bf16.vlgmr.msra.gmra.mrb[32].mxu0 %v822_v49 }
 0x38b   : > { %5738 = vmatprep.mubr.bf16.mxu0 %v823_v26  ;;  %v1926_v21 = vpop.xlane.xlu1 %1925 }
 0x38c   : > { %vm1927_vm3 = vcmp.eq.f32.partialorder %v6541_v38, %v1926_v21 }
 0x38d   : > { %v1928_v27 = vsel %vm1927_vm3, %v6308_v3, 16  ;;  %vm8099_vm3 = vmmov %vm8079_vm1 }
 0x38e   : > { %v1929_v22 = vsel %vm8092_vm4, %v1928_v27, 2147483647  ;;  %vm8100_vm4 = vmmov %vm8079_vm1 }
 0x38f   : > { %v1931_v29 = vshra.s32 %v1929_v22, 16  ;;  %v1930_v30 = vand.u32 65535, %v1929_v22 }
 0x391   : > { %v1933_v40 = vcvt.s32.f32 %v1931_v29  ;;  %v1932_v35 = vcvt.s32.f32 %v1930_v30 }
 0x392   : > { %5739 = vmatmul.mubr.bf16.gmra.mrb[36].mxu0 %v824_v55 }
 0x393   : > { %1934 = vmin.xlane.f32.xlu0 %v1933_v40 }
 0x41d   : > { %v5213_v39 = vpop.f32.mrb[0].mxu0 }
 0x41e   : > { %v5253_v44 = vpop.f32.mrb[0].mxu1  ;;  %v5214_v47 = vpop.f32.mrb[1].mxu0 }
 0x41f   : > { %v5254_v37 = vpop.f32.mrb[1].mxu1  ;;  %v5215_v38 = vadd.f32 %v5214_v47, %v5213_v39  ;;  %v5216_v50 = vpop.f32.mrb[2].mxu0 }
 0x420   : > { %v5255_v57 = vadd.f32 %v5254_v37, %v5253_v44  ;;  %v5256_v36 = vpop.f32.mrb[2].mxu1  ;;  %v5217_v15 = vpop.f32.mrb[3].mxu0 }
 0x421   : > { %v5257_v54 = vpop.f32.mrb[3].mxu1  ;;  %v6797_v2 = vpop.xlane.xlu0 %1934  ;;  %v1440_v42 = vadd.f32 %v5215_v38, %v6795_v45  ;;  %v5218_v41 = vadd.f32 %v5217_v15, %v5216_v50 }
 0x422   : > { %v5258_v61 = vadd.f32 %v5257_v54, %v5256_v36  ;;  %vm1936_vm7 = vcmp.eq.f32.partialorder %v1933_v40, %v6797_v2 }
 0x423   : > { %v1937_v9 = vsel %vm1936_vm7, %v1932_v35, inf  ;;  %v1443_v62 = vadd.f32 %v5218_v41, %v6795_v45  ;;  %v1505_v63 = vadd.f32 %v5255_v57, %v1440_v42  ;;  %vm8101_vm7 = vmmov %vm8079_vm1 }
 0x424   : > { %1938 = vmin.xlane.f32.xlu0 %v1937_v9 }
 0x425   : > { %v5219_v43 = vpop.f32.mrb[4].mxu0  ;;  %v1508_v28 = vadd.f32 %v5258_v61, %v1443_v62 }
 0x426   : > { %v5259_v0 = vpop.f32.mrb[4].mxu1  ;;  %v5220_v1 = vpop.f32.mrb[5].mxu0 }
 0x427   : > { %v5260_v4 = vpop.f32.mrb[5].mxu1  ;;  %v5221_v5 = vadd.f32 %v5220_v1, %v5219_v43  ;;  %v5222_v48 = vpop.f32.mrb[6].mxu0 }
 0x428   : > { %v5261_v13 = vadd.f32 %v5260_v4, %v5259_v0  ;;  %v5262_v6 = vpop.f32.mrb[6].mxu1  ;;  %v5223_v25 = vpop.f32.mrb[7].mxu0 }
 0x429   : > { %v5263_v31 = vpop.f32.mrb[7].mxu1  ;;  %v1448_v32 = vadd.f32 %v5221_v5, %v6795_v45  ;;  %v5224_v24 = vadd.f32 %v5223_v25, %v5222_v48 }
 0x42a   : > { %v5264_v23 = vadd.f32 %v5263_v31, %v5262_v6 }
 0x42b   : > { %v1451_v49 = vadd.f32 %v5224_v24, %v6795_v45  ;;  %v1513_v26 = vadd.f32 %v5261_v13, %v1448_v32 }
 0x42d   : > { %v5225_v33 = vpop.f32.mrb[8].mxu0  ;;  %v1516_v34 = vadd.f32 %v5264_v23, %v1451_v49 }
 0x42e   : > { %v5265_v21 = vpop.f32.mrb[8].mxu1  ;;  %v5226_v27 = vpop.f32.mrb[9].mxu0 }
 0x42f   : > { %v5266_v55 = vpop.f32.mrb[9].mxu1  ;;  %v5227_v22 = vadd.f32 %v5226_v27, %v5225_v33  ;;  %v5228_v29 = vpop.f32.mrb[10].mxu0 }
 0x430   : > { %v5267_v40 = vadd.f32 %v5266_v55, %v5265_v21  ;;  %v5268_v30 = vpop.f32.mrb[10].mxu1  ;;  %v5229_v39 = vpop.f32.mrb[11].mxu0 }
 0x431   : > { %v5269_v44 = vpop.f32.mrb[11].mxu1  ;;  %v1456_v47 = vadd.f32 %v5227_v22, %v6795_v45  ;;  %v5230_v37 = vadd.f32 %v5229_v39, %v5228_v29 }
 0x432   : > { %v5270_v38 = vadd.f32 %v5269_v44, %v5268_v30 }
 0x433   : > { %v1459_v50 = vadd.f32 %v5230_v37, %v6795_v45  ;;  %v1521_v57 = vadd.f32 %v5267_v40, %v1456_v47 }
 0x435   : > { %v5231_v36 = vpop.f32.mrb[12].mxu0  ;;  %v1524_v15 = vadd.f32 %v5270_v38, %v1459_v50 }
 0x436   : > { %v5271_v54 = vpop.f32.mrb[12].mxu1  ;;  %v5232_v35 = vpop.f32.mrb[13].mxu0 }
 0x437   : > { %v5272_v42 = vpop.f32.mrb[13].mxu1  ;;  %v5233_v41 = vadd.f32 %v5232_v35, %v5231_v36  ;;  %v5234_v61 = vpop.f32.mrb[14].mxu0 }
 0x438   : > { %v5273_v9 = vadd.f32 %v5272_v42, %v5271_v54  ;;  %v5274_v62 = vpop.f32.mrb[14].mxu1  ;;  %v5235_v43 = vpop.f32.mrb[15].mxu0 }
 0x439   : > { %v5275_v0 = vpop.f32.mrb[15].mxu1  ;;  %v1464_v1 = vadd.f32 %v5233_v41, %v6795_v45  ;;  %v5236_v4 = vadd.f32 %v5235_v43, %v5234_v61 }
 0x43a   : > { %v5276_v5 = vadd.f32 %v5275_v0, %v5274_v62 }
 0x43b   : > { %v1467_v48 = vadd.f32 %v5236_v4, %v6795_v45  ;;  %v1529_v13 = vadd.f32 %v5273_v9, %v1464_v1 }
 0x43d   : > { %v5293_v6 = vpop.f32.mrb[16].mxu0  ;;  %v1532_v25 = vadd.f32 %v5276_v5, %v1467_v48 }
 0x43e   : > { %v5294_v31 = vpop.f32.mrb[17].mxu0 }
 0x43f   : > { %v5295_v32 = vadd.f32 %v5294_v31, %v5293_v6  ;;  %v5296_v24 = vpop.f32.mrb[18].mxu0  ;;  %v5333_v23 = vpop.f32.mrb[16].mxu1 }
 0x440   : > { %v5297_v49 = vpop.f32.mrb[19].mxu0  ;;  %v5334_v33 = vpop.f32.mrb[17].mxu1 }
 0x441   : > { %v1570_v21 = vadd.f32 %v5295_v32, %v1505_v63  ;;  %v5298_v27 = vadd.f32 %v5297_v49, %v5296_v24  ;;  %v5335_v55 = vadd.f32 %v5334_v33, %v5333_v23  ;;  %v5336_v22 = vpop.f32.mrb[18].mxu1 }
 0x442   : > { %v5337_v29 = vpop.f32.mrb[19].mxu1 }
 0x443   : > { %v1573_v40 = vadd.f32 %v5298_v27, %v1508_v28  ;;  %v5338_v30 = vadd.f32 %v5337_v29, %v5336_v22  ;;  %v1635_v39 = vadd.f32 %v5335_v55, %v1570_v21 }
 0x445   : > { %v5299_v44 = vpop.f32.mrb[20].mxu0  ;;  %v1638_v47 = vadd.f32 %v5338_v30, %v1573_v40 }
 0x446   : > { %v5300_v45 = vpop.f32.mrb[21].mxu0 }
 0x447   : > { %v5301_v37 = vadd.f32 %v5300_v45, %v5299_v44  ;;  %v5302_v38 = vpop.f32.mrb[22].mxu0  ;;  %v5339_v50 = vpop.f32.mrb[20].mxu1 }
 0x448   : > { %v5303_v36 = vpop.f32.mrb[23].mxu0  ;;  %v5340_v54 = vpop.f32.mrb[21].mxu1 }
 0x449   : > { %v1578_v35 = vadd.f32 %v5301_v37, %v1513_v26  ;;  %v5304_v42 = vadd.f32 %v5303_v36, %v5302_v38  ;;  %v5341_v41 = vadd.f32 %v5340_v54, %v5339_v50  ;;  %v5342_v61 = vpop.f32.mrb[22].mxu1 }
 0x44a   : > { %v5343_v63 = vpop.f32.mrb[23].mxu1 }
 0x44b   : > { %v1581_v9 = vadd.f32 %v5304_v42, %v1516_v34  ;;  %v1643_v62 = vadd.f32 %v5341_v41, %v1578_v35  ;;  %v5344_v43 = vadd.f32 %v5343_v63, %v5342_v61 }
 0x44d   : > { %v5305_v0 = vpop.f32.mrb[24].mxu0  ;;  %v1646_v28 = vadd.f32 %v5344_v43, %v1581_v9 }
 0x44e   : > { %v5306_v1 = vpop.f32.mrb[25].mxu0 }
 0x44f   : > { %v5307_v4 = vadd.f32 %v5306_v1, %v5305_v0  ;;  %v5308_v5 = vpop.f32.mrb[26].mxu0  ;;  %v5345_v48 = vpop.f32.mrb[24].mxu1 }
 0x450   : > { %v5309_v6 = vpop.f32.mrb[27].mxu0  ;;  %v5346_v31 = vpop.f32.mrb[25].mxu1 }
 0x451   : > { %v1586_v32 = vadd.f32 %v5307_v4, %v1521_v57  ;;  %v5310_v24 = vadd.f32 %v5309_v6, %v5308_v5  ;;  %v5347_v23 = vadd.f32 %v5346_v31, %v5345_v48  ;;  %v5348_v49 = vpop.f32.mrb[26].mxu1 }
 0x452   : > { %v5349_v26 = vpop.f32.mrb[27].mxu1 }
 0x453   : > { %v1589_v33 = vadd.f32 %v5310_v24, %v1524_v15  ;;  %v5350_v21 = vadd.f32 %v5349_v26, %v5348_v49  ;;  %v1651_v27 = vadd.f32 %v5347_v23, %v1586_v32  ;;  %v6828_v26 = vld [vmem:[#allocation2] sm:$0xff] }
 0x455   : > { %v5311_v55 = vpop.f32.mrb[28].mxu0  ;;  %v1654_v34 = vadd.f32 %v5350_v21, %v1589_v33 }
 0x456   : > { %v5312_v22 = vpop.f32.mrb[29].mxu0 }
 0x457   : > { %v5313_v29 = vadd.f32 %v5312_v22, %v5311_v55  ;;  %v5314_v40 = vpop.f32.mrb[30].mxu0  ;;  %v5351_v30 = vpop.f32.mrb[28].mxu1  ;;  %v6239_v55 = vld [vmem:[%s8047_s3 + $0x8] sm:$0xff] }
 0x458   : > { %v5315_v44 = vpop.f32.mrb[31].mxu0  ;;  %v5352_v45 = vpop.f32.mrb[29].mxu1 }
 0x459   : > { %v1594_v37 = vadd.f32 %v5313_v29, %v1529_v13  ;;  %v5316_v38 = vadd.f32 %v5315_v44, %v5314_v40  ;;  %v5353_v50 = vadd.f32 %v5352_v45, %v5351_v30  ;;  %v5354_v36 = vpop.f32.mrb[30].mxu1 }
 0x45a   : > { %v5355_v57 = vpop.f32.mrb[31].mxu1 }
 0x45b   : > { %v1597_v54 = vadd.f32 %v5316_v38, %v1532_v25  ;;  %v1659_v35 = vadd.f32 %v5353_v50, %v1594_v37  ;;  %v5356_v42 = vadd.f32 %v5355_v57, %v5354_v36  ;;  %v6841_v50 = vld [vmem:[%s6349_s28 + $0xf0] sm:$0x1f]  ;;  %v6844_v36 = vld [vmem:[%s6349_s28 + $0x80] sm:$0xff] }
 0x45d   : > { %v5736_v41 = vpop.f32.mrb[32].mxu0  ;;  %v1662_v15 = vadd.f32 %v5356_v42, %v1597_v54  ;;  %v6847_v54 = vld [vmem:[%s6349_s28 + $0x90] sm:$0xff] }
 0x45e   : > { %v1699_v61 = vpop.f32.mrb[33].mxu0  ;;  %v6808_v63 = vadd.f32 %v5736_v41, %v1643_v62 }
 0x45f   : > { %v6810_v9 = vadd.f32 %v1699_v61, %v1635_v39  ;;  %v5737_v43 = vpop.f32.mrb[34].mxu0  ;;  %v1941_v39 = vcvt.f32.s32 %v6797_v2  ;;  %v6238_v2 = vld [vmem:[%s8047_s3] sm:$0xff] }
 0x460   : > { %v1702_v0 = vpop.f32.mrb[35].mxu0  ;;  %v6812_v1 = vadd.f32 %v5737_v43, %v1646_v28 }
 0x461   : > { %v6814_v4 = vadd.f32 %v1702_v0, %v1638_v47  ;;  %v1942_v23 = vshll.u32 %v1941_v39, 16 }
 0x465   : > { %v5740_v13 = vpop.f32.mrb[36].mxu0 }
 0x466   : > { %v1715_v5 = vpop.f32.mrb[37].mxu0  ;;  %v6816_v48 = vadd.f32 %v5740_v13, %v1659_v35  ;;  %v6850_v35 = vld [vmem:[%s6349_s28 + $0xa0] sm:$0xff]  ;;  %v6859_v13 = vld [vmem:[%s6349_s28 + $0xb0] sm:$0xff] }
 0x467   : > { %v6818_v25 = vadd.f32 %v1715_v5, %v1651_v27  ;;  %v5741_v6 = vpop.f32.mrb[38].mxu0  ;;  %v6862_v5 = vld [vmem:[%s6349_s28 + $0xc0] sm:$0xff] }
 0x468   : > { %v1718_v31 = vpop.f32.mrb[39].mxu0  ;;  %v6820_v32 = vadd.f32 %v5741_v6, %v1662_v15 }
 0x469   : > { %v6822_v62 = vadd.f32 %v1718_v31, %v1654_v34 }
 0x4b1   : > { %v1939_v24 = vpop.xlane.xlu0 %1938 }
 0x4b2   : > { %v1940_v28 = vcvt.f32.s32 %v1939_v24 }
 0x4b4   : > { %v1943_v49 = vadd.s32 %v1942_v23, %v1940_v28  ;;  %v6869_v23 = vld [vmem:[%s6349_s28 + $0xd0] sm:$0xff]  ;;  %v6872_v28 = vld [vmem:[%s6349_s28 + $0xe0] sm:$0xff] }
 0x4b6   : > { %v1947_v47 = vrot.slane %v1943_v49, %v6327_v18  ;;  %v1732_v49 = vmul.f32 0.5, %v6808_v63 }
 0x4b8   : > { %vm1948_vm8 = vcmp.eq.s32.totalorder %v6324_v14, %v1947_v47  ;;  %vm1949_vm10 = vcmp.eq.s32.totalorder %v6330_v20, %v1947_v47  ;;  %v1730_v47 = vmul.f32 0.5, %v6810_v9  ;;  %6073 = vtanh.f32 %v1732_v49 }
 0x4b9   : > { %v5030_v33 = vsel %vm1948_vm8, 1.0, %v6828_v26  ;;  %v5031_v21 = vsel %vm1949_vm10, 1.0, %v6828_v26  ;;  %vm8102_vm8 = vmmov %vm8079_vm1 }
 0x4ba   : > { %v1954_v27 = vmul.f32 %v6238_v2, %v5030_v33  ;;  %v1955_v34 = vmul.f32 %v6239_v55, %v5031_v21  ;;  %6075 = vtanh.f32 %v1730_v47  ;;  %v1731_v55 = vmul.f32 0.5, %v6814_v4  ;;  %vm8103_vm10 = vmmov %vm8079_vm1 }
 0x4bc   : > { %v1956_v22 = vsel %vm8093_vm11, %v1954_v27, 0.0  ;;  %v1957_v29 = vsel %vm8094_vm12, %v1955_v34, 0.0  ;;  %6077 = vtanh.f32 %v1731_v55  ;;  %vm8104_vm11 = vmmov %vm8079_vm1 }
 0x4bd   : > { %v1958_v40 = vadd.f32 %v1957_v29, %v1956_v22  ;;  %vm8105_vm12 = vmmov %vm8079_vm1 }
 0x4bf   : > { %v1959_v30 = vrot.slane %v1958_v40, 4 }
 0x4c1   : > { %v1960_v44 = vadd.f32 %v1959_v30, %v1958_v40  ;;  %v1733_v40 = vmul.f32 0.5, %v6812_v1 }
 0x4c2   : > { %v6074_v29 = vpop.eup %6073 }
 0x4c3   : > { %v1961_v45 = vrot.slane %v1960_v44, 2  ;;  %6079 = vtanh.f32 %v1733_v40 }
 0x4c4   : > { %v6076_v30 = vpop.eup %6075 }
 0x4c5   : > { %v1962_v37 = vadd.f32 %v1961_v45, %v1960_v44  ;;  %v1734_v44 = vmul.f32 0.5, %v6818_v25  ;;  %v1746_v45 = vmul.f32 0.5, %v6076_v30 }
 0x4c7   : > { %v1963_v38 = vrot.slane %v1962_v37, 1  ;;  %6081 = vtanh.f32 %v1734_v44 }
 0x4c9   : > { %v1964_v57 = vadd.f32 %v1963_v38, %v1962_v37  ;;  %v1748_v37 = vmul.f32 0.5, %v6074_v29  ;;  %v6078_v38 = vpop.eup %6077 }
 0x4cb   : > { %v1972_v42 = vmul.f32 %v6841_v50, %v1964_v57  ;;  %v1965_v41 = vmul.f32 %v6844_v36, %v1964_v57  ;;  %v1966_v43 = vmul.f32 %v6847_v54, %v1964_v57  ;;  %v1967_v0 = vmul.f32 %v6850_v35, %v1964_v57 }
 0x4cc   : > { %v1968_v39 = vmul.f32 %v6859_v13, %v1964_v57  ;;  %v1969_v24 = vmul.f32 %v6862_v5, %v1964_v57  ;;  %v1970_v2 = vmul.f32 %v6869_v23, %v1964_v57  ;;  %v1971_v27 = vmul.f32 %v6872_v28, %v1964_v57 }
 0x4cd   : > { %v1994_v15 = vsel %vm8095_vm13, %v1972_v42, 0.0  ;;  %v1973_v61 = vsel %vm8096_vm6, %v1965_v41, 0.0  ;;  %v1976_v6 = vsel %vm8097_vm15, %v1966_v43, 0.0  ;;  %v1979_v31 = vsel %vm8079_vm1, %v1967_v0, 0.0  ;;  %vm8106_vm13 = vmmov %vm8079_vm1 }
 0x4ce   : > { %1995 = vadd.xlane.f32.xlu0 %v1994_v15  ;;  %1974 = vadd.xlane.f32.xlu1 %v1973_v61  ;;  %v1982_v33 = vsel %vm8098_vm2, %v1968_v39, 0.0  ;;  %v1985_v21 = vsel %vm8099_vm3, %v1969_v24, 0.0  ;;  %v1988_v34 = vsel %vm8100_vm4, %v1970_v2, 0.0  ;;  %v1991_v22 = vsel %vm8101_vm7, %v1971_v27, 0.0  ;;  %vm8107_vm6 = vmmov %vm8079_vm1 }
 0x4cf   : > { %v6885_v57 = vadd.f32 0.5, %v1746_v45  ;;  %v1735_v42 = vmul.f32 0.5, %v6822_v62  ;;  %v6888_v41 = vadd.f32 0.5, %v1748_v37  ;;  %v1747_v15 = vmul.f32 0.5, %v6078_v38  ;;  %vm8108_vm15 = vmmov %vm8079_vm1 }
 0x4d0   : > { %v1736_v61 = vmul.f32 0.5, %v6816_v48  ;;  %vm8109_vm1 = vcmask 520192   ;;  %vm8110_vm3 = vcmask 122880   ;;  %vm8111_vm4 = vmmov %vm8098_vm2 }
 0x4d1   : > { %6083 = vtanh.f32 %v1735_v42  ;;  %v1810_v43 = vmul.f32 0.0, %v6885_v57  ;;  %v6894_v0 = vadd.f32 0.5, %v1747_v15  ;;  %v1812_v47 = vmul.f32 0.0, %v6888_v41  ;;  %vm8112_vm7 = vmmov %vm8098_vm2 }
 0x4d2   : > { %1977 = vadd.xlane.f32.xlu0 %v1976_v6  ;;  %1980 = vadd.xlane.f32.xlu1 %v1979_v31  ;;  %v6080_v6 = vpop.eup %6079  ;;  %6085 = vtanh.f32 %v1736_v61  ;;  %v1737_v31 = vmul.f32 0.5, %v6820_v32 }
 0x4d3   : > { %v6082_v39 = vpop.eup %6081  ;;  %v1811_v24 = vmul.f32 0.0, %v6894_v0  ;;  %v1749_v49 = vmul.f32 0.5, %v6080_v6 }
 0x4d4   : > { %6087 = vtanh.f32 %v1737_v31 }
 0x4d5   : > { %6089 = vtanh.f32 %v6810_v9 }
 0x4d6   : > { %1983 = vadd.xlane.f32.xlu0 %v1982_v33  ;;  %1986 = vadd.xlane.f32.xlu1 %v1985_v21  ;;  %v1750_v33 = vmul.f32 0.5, %v6082_v39  ;;  %v6905_v21 = vadd.f32 0.5, %v1749_v49  ;;  %6091 = vtanh.f32 %v6808_v63 }
 0x4d7   : > { %6093 = vtanh.f32 %v6814_v4 }
 0x4d8   : > { %v6910_v27 = vadd.f32 0.5, %v1750_v33  ;;  %6095 = vtanh.f32 %v6812_v1 }
 0x4da   : > { %1989 = vadd.xlane.f32.xlu0 %v1988_v34  ;;  %1992 = vadd.xlane.f32.xlu1 %v1991_v22  ;;  %v1813_v34 = vmul.f32 0.0, %v6905_v21  ;;  %v1814_v29 = vmul.f32 0.0, %v6910_v27 }
 0x4db   : > { %v6084_v2 = vpop.eup %6083 }
 0x4dc   : > { %v6086_v55 = vpop.eup %6085  ;;  %v1751_v22 = vmul.f32 0.5, %v6084_v2 }
 0x4dd   : > { %v1752_v40 = vmul.f32 0.5, %v6086_v55 }
 0x4de   : > { %v6088_v30 = vpop.eup %6087  ;;  %v6917_v44 = vadd.f32 0.5, %v1751_v22 }
 0x4df   : > { %v6922_v45 = vadd.f32 0.5, %v1752_v40  ;;  %v1753_v37 = vmul.f32 0.5, %v6088_v30 }
 0x4e0   : > { %v1815_v38 = vmul.f32 0.0, %v6917_v44 }
 0x4e1   : > { %v1816_v42 = vmul.f32 0.0, %v6922_v45  ;;  %v6929_v15 = vadd.f32 0.5, %v1753_v37 }
 0x4e3   : > { %v1817_v61 = vmul.f32 0.0, %v6929_v15 }
 0x4eb   : > { %1782 = vrot.lane.b32.xlu1 %v6888_v41, %s6258_s6 }
 0x4ef   : > { %1826 = vrot.lane.b32.xlu1 %v1810_v43, %s6259_s12 }
 0x4f0   : > { %1778 = vrot.lane.b32.xlu0 %v6885_v57, %s6258_s6 }
 0x4f3   : > { %1780 = vrot.lane.b32.xlu1 %v6894_v0, %s6258_s6 }
 0x4f4   : > { %1828 = vrot.lane.b32.xlu0 %v1811_v24, %s6259_s12 }
 0x4f7   : > { %1830 = vrot.lane.b32.xlu1 %v1812_v47, %s6259_s12 }
 0x4f8   : > { %1784 = vrot.lane.b32.xlu0 %v6905_v21, %s6258_s6 }
 0x4fb   : > { %1786 = vrot.lane.b32.xlu1 %v6910_v27, %s6258_s6 }
 0x4fc   : > { %1832 = vrot.lane.b32.xlu0 %v1813_v34, %s6259_s12 }
 0x4ff   : > { %1834 = vrot.lane.b32.xlu1 %v1814_v29, %s6259_s12 }
 0x500   : > { %1788 = vrot.lane.b32.xlu0 %v6917_v44, %s6258_s6 }
 0x503   : > { %1790 = vrot.lane.b32.xlu1 %v6922_v45, %s6258_s6 }
 0x504   : > { %1836 = vrot.lane.b32.xlu0 %v1815_v38, %s6259_s12 }
 0x507   : > { %1838 = vrot.lane.b32.xlu1 %v1816_v42, %s6259_s12 }
 0x508   : > { %1792 = vrot.lane.b32.xlu0 %v6929_v15, %s6258_s6 }
 0x50b   : > { %1840 = vrot.lane.b32.xlu1 %v1817_v61, %s6259_s12 }
 0x55b   : > { %v1996_v43 = vpop.xlane.xlu0 %1995  ;;  %v1975_v6 = vpop.xlane.xlu1 %1974 }
 0x55c   : > { %v6938_v47 = vsub.f32 %v1996_v43, %v6447_v7  ;;  %v1997_v55 = vsub.f32 %v1975_v6, %v6453_v11 }
 0x55e   : > { %v2008_v37 = vsel %vm586_vm0, %v6938_v47, -inf }
 0x55f   : > { %v1978_v31 = vpop.xlane.xlu0 %1977  ;;  %v1981_v39 = vpop.xlane.xlu1 %1980 }
 0x560   : > { %v1998_v29 = vsub.f32 %v1978_v31, %v6455_v12  ;;  %v1999_v9 = vsub.f32 %v1981_v39, %v6457_v16 }
 0x563   : > { %v1984_v24 = vpop.xlane.xlu0 %1983  ;;  %v1987_v49 = vpop.xlane.xlu1 %1986 }
 0x564   : > { %v6941_v33 = vsub.f32 %v1984_v24, %v6449_v8  ;;  %v6944_v2 = vsub.f32 %v1987_v49, %v6451_v10  ;;  %v6090_v24 = vpop.eup %6089 }
 0x566   : > { %v2009_v63 = vmax.f32 %v6941_v33, %v2008_v37  ;;  %v2005_v38 = vmax.f32 %v1997_v55, %v6944_v2  ;;  %v6092_v37 = vpop.eup %6091 }
 0x567   : > { %v1990_v34 = vpop.xlane.xlu0 %1989  ;;  %v1993_v22 = vpop.xlane.xlu1 %1992 }
 0x568   : > { %v6951_v40 = vsub.f32 %v1990_v34, %v6459_v17  ;;  %v6954_v30 = vsub.f32 %v1993_v22, %v6461_v19  ;;  %v6094_v17 = vpop.eup %6093 }
 0x569   : > { %v6096_v10 = vpop.eup %6095 }
 0x56a   : > { %v2006_v42 = vmax.f32 %v1998_v29, %v6951_v40  ;;  %v2007_v61 = vmax.f32 %v1999_v9, %v6954_v30 }
 0x56b   : > { %v1779_v43 = vpop.permute.xlu0 %1778  ;;  %v1783_v6 = vpop.permute.xlu1 %1782 }
 0x56c   : > { %v2010_v31 = vmax.f32 %v2005_v38, %v2006_v42  ;;  %v2011_v39 = vmax.f32 %v2007_v61, %v2009_v63  ;;  %v1802_v4 = vmul.f32 %v6090_v24, %v1779_v43  ;;  %v1804_v38 = vmul.f32 %v6092_v37, %v1783_v6 }
 0x56e   : > { %v2012_v49 = vmax.f32 %v2010_v31, %v2011_v39 }
 0x56f   : > { %v1829_v34 = vpop.permute.xlu0 %1828  ;;  %v1827_v22 = vpop.permute.xlu1 %1826 }
 0x570   : > { %v2013_v19 = vrot.slane %v2012_v49, 4  ;;  %v6964_v16 = vadd.f32 %v1827_v22, %v1802_v4 }
 0x572   : > { %v2014_v12 = vmax.f32 %v2012_v49, %v2013_v19  ;;  %6097 = vtanh.f32 %v6964_v16 }
 0x573   : > { %v1785_v11 = vpop.permute.xlu0 %1784  ;;  %v1781_v8 = vpop.permute.xlu1 %1780  ;;  %6099 = vtanh.f32 %v6818_v25 }
 0x574   : > { %v2015_v1 = vrot.slane %v2014_v12, 2  ;;  %v1803_v7 = vmul.f32 %v6094_v17, %v1781_v8  ;;  %v1805_v42 = vmul.f32 %v6096_v10, %v1785_v11  ;;  %6101 = vtanh.f32 %v6822_v62 }
 0x576   : > { %v2016_v63 = vmax.f32 %v2014_v12, %v2015_v1  ;;  %v6968_v61 = vadd.f32 %v1829_v34, %v1803_v7 }
 0x577   : > { %v1833_v43 = vpop.permute.xlu0 %1832  ;;  %v1831_v31 = vpop.permute.xlu1 %1830 }
 0x578   : > { %v2017_v19 = vrot.slane %v2016_v63, 1  ;;  %6103 = vtanh.f32 %v6968_v61  ;;  %v6972_v39 = vadd.f32 %v1833_v43, %v1805_v42  ;;  %v6974_v24 = vadd.f32 %v1831_v31, %v1804_v38 }
 0x579   : > { %6105 = vtanh.f32 %v6816_v48 }
 0x57a   : > { %v2018_v8 = vmax.f32 %v2016_v63, %v2017_v19  ;;  %6107 = vtanh.f32 %v6972_v39 }
 0x57b   : > { %6109 = vtanh.f32 %v6974_v24  ;;  %v1789_v7 = vpop.permute.xlu0 %1788  ;;  %v1787_v10 = vpop.permute.xlu1 %1786 }
 0x57c   : > { %v6098_v11 = vpop.eup %6097  ;;  %v2019_v12 = vsub.f32 %v1997_v55, %v2018_v8  ;;  %v2020_v17 = vsub.f32 %v1998_v29, %v2018_v8  ;;  %v2021_v25 = vsub.f32 %v1999_v9, %v2018_v8  ;;  %v2022_v62 = vsub.f32 %v6941_v33, %v2018_v8 }
 0x57d   : > { %v2023_v6 = vsub.f32 %v6944_v2, %v2018_v8  ;;  %1874 = vrot.lane.b32.xlu0 %v6098_v11, %s6259_s12  ;;  %v2024_v49 = vsub.f32 %v6951_v40, %v2018_v8  ;;  %v6100_v34 = vpop.eup %6099  ;;  %6111 = vtanh.f32 %v6820_v32  ;;  %v2025_v22 = vsub.f32 %v6954_v30, %v2018_v8 }
 0x57e   : > { %v2027_v48 = vmul.f32 1.442695, %v2019_v12  ;;  %v2029_v4 = vmul.f32 1.442695, %v2020_v17  ;;  %v2031_v37 = vmul.f32 1.442695, %v2021_v25  ;;  %v6102_v29 = vpop.eup %6101  ;;  %v2026_v63 = vsub.f32 %v6938_v47, %v2018_v8 }
 0x57f   : > { %v1835_v1 = vpop.permute.xlu1 %1834  ;;  %v2033_v55 = vmul.f32 1.442695, %v2022_v62  ;;  %v2035_v33 = vmul.f32 1.442695, %v2023_v6  ;;  %v1837_v9 = vpop.permute.xlu0 %1836  ;;  %v2037_v38 = vmul.f32 1.442695, %v2024_v49  ;;  %v1807_v40 = vmul.f32 %v6102_v29, %v1789_v7 }
 0x580   : > { %6113 = vpow2.f32 %v2027_v48  ;;  %v2039_v43 = vmul.f32 1.442695, %v2025_v22  ;;  %v1806_v31 = vmul.f32 %v6100_v34, %v1787_v10  ;;  %v2041_v17 = vmul.f32 1.442695, %v2026_v63 }
 0x581   : > { %6115 = vpow2.f32 %v2029_v4  ;;  %v6987_v19 = vadd.f32 %v1837_v9, %v1807_v40 }
 0x582   : > { %v6104_v2 = vpop.eup %6103  ;;  %6117 = vpow2.f32 %v2031_v37  ;;  %v6989_v12 = vadd.f32 %v1835_v1, %v1806_v31 }
 0x583   : > { %v6106_v42 = vpop.eup %6105  ;;  %1876 = vrot.lane.b32.xlu1 %v6104_v2, %s6259_s12  ;;  %v1791_v32 = vpop.permute.xlu1 %1790  ;;  %6119 = vpow2.f32 %v2033_v55 }
 0x584   : > { %v6108_v30 = vpop.eup %6107  ;;  %6121 = vpow2.f32 %v2035_v33  ;;  %v1808_v47 = vmul.f32 %v6106_v42, %v1791_v32  ;;  %v1793_v8 = vpop.permute.xlu0 %1792 }
 0x585   : > { %v6110_v11 = vpop.eup %6109  ;;  %6123 = vpow2.f32 %v2037_v38 }
 0x586   : > { %1878 = vrot.lane.b32.xlu0 %v6110_v11, %s6259_s12  ;;  %6125 = vpow2.f32 %v2039_v43 }
 0x587   : > { %1880 = vrot.lane.b32.xlu1 %v6108_v30, %s6259_s12  ;;  %v1839_v7 = vpop.permute.xlu1 %1838  ;;  %6127 = vtanh.f32 %v6987_v19  ;;  %v6112_v25 = vpop.eup %6111 }
 0x588   : > { %v6994_v10 = vadd.f32 %v1839_v7, %v1808_v47  ;;  %6129 = vtanh.f32 %v6989_v12  ;;  %v1809_v6 = vmul.f32 %v6112_v25, %v1793_v8 }
 0x589   : > { %6131 = vpow2.f32 %v2041_v17 }
 0x58a   : > { %v6114_v62 = vpop.eup %6113  ;;  %6133 = vtanh.f32 %v6994_v10 }
 0x58b   : > { %v6116_v49 = vpop.eup %6115  ;;  %v1841_v48 = vpop.permute.xlu1 %1840 }
 0x58c   : > { %v2043_v4 = vadd.f32 %v6116_v49, %v6114_v62  ;;  %v6998_v34 = vadd.f32 %v1841_v48, %v1809_v6  ;;  %v6118_v22 = vpop.eup %6117  ;;  %v5911_v48 = vld [vmem:[%s8046_s2 + $0x40] sm:$0xff]  }
 0x58d   : > { %v6120_v37 = vpop.eup %6119  ;;  %5369 = vmatprep.subr.bf16.mxu1 %v5911_v48 }
 0x58e   : > { %v2044_v1 = vadd.f32 %v6118_v22, %v2043_v4  ;;  %6135 = vtanh.f32 %v6998_v34  ;;  %v6122_v55 = vpop.eup %6121  ;;  %v5912_v4 = vld [vmem:[%s8046_s2] sm:$0xff]  }
 0x58f   : > { %v6124_v29 = vpop.eup %6123  ;;  %5370 = vmatpush3.bf16.msra.mxu1 %v5912_v4  ;;  %v5026_v4 = vld [vmem:[%s6349_s28 + $0xc8] sm:$0xff] }
 0x590   : > { %v2045_v33 = vadd.f32 %v6120_v37, %v2044_v1  ;;  %v7001_v9 = vpop.eup %6125  ;;  %v5913_v1 = vld [vmem:[%s8046_s2 + $0x48] sm:$0xff]  }
 0x591   : > { %v6128_v2 = vpop.eup %6127  ;;  %5371 = vmatprep.subr.bf16.mxu1 %v5913_v1  ;;  %v5918_v1 = vld [vmem:[%s8046_s2 + $0x10] sm:$0xff]  }
 0x592   : > { %v2046_v63 = vadd.f32 %v6122_v55, %v2045_v33  ;;  %v6130_v38 = vpop.eup %6129  ;;  %1884 = vrot.lane.b32.xlu1 %v6128_v2, %s6259_s12  ;;  %v5915_v33 = vld [vmem:[%s8046_s2 + $0xc0] sm:$0xff]  }
 0x593   : > { %v7004_v40 = vpop.eup %6131  ;;  %1882 = vrot.lane.b32.xlu0 %v6130_v38, %s6259_s12  ;;  %v5916_v2 = vld [vmem:[%s8046_s2 + $0x80] sm:$0xff]   ;;  %5409 = vmatprep.subr.bf16.mxu0 %v5915_v33 }
 0x594   : > { %v2047_v42 = vadd.f32 %v6124_v29, %v2046_v63  ;;  %v6134_v43 = vpop.eup %6133  ;;  %v2049_v32 = vsel %vm586_vm0, %v7004_v40, 0.0  ;;  %v5919_v63 = vld [vmem:[%s8046_s2 + $0xc8] sm:$0xff]   ;;  %5410 = vmatpush3.bf16.msra.mxu0 %v5916_v2 }
 0x595   : > { %5411 = vmatprep.subr.bf16.mxu0 %v5919_v63  ;;  %v5921_v63 = vld [vmem:[%s8046_s2 + $0x58] sm:$0xff]  }
 0x596   : > { %v2048_v31 = vadd.f32 %v7001_v9, %v2047_v42  ;;  %v5022_v42 = vld [vmem:[%s6349_s28 + $0x88] sm:$0xff] }
 0x597   : > { %1886 = vrot.lane.b32.xlu0 %v6134_v43, %s6259_s12  ;;  %v5023_v43 = vld [vmem:[%s6349_s28 + $0x98] sm:$0xff] }
 0x598   : > { %v6136_v30 = vpop.eup %6135  ;;  %v2050_v11 = vadd.f32 %v2049_v32, %v2048_v31  ;;  %v5914_v31 = vld [vmem:[%s8046_s2 + $0x8] sm:$0xff]  }
 0x599   : > { %1888 = vrot.lane.b32.xlu1 %v6136_v30, %s6259_s12  ;;  %5372 = vmatpush3.bf16.msra.mxu1 %v5914_v31  ;;  %v5924_v31 = vld [vmem:[%s8046_s2 + $0x90] sm:$0xff]  }
 0x59a   : > { %v2051_v17 = vrot.slane %v2050_v11, 4 }
 0x59c   : > { %v2052_v47 = vadd.f32 %v2051_v17, %v2050_v11  ;;  %v5024_v11 = vld [vmem:[%s6349_s28 + $0xa8] sm:$0xff] }
 0x59e   : > { %v2053_v8 = vrot.slane %v2052_v47, 2 }
 0x5a0   : > { %v2054_v7 = vadd.f32 %v2053_v8, %v2052_v47  ;;  %v5917_v8 = vld [vmem:[%s8046_s2 + $0x50] sm:$0xff]  }
 0x5a1   : > { %5373 = vmatprep.subr.bf16.mxu1 %v5917_v8 }
 0x5a2   : > { %v2055_v25 = vrot.slane %v2054_v7, 1  ;;  %5374 = vmatpush3.bf16.msra.mxu1 %v5918_v1 }
 0x5a3   : > { %5375 = vmatprep.subr.bf16.mxu1 %v5921_v63  ;;  %v5929_v63 = vld [vmem:[%s8046_s2 + $0x68] sm:$0xff]  }
 0x5a4   : > { %v2056_v6 = vadd.f32 %v2055_v25, %v2054_v7  ;;  %v5025_v7 = vld [vmem:[%s6349_s28 + $0xb8] sm:$0xff]  ;;  %v5920_v25 = vld [vmem:[%s8046_s2 + $0x88] sm:$0xff]  }
 0x5a5   : > { %5412 = vmatpush3.bf16.msra.mxu0 %v5920_v25 }
 0x5a6   : > { %6137 = vrcp.f32 %v2056_v6 }
 0x5b0   : > { %v6138_v38 = vpop.eup %6137 }
 0x5b1   : > { %v2058_v32 = vmul.f32 %v6138_v38, %v6114_v62  ;;  %v2059_v30 = vmul.f32 %v6138_v38, %v6116_v49  ;;  %v7036_v17 = vmul.f32 %v6138_v38, %v6118_v22  ;;  %v7038_v47 = vmul.f32 %v6138_v38, %v6120_v37  ;;  %v5923_v37 = vld [vmem:[%s8046_s2 + $0xd0] sm:$0xff]  }
 0x5b2   : > { %v7048_v22 = vmul.f32 %v6138_v38, %v6122_v55  ;;  %v7062_v2 = vmul.f32 %v6138_v38, %v6124_v29  ;;  %v7075_v8 = vmul.f32 %v6138_v38, %v7001_v9  ;;  %5413 = vmatprep.subr.bf16.mxu0 %v5923_v37  ;;  %v7088_v9 = vmul.f32 %v6138_v38, %v7004_v40  ;;  %v5926_v40 = vld [vmem:[%s8046_s2 + $0x20] sm:$0xff]  }
 0x5b3   : > { %v2066_v6 = vmul.f32 %v5022_v42, %v2058_v32  ;;  %v2097_v62 = vmul.f32 %v6844_v36, %v2058_v32  ;;  %v2067_v49 = vmul.f32 %v5023_v43, %v2059_v30  ;;  %v2068_v48 = vmul.f32 %v5024_v11, %v7036_v17  ;;  %v5027_v43 = vld [vmem:[%s6349_s28 + $0xd8] sm:$0xff]  ;;  %5414 = vmatpush3.bf16.msra.mxu0 %v5924_v31 }
 0x5b4   : > { %v2069_v55 = vmul.f32 %v5025_v7, %v7038_v47  ;;  %v2098_v32 = vmul.f32 %v6847_v54, %v2059_v30  ;;  %v2070_v29 = vmul.f32 %v5026_v4, %v7048_v22  ;;  %v5927_v7 = vld [vmem:[%s8046_s2 + $0xd8] sm:$0xff]  }
 0x5b5   : > { %v2074_v33 = vsel %vm8102_vm8, %v2066_v6, 0.0  ;;  %2113 = vrot.lane.b32.xlu0 %v2097_v62, %s6258_s6  ;;  %v2075_v36 = vsel %vm8103_vm10, %v2067_v49, 0.0  ;;  %v2077_v11 = vsel %vm8104_vm11, %v2068_v48, 0.0  ;;  %v5028_v6 = vld [vmem:[%s6349_s28 + $0xe8] sm:$0xff]  ;;  %v5922_v54 = vld [vmem:[%s8046_s2 + $0x18] sm:$0xff]   ;;  %v2071_v62 = vmul.f32 %v5027_v43, %v7062_v2  ;;  %v5925_v49 = vld [vmem:[%s8046_s2 + $0x60] sm:$0xff]   ;;  %5415 = vmatprep.subr.bf16.mxu0 %v5927_v7 }
 0x5b6   : > { %v2076_v42 = vadd.f32 %v2075_v36, %v2074_v33  ;;  %v2079_v30 = vsel %vm8105_vm12, %v2069_v55, 0.0  ;;  %v5029_v48 = vld [vmem:[%s6349_s28 + $0xf8] sm:$0x1f]  ;;  %v2081_v1 = vsel %vm8106_vm13, %v2070_v29, 0.0  ;;  %v2072_v33 = vmul.f32 %v5028_v6, %v7075_v8  ;;  %5376 = vmatpush3.bf16.msra.mxu1 %v5922_v54  ;;  %vm8113_vm8 = vmmov %vm8098_vm2 }
 0x5b7   : > { %v5928_v4 = vld [vmem:[%s8046_s2 + $0x98] sm:$0xff]   ;;  %v2083_v38 = vsel %vm8107_vm6, %v2071_v62, 0.0  ;;  %v2073_v55 = vmul.f32 %v5029_v48, %v7088_v9  ;;  %5377 = vmatprep.subr.bf16.mxu1 %v5925_v49  ;;  %v6240_v62 = vld [vmem:[%s8047_s3 + $0x11] sm:$0x1]  ;;  %v5931_v48 = vld [vmem:[%s8046_s2 + $0xe0] sm:$0xff]  }
 0x5b8   : > { %v2078_v25 = vadd.f32 %v2077_v11, %v2076_v42  ;;  %5416 = vmatpush3.bf16.msra.mxu0 %v5928_v4  ;;  %v2085_v43 = vsel %vm8108_vm15, %v2072_v33, 0.0  ;;  %v5932_v4 = vld [vmem:[%s8046_s2 + $0xa0] sm:$0xff]   ;;  %v5934_v33 = vld [vmem:[%s8046_s2 + $0x30] sm:$0xff]   ;;  %vm8114_vm10 = vmmov %vm8098_vm2 }
 0x5b9   : > { %2115 = vrot.lane.b32.xlu0 %v2098_v32, %s6258_s6  ;;  %v2087_v32 = vsel %vm8109_vm1, %v2073_v55, 0.0  ;;  %5417 = vmatprep.subr.bf16.mxu0 %v5931_v48  ;;  %vm8115_vm11 = vmmov %vm8098_vm2 }
 0x5ba   : > { %v2080_v37 = vadd.f32 %v2079_v30, %v2078_v25  ;;  %5378 = vmatpush3.bf16.msra.mxu1 %v5926_v40  ;;  %v5936_v40 = vld [vmem:[%s8046_s2 + $0xa8] sm:$0xff]   ;;  %vm8116_vm12 = vmmov %vm8109_vm1 }
 0x5bb   : > { %5379 = vmatprep.subr.bf16.mxu1 %v5929_v63  ;;  %vm8117_vm13 = vmmov %vm8098_vm2 }
 0x5bc   : > { %v2082_v36 = vadd.f32 %v2081_v1, %v2080_v37  ;;  %v5930_v37 = vld [vmem:[%s8046_s2 + $0x28] sm:$0xff]   ;;  %v5933_v1 = vld [vmem:[%s8046_s2 + $0x70] sm:$0xff]   ;;  %5418 = vmatpush3.bf16.msra.mxu0 %v5932_v4  ;;  %vm8118_vm15 = vmmov %vm8110_vm3 }
 0x5be   : > { %v2084_v42 = vadd.f32 %v2083_v38, %v2082_v36  ;;  %5380 = vmatpush3.bf16.msra.mxu1 %v5930_v37  ;;  %v5935_v36 = vld [vmem:[%s8046_s2 + $0xe8] sm:$0xff]   ;;  %v5937_v38 = vld [vmem:[%s8046_s2 + $0x78] sm:$0xff]  }
 0x5bf   : > { %5381 = vmatprep.subr.bf16.mxu1 %v5933_v1  ;;  %5419 = vmatprep.subr.bf16.mxu0 %v5935_v36  ;;  %v2103_v36 = vmul.f32 %v6872_v28, %v7075_v8 }
 0x5c0   : > { %v2086_v31 = vadd.f32 %v2085_v43, %v2084_v42  ;;  %5420 = vmatpush3.bf16.msra.mxu0 %v5936_v40  ;;  %v5938_v42 = vld [vmem:[%s8046_s2 + $0x38] sm:$0xff]   ;;  %v5939_v43 = vld [vmem:[%s8046_s2 + $0xf0] sm:$0xff]  }
 0x5c1   : > { %5421 = vmatprep.subr.bf16.mxu0 %v5939_v43 }
 0x5c2   : > { %v2088_v11 = vadd.f32 %v2087_v32, %v2086_v31  ;;  %5382 = vmatpush3.bf16.msra.mxu1 %v5934_v33  ;;  %v5940_v31 = vld [vmem:[%s8046_s2 + $0xb0] sm:$0xff]  }
 0x5c3   : > { %5383 = vmatprep.subr.bf16.mxu1 %v5937_v38 }
 0x5c4   : > { %v2089_v29 = vrot.slane %v2088_v11, 4  ;;  %5422 = vmatpush3.bf16.msra.mxu0 %v5940_v31 }
 0x5c6   : > { %v2090_v7 = vadd.f32 %v2089_v29, %v2088_v11  ;;  %5384 = vmatpush3.bf16.msra.mxu1 %v5938_v42  ;;  %v5943_v11 = vld [vmem:[%s8046_s2 + $0xf8] sm:$0xff]  }
 0x5c7   : > { %5423 = vmatprep.subr.bf16.mxu0 %v5943_v11  ;;  %v2193_v42 = vld [vmem:[#allocation2 + $0x16] sm:$0xff] }
 0x5c8   : > { %v2091_v25 = vrot.slane %v2090_v7, 2 }
 0x5ca   : > { %v2092_v6 = vadd.f32 %v2091_v25, %v2090_v7  ;;  %v5944_v7 = vld [vmem:[%s8046_s2 + $0xb8] sm:$0xff]  }
 0x5cb   : > { %5424 = vmatpush3.bf16.msra.mxu0 %v5944_v7 }
 0x5cc   : > { %v2093_v54 = vrot.slane %v2092_v6, 1 }
 0x5ce   : > { %v2094_v30 = vadd.f32 %v2093_v54, %v2092_v6  ;;  %v2099_v6 = vmul.f32 %v6850_v35, %v7036_v17  ;;  %v5947_v35 = vld [vmem:[%s8046_s2 + $0x1c0] sm:$0xff]  }
 0x5cf   : > { %5489 = vmatprep.subr.bf16.mxu0 %v5947_v35 }
 0x5d0   : > { %v2095_v49 = vadd.f32 %v6240_v62, %v2094_v30 }
 0x5d2   : > { %2096 = vst.msk [vmem:[%s6417_s5 + $0x1] sm:$0x1] %vm675_vm14, %v2095_v49 }
 0x5ef   : > { %v1875_v55 = vpop.permute.xlu0 %1874 }
 0x5f0   : > { %v1898_v63 = vmul.f32 %v1875_v55, %v6885_v57  ;;  %v5941_v57 = vld [vmem:[%s8046_s2 + $0x140] sm:$0xff]  }
 0x5f1   : > { %5449 = vmatprep.subr.bf16.mxu1 %v5941_v57  ;;  %v7202_v55 = vld [vmem:[%s6304_s20 + $0x2] sm:$0x1] }
 0x5f2   : > { %v2145_v32 = vmul.f32 %v6420_v53, %v1898_v63  ;;  %v2205_v63 = vld [vmem:[#allocation2 + $0x17] sm:$0xff] }
 0x5f4   : > { %2161 = vrot.lane.b32.xlu1 %v2145_v32, %s6260_s18 }
 0x5f5   : > { %v1877_v29 = vpop.permute.xlu1 %1876 }
 0x5f6   : > { %v1899_v25 = vmul.f32 %v1877_v29, %v6894_v0  ;;  %v2100_v0 = vmul.f32 %v6859_v13, %v7038_v47  ;;  %v2102_v13 = vmul.f32 %v6869_v23, %v7062_v2  ;;  %v5942_v29 = vld [vmem:[%s8046_s2 + $0x100] sm:$0xff]  }
 0x5f8   : > { %v2146_v54 = vmul.f32 %v6423_v56, %v1899_v25  ;;  %v1879_v30 = vpop.permute.xlu0 %1878  ;;  %2117 = vrot.lane.b32.xlu1 %v2099_v6, %s6258_s6  ;;  %v5945_v25 = vld [vmem:[%s8046_s2 + $0x148] sm:$0xff]  }
 0x5f9   : > { %v1900_v62 = vmul.f32 %v1879_v30, %v6888_v41  ;;  %v1881_v49 = vpop.permute.xlu1 %1880  ;;  %v2101_v41 = vmul.f32 %v6862_v5, %v7048_v22 }
 0x5fa   : > { %2163 = vrot.lane.b32.xlu0 %v2146_v54, %s6260_s18  ;;  %v1901_v48 = vmul.f32 %v1881_v49, %v6905_v21  ;;  %v5946_v54 = vld [vmem:[%s8046_s2 + $0x108] sm:$0xff]  }
 0x5fb   : > { %v2147_v37 = vmul.f32 %v6429_v58, %v1900_v62 }
 0x5fc   : > { %v2148_v17 = vmul.f32 %v6407_v51, %v1901_v48 }
 0x5fd   : > { %2165 = vrot.lane.b32.xlu1 %v2147_v37, %s6260_s18  ;;  %v5949_v37 = vld [vmem:[%s8046_s2 + $0x150] sm:$0xff]  }
 0x5fe   : > { %2119 = vrot.lane.b32.xlu0 %v2100_v0, %s6258_s6  ;;  %v5948_v0 = vld [vmem:[%s8046_s2 + $0x180] sm:$0xff]  }
 0x601   : > { %2121 = vrot.lane.b32.xlu1 %v2101_v41, %s6258_s6  ;;  %v5951_v41 = vld [vmem:[%s8046_s2 + $0x1c8] sm:$0xff]  }
 0x602   : > { %2167 = vrot.lane.b32.xlu0 %v2148_v17, %s6260_s18 }
 0x604   : > { %v1885_v21 = vpop.permute.xlu1 %1884 }
 0x605   : > { %v1883_v47 = vpop.permute.xlu0 %1882  ;;  %v1903_v4 = vmul.f32 %v1885_v21, %v6917_v44  ;;  %v2104_v44 = vmul.f32 %v6841_v50, %v7088_v9  ;;  %v3362_v50 = vsel %vm8110_vm3, %v7202_v55, -inf }
 0x606   : > { %2123 = vrot.lane.b32.xlu0 %v2102_v13, %s6258_s6  ;;  %v1902_v1 = vmul.f32 %v1883_v47, %v6910_v27 }
 0x607   : > { %v2150_v5 = vmul.f32 %v6432_v59, %v1903_v4 }
 0x608   : > { %v2149_v22 = vmul.f32 %v6410_v52, %v1902_v1 }
 0x609   : > { %v1887_v33 = vpop.permute.xlu0 %1886 }
 0x60a   : > { %2171 = vrot.lane.b32.xlu0 %v2150_v5, %s6260_s18  ;;  %2169 = vrot.lane.b32.xlu1 %v2149_v22, %s6260_s18  ;;  %v1904_v23 = vmul.f32 %v1887_v33, %v6922_v45  ;;  %v5950_v5 = vld [vmem:[%s8046_s2 + $0x110] sm:$0xff]   ;;  %v5953_v22 = vld [vmem:[%s8046_s2 + $0x158] sm:$0xff]  }
 0x60b   : > { %v1889_v2 = vpop.permute.xlu1 %1888  ;;  %v5955_v33 = vld [vmem:[%s8046_s2 + $0x1d0] sm:$0xff]  }
 0x60c   : > { %v2151_v27 = vmul.f32 %v6435_v60, %v1904_v23  ;;  %v1905_v40 = vmul.f32 %v1889_v2, %v6929_v15 }
 0x60e   : > { %2127 = vrot.lane.b32.xlu0 %v2104_v44, %s6258_s6  ;;  %2125 = vrot.lane.b32.xlu1 %v2103_v36, %s6258_s6  ;;  %v2152_v38 = vmul.f32 %v6404_v46, %v1905_v40  ;;  %v5954_v36 = vld [vmem:[%s8046_s2 + $0x118] sm:$0xff]  }
 0x612   : > { %2173 = vrot.lane.b32.xlu1 %v2151_v27, %s6260_s18 }
 0x616   : > { %2175 = vrot.lane.b32.xlu1 %v2152_v38, %s6260_s18 }
 0x627   : > { %v2114_v45 = vpop.permute.xlu0 %2113 }
 0x628   : > { %2137 = vst.msk [vmem:[#allocation2 + $0x20] sm:$0xff] %vm8098_vm2, %v2114_v45  ;;  %v5956_v45 = vld [vmem:[%s8046_s2 + $0x190] sm:$0xff]  }
 0x62b   : > { %v2116_v28 = vpop.permute.xlu0 %2115 }
 0x62c   : > { %2138 = vst.msk [vmem:[#allocation2 + $0x28] sm:$0xff] %vm8111_vm4, %v2116_v28 }
 0x62d   : > { %3363 = vmax.xlane.f32.xlu0 %v3362_v50  ;;  %v5957_v50 = vld [vmem:[%s8046_s2 + $0x160] sm:$0xff]  }
 0x666   : > { %v2162_v8 = vpop.permute.xlu1 %2161 }
 0x667   : > { %2185 = vst.msk [vmem:[#allocation2 + $0x20] sm:$0xff] %vm733_vm9, %v2162_v8  ;;  %v5959_v8 = vld [vmem:[%s8046_s2 + $0x1d8] sm:$0xff]  }
 0x66a   : > { %v2118_v15 = vpop.permute.xlu1 %2117 }
 0x66b   : > { %2139 = vst.msk [vmem:[#allocation2 + $0x30] sm:$0xff] %vm8112_vm7, %v2118_v15  ;;  %vm8120_vm7 = vmmov %vm8111_vm4 }
 0x66c   : > { %v2164_v9 = vpop.permute.xlu0 %2163 }
 0x66d   : > { %2186 = vst.msk [vmem:[#allocation2 + $0x28] sm:$0xff] %vm733_vm9, %v2164_v9  ;;  %v5958_v9 = vld [vmem:[%s8046_s2 + $0x120] sm:$0xff]  }
 0x66e   : > { %v2206_v43 = vld [vmem:[#allocation2 + $0x1f] sm:$0xff] }
 0x66f   : > { %v2194_v31 = vld [vmem:[#allocation2 + $0x1e] sm:$0xff]  ;;  %v2166_v32 = vpop.permute.xlu1 %2165  ;;  %v2213_v57 = vpack.c.bf16 %v2206_v43, %v2205_v63 }
 0x670   : > { %v2201_v11 = vpack.c.bf16 %v2194_v31, %v2193_v42  ;;  %2187 = vst.msk [vmem:[#allocation2 + $0x30] sm:$0xff] %vm733_vm9, %v2166_v32  ;;  %v2120_v7 = vpop.permute.xlu0 %2119  ;;  %v7222_v30 = vld [vmem:[#allocation2 + $0x20] sm:$0xff]  ;;  %v5960_v42 = vld [vmem:[%s8046_s2 + $0x198] sm:$0xff]  }
 0x671   : > { %2140 = vst.msk [vmem:[#allocation2 + $0x38] sm:$0xff] %vm8113_vm8, %v2120_v7  ;;  %2883 = vmatprep.mubr.bf16.mxu1 %v2213_v57  ;;  %v2225_v35 = vpack.c.bf16 %v7222_v30, %v6828_v26  ;;  %v5952_v26 = vld [vmem:[%s8046_s2 + $0x188] sm:$0xff]   ;;  %v5963_v31 = vld [vmem:[%s8046_s2 + $0x1e0] sm:$0xff]   ;;  %vm8122_vm8 = vmmov %vm8116_vm12 }
 0x672   : > { %2884 = vmatmul.mubr.bf16.vlgmr.msra.gmra.mrb[32].mxu1 %v2201_v11  ;;  %v5962_v57 = vld [vmem:[%s8046_s2 + $0x128] sm:$0xff]  }
 0x673   : > { %v2122_v6 = vpop.permute.xlu1 %2121  ;;  %5450 = vmatpush3.bf16.msra.mxu1 %v5942_v29 }
 0x674   : > { %2141 = vst.msk [vmem:[#allocation2 + $0x40] sm:$0xff] %vm8114_vm10, %v2122_v6  ;;  %v2168_v62 = vpop.permute.xlu0 %2167  ;;  %5451 = vmatprep.subr.bf16.mxu1 %v5945_v25  ;;  %v2207_v49 = vld [vmem:[#allocation2 + $0x27] sm:$0xff]  ;;  %vm8123_vm10 = vmmov %vm8111_vm4 }
 0x675   : > { %2188 = vst.msk [vmem:[#allocation2 + $0x38] sm:$0xff] %vm733_vm9, %v2168_v62  ;;  %v2231_v48 = vpack.c.bf16 %v2207_v49, %v2206_v43  ;;  %v2195_v13 = vld [vmem:[#allocation2 + $0x26] sm:$0xff] }
 0x676   : > { %v7256_v38 = vld [vmem:[#allocation2 + $0x28] sm:$0xff] }
 0x677   : > { %2948 = vmatprep.mubr.bf16.mxu0 %v2231_v48  ;;  %5452 = vmatpush3.bf16.msra.mxu1 %v5946_v54  ;;  %v2208_v17 = vld [vmem:[#allocation2 + $0x2f] sm:$0xff]  ;;  %v5964_v48 = vld [vmem:[%s8046_s2 + $0x1a0] sm:$0xff]  }
 0x678   : > { %v2196_v21 = vld [vmem:[#allocation2 + $0x2e] sm:$0xff]  ;;  %v2124_v47 = vpop.permute.xlu0 %2123  ;;  %2949 = vmatmul.mubr.bf16.vlgmr.msra.gmra.mrb[40].mxu0 %v2225_v35  ;;  %v2214_v4 = vpack.c.bf16 %v2208_v17, %v2207_v49  ;;  %5453 = vmatprep.subr.bf16.mxu1 %v5949_v37 }
 0x679   : > { %v2202_v1 = vpack.c.bf16 %v2196_v21, %v2195_v13  ;;  %2142 = vst.msk [vmem:[#allocation2 + $0x48] sm:$0xff] %vm8115_vm11, %v2124_v47  ;;  %5490 = vmatpush3.bf16.msra.mxu0 %v5948_v0  ;;  %v7250_v23 = vld [vmem:[#allocation2 + $0x30] sm:$0xff]  ;;  %v5961_v43 = vld [vmem:[%s8046_s2 + $0x168] sm:$0xff]   ;;  %v5969_v47 = vld [vmem:[%s8046_s2 + $0x178] sm:$0xff]  }
 0x67a   : > { %2891 = vmatprep.mubr.bf16.mxu1 %v2214_v4  ;;  %5491 = vmatprep.subr.bf16.mxu0 %v5951_v41  ;;  %v7267_v28 = vpack.c.bf16 %v7250_v23, %v7256_v38  ;;  %v5965_v35 = vld [vmem:[%s8046_s2 + $0x170] sm:$0xff]   ;;  %v5967_v41 = vld [vmem:[%s8046_s2 + $0x1e8] sm:$0xff]   ;;  %vm8124_vm11 = vmmov %vm8111_vm4 }
 0x67b   : > { %2892 = vmatmul.mubr.bf16.gmra.mrb[36].mxu1 %v2202_v1  ;;  %v5966_v13 = vld [vmem:[%s8046_s2 + $0x130] sm:$0xff]   ;;  %v5968_v21 = vld [vmem:[%s8046_s2 + $0x1a8] sm:$0xff]  }
 0x67c   : > { %5454 = vmatpush3.bf16.msra.mxu1 %v5950_v5  ;;  %v2172_v2 = vpop.permute.xlu0 %2171  ;;  %v2209_v44 = vld [vmem:[#allocation2 + $0x37] sm:$0xff]  ;;  %v2170_v27 = vpop.permute.xlu1 %2169  ;;  %v2242_v1 = vld [vmem:[#allocation2 + $0x29] sm:$0xff] }
 0x67d   : > { %2190 = vst.msk [vmem:[#allocation2 + $0x48] sm:$0xff] %vm733_vm9, %v2172_v2  ;;  %5492 = vmatpush3.bf16.msra.mxu0 %v5952_v26  ;;  %5455 = vmatprep.subr.bf16.mxu1 %v5953_v22  ;;  %v2232_v40 = vpack.c.bf16 %v2209_v44, %v2208_v17  ;;  %2189 = vst.msk [vmem:[#allocation2 + $0x40] sm:$0xff] %vm733_vm9, %v2170_v27  ;;  %v2197_v32 = vld [vmem:[#allocation2 + $0x36] sm:$0xff] }
 0x67e   : > { %5493 = vmatprep.subr.bf16.mxu0 %v5955_v33  ;;  %v7291_v49 = vld [vmem:[#allocation2 + $0x38] sm:$0xff]  ;;  %v5971_v4 = vld [vmem:[%s8046_s2 + $0x1f0] sm:$0xff]  }
 0x67f   : > { %2956 = vmatprep.mubr.bf16.mxu0 %v2232_v40  ;;  %v5972_v27 = vld [vmem:[%s8046_s2 + $0x1b0] sm:$0xff]   ;;  %v5973_v40 = vld [vmem:[%s8046_s2 + $0x200] sm:$0xff]  }
 0x680   : > { %5456 = vmatpush3.bf16.msra.mxu1 %v5954_v36  ;;  %v2128_v15 = vpop.permute.xlu0 %2127  ;;  %2957 = vmatmul.mubr.bf16.gmra.mrb[44].mxu0 %v7267_v28  ;;  %v2126_v63 = vpop.permute.xlu1 %2125  ;;  %v2241_v36 = vld [vmem:[#allocation2 + $0x21] sm:$0xff] }
 0x681   : > { %2144 = vst.msk [vmem:[#allocation2 + $0x58] sm:$0x1f] %vm8116_vm12, %v2128_v15  ;;  %5494 = vmatpush3.bf16.msra.mxu0 %v5956_v45  ;;  %5457 = vmatprep.subr.bf16.mxu1 %v5957_v50  ;;  %v2249_v45 = vpack.c.bf16 %v2242_v1, %v2241_v36  ;;  %vm8125_vm12 = vmmov %vm8111_vm4 }
 0x682   : > { %2143 = vst.msk [vmem:[#allocation2 + $0x50] sm:$0xff] %vm8117_vm13, %v2126_v63  ;;  %5495 = vmatprep.subr.bf16.mxu0 %v5959_v8  ;;  %v5974_v8 = vld [vmem:[%s8046_s2 + $0x1f8] sm:$0xff]   ;;  %vm8126_vm13 = vmmov %vm8111_vm4 }
 0x683   : > { %v2243_v63 = vld [vmem:[#allocation2 + $0x31] sm:$0xff] }
 0x684   : > { %5458 = vmatpush3.bf16.msra.mxu1 %v5958_v9  ;;  %v2174_v11 = vpop.permute.xlu1 %2173  ;;  %v2210_v29 = vld [vmem:[#allocation2 + $0x3f] sm:$0xff]  ;;  %v2211_v25 = vld [vmem:[#allocation2 + $0x47] sm:$0xff] }
 0x685   : > { %v2198_v7 = vld [vmem:[#allocation2 + $0x3e] sm:$0xff]  ;;  %5496 = vmatpush3.bf16.msra.mxu0 %v5960_v42  ;;  %5459 = vmatprep.subr.bf16.mxu1 %v5961_v43  ;;  %2191 = vst.msk [vmem:[#allocation2 + $0x50] sm:$0xff] %vm733_vm9, %v2174_v11  ;;  %v2215_v6 = vpack.c.bf16 %v2210_v29, %v2209_v44  ;;  %v2233_v62 = vpack.c.bf16 %v2211_v25, %v2210_v29  ;;  %v2199_v26 = vld [vmem:[#allocation2 + $0x46] sm:$0xff] }
 0x686   : > { %v2203_v54 = vpack.c.bf16 %v2198_v7, %v2197_v32  ;;  %v7293_v37 = vld [vmem:[#allocation2 + $0x40] sm:$0xff]  ;;  %5497 = vmatprep.subr.bf16.mxu0 %v5963_v31  ;;  %v5970_v44 = vld [vmem:[%s8046_s2 + $0x138] sm:$0xff]   ;;  %v2223_v43 = vld [vmem:[#allocation2 + $0x48] sm:$0xff]  ;;  %v2237_v29 = vpack.c.bf16 %v7256_v38, %v7222_v30  ;;  %v2238_v30 = vpack.c.bf16 %v7291_v49, %v7250_v23 }
 0x687   : > { %v7300_v0 = vpack.c.bf16 %v7293_v37, %v7291_v49  ;;  %2899 = vmatprep.mubr.bf16.mxu1 %v2215_v6  ;;  %2964 = vmatprep.mubr.bf16.mxu0 %v2233_v62  ;;  %v5975_v32 = vld [vmem:[%s8046_s2 + $0x1b8] sm:$0xff]   ;;  %v5976_v7 = vld [vmem:[%s8046_s2 + $0x208] sm:$0xff]   ;;  %v2239_v23 = vpack.c.bf16 %v2223_v43, %v7293_v37 }
 0x688   : > { %2900 = vmatmul.mubr.bf16.gmra.mrb[40].mxu1 %v2203_v54  ;;  %v2176_v17 = vpop.permute.xlu1 %2175  ;;  %v2244_v11 = vld [vmem:[#allocation2 + $0x39] sm:$0xff]  ;;  %v2245_v6 = vld [vmem:[#allocation2 + $0x41] sm:$0xff]  ;;  %v5977_v54 = vld [vmem:[%s8046_s2 + $0x210] sm:$0xff]  }
 0x689   : > { %2965 = vmatmul.mubr.bf16.gmra.mrb[48].mxu0 %v7300_v0  ;;  %2192 = vst.msk [vmem:[#allocation2 + $0x58] sm:$0x1f] %vm741_vm5, %v2176_v17  ;;  %5460 = vmatpush3.bf16.msra.mxu1 %v5962_v57  ;;  %v2259_v57 = vpack.c.bf16 %v2243_v63, %v2242_v1  ;;  %v2260_v62 = vpack.c.bf16 %v2245_v6, %v2244_v11  ;;  %v5978_v38 = vld [vmem:[%s8046_s2 + $0x218] sm:$0xff]   ;;  %v5980_v49 = vld [vmem:[%s8046_s2 + $0x228] sm:$0xff]   ;;  %v2258_v1 = vld [vmem:[#allocation2 + $0x61] sm:$0x1f] }
 0x68a   : > { %5498 = vmatpush3.bf16.msra.mxu0 %v5964_v48  ;;  %5461 = vmatprep.subr.bf16.mxu1 %v5965_v35 }
 0x68b   : > { %5499 = vmatprep.subr.bf16.mxu0 %v5967_v41 }
 0x68c   : > { %v2212_v5 = vld [vmem:[#allocation2 + $0x4f] sm:$0x1f] }
 0x68d   : > { %v2200_v22 = vld [vmem:[#allocation2 + $0x4e] sm:$0x1f]  ;;  %v2216_v33 = vpack.c.bf16 %v2212_v5, %v2211_v25  ;;  %5462 = vmatpush3.bf16.msra.mxu1 %v5966_v13  ;;  %v2250_v25 = vpack.c.bf16 %v2244_v11, %v2243_v63 }
 0x68e   : > { %v2204_v2 = vpack.c.bf16 %v2200_v22, %v2199_v26  ;;  %5500 = vmatpush3.bf16.msra.mxu0 %v5968_v21  ;;  %5463 = vmatprep.subr.bf16.mxu1 %v5969_v47  ;;  %v2224_v50 = vld [vmem:[#allocation2 + $0x50] sm:$0x1f] }
 0x68f   : > { %5501 = vmatprep.subr.bf16.mxu0 %v5971_v4  ;;  %2907 = vmatprep.mubr.bf16.mxu1 %v2216_v33  ;;  %v2229_v15 = vld [vmem:[#allocation2 + $0x4f] sm:$0xff]  ;;  %v2228_v31 = vpack.c.bf16 %v2224_v50, %v2223_v43  ;;  %v2266_v50 = vld [vmem:[#allocation2 + $0x42] sm:$0xff] }
 0x690   : > { %2908 = vmatmul.mubr.bf16.gmra.mrb[44].mxu1 %v2204_v2  ;;  %v2230_v9 = vld [vmem:[#allocation2 + $0x57] sm:$0x1f]  ;;  %v2246_v48 = vld [vmem:[#allocation2 + $0x49] sm:$0xff] }
 0x691   : > { %3013 = vmatprep.mubr.bf16.mxu1 %v2249_v45  ;;  %v2234_v42 = vpack.c.bf16 %v2230_v9, %v2229_v15  ;;  %5464 = vmatpush3.bf16.msra.mxu1 %v5970_v44  ;;  %v2251_v35 = vpack.c.bf16 %v2246_v48, %v2245_v6  ;;  %v2247_v41 = vld [vmem:[#allocation2 + $0x51] sm:$0xff]  ;;  %v2248_v13 = vld [vmem:[#allocation2 + $0x59] sm:$0x1f] }
 0x692   : > { %5502 = vmatpush3.bf16.msra.mxu0 %v5972_v27  ;;  %5742 = vmatprep.subr.bf16.mxu1 %v5973_v40  ;;  %v2261_v17 = vpack.c.bf16 %v2247_v41, %v2246_v48  ;;  %v2252_v21 = vpack.c.bf16 %v2248_v13, %v2247_v41  ;;  %v2235_v47 = vld [vmem:[#allocation2 + $0x50] sm:$0xff]  ;;  %v2257_v4 = vld [vmem:[#allocation2 + $0x59] sm:$0xff] }
 0x693   : > { %2972 = vmatprep.mubr.bf16.mxu0 %v2234_v42  ;;  %5503 = vmatprep.subr.bf16.mxu0 %v5974_v8  ;;  %v2255_v5 = vpack.c.bf16 %v2235_v47, %v2223_v43  ;;  %v2262_v26 = vpack.c.bf16 %v2258_v1, %v2257_v4  ;;  %v2236_v37 = vld [vmem:[#allocation2 + $0x58] sm:$0x1f]  ;;  %v2263_v2 = vld [vmem:[#allocation2 + $0x2a] sm:$0xff] }
 0x694   : > { %2973 = vmatmul.mubr.bf16.gmra.mrb[52].mxu0 %v2228_v31  ;;  %v2264_v22 = vld [vmem:[#allocation2 + $0x32] sm:$0xff]  ;;  %v2240_v33 = vpack.c.bf16 %v2236_v37, %v2235_v47  ;;  %v2265_v15 = vld [vmem:[#allocation2 + $0x3a] sm:$0xff]  ;;  %v2267_v63 = vld [vmem:[#allocation2 + $0x4a] sm:$0xff] }
 0x695   : > { %3078 = vmatprep.mubr.bf16.mxu0 %v2259_v57  ;;  %v5982_v44 = vld [vmem:[%s8046_s2 + $0x238] sm:$0xff]   ;;  %v2271_v36 = vpack.c.bf16 %v2264_v22, %v2263_v2  ;;  %v2272_v9 = vpack.c.bf16 %v2266_v50, %v2265_v15  ;;  %v2270_v57 = vld [vmem:[#allocation2 + $0x62] sm:$0x1f] }
 0x696   : > { %5504 = vmatpush3.bf16.msra.mxu0 %v5975_v32  ;;  %v2253_v27 = vld [vmem:[#allocation2 + $0x58] sm:$0xff] }
 0x697   : > { %v2268_v8 = vld [vmem:[#allocation2 + $0x52] sm:$0xff]  ;;  %v2269_v32 = vld [vmem:[#allocation2 + $0x5a] sm:$0xff] }
 0x698   : > { %3014 = vmatmul.mubr.bf16.vlgmr.msra.gmra.mrb[48].mxu1 %v2237_v29  ;;  %v2273_v42 = vpack.c.bf16 %v2268_v8, %v2267_v63 }
 0x699   : > { %3021 = vmatprep.mubr.bf16.mxu1 %v2250_v25  ;;  %5743 = vmatpush3.bf16.msra.mxu1 %v5973_v40  ;;  %v2254_v40 = vld [vmem:[#allocation2 + $0x60] sm:$0x1f] }
 0x69a   : > { %5744 = vmatprep.subr.bf16.mxu1 %v5976_v7  ;;  %v2256_v45 = vpack.c.bf16 %v2254_v40, %v2253_v27 }
 0x69c   : > { %3079 = vmatmul.mubr.bf16.vlgmr.msra.gmra.mrb[56].mxu0 %v7267_v28  ;;  %v5979_v28 = vld [vmem:[%s8046_s2 + $0x220] sm:$0xff]  }
 0x69d   : > { %5745 = vmatpush3.bf16.msra.mxu1 %v5976_v7  ;;  %3086 = vmatprep.mubr.bf16.mxu0 %v2260_v62  ;;  %v2274_v7 = vpack.c.bf16 %v2270_v57, %v2269_v32 }
 0x69e   : > { %5746 = vmatprep.subr.bf16.mxu1 %v5977_v54 }
 0x6a0   : > { %3022 = vmatmul.mubr.bf16.gmra.mrb[52].mxu1 %v2238_v30 }
 0x6a1   : > { %3029 = vmatprep.mubr.bf16.mxu1 %v2251_v35  ;;  %5747 = vmatpush3.bf16.msra.mxu1 %v5977_v54 }
 0x6a2   : > { %5748 = vmatprep.subr.bf16.mxu1 %v5978_v38 }
 0x6a4   : > { %3087 = vmatmul.mubr.bf16.gmra.mrb[60].mxu0 %v7300_v0  ;;  %v5981_v0 = vld [vmem:[%s8046_s2 + $0x230] sm:$0xff]  }
 0x6a5   : > { %5749 = vmatpush3.bf16.msra.mxu1 %v5978_v38  ;;  %3094 = vmatprep.mubr.bf16.mxu0 %v2261_v17 }
 0x6a6   : > { %5750 = vmatprep.subr.bf16.mxu1 %v5979_v28 }
 0x6a8   : > { %3030 = vmatmul.mubr.bf16.gmra.mrb[56].mxu1 %v2239_v23 }
 0x6a9   : > { %3037 = vmatprep.mubr.bf16.mxu1 %v2252_v21  ;;  %5751 = vmatpush3.bf16.msra.mxu1 %v5979_v28 }
 0x6aa   : > { %5752 = vmatprep.subr.bf16.mxu1 %v5980_v49 }
 0x6ac   : > { %3095 = vmatmul.mubr.bf16.gmra.mrb[64].mxu0 %v2255_v5 }
 0x6ad   : > { %5753 = vmatpush3.bf16.msra.mxu1 %v5980_v49  ;;  %3102 = vmatprep.mubr.bf16.mxu0 %v2262_v26 }
 0x6ae   : > { %5754 = vmatprep.subr.bf16.mxu1 %v5981_v0 }
 0x6b0   : > { %3038 = vmatmul.mubr.bf16.gmra.mrb[60].mxu1 %v2240_v33 }
 0x6b1   : > { %5755 = vmatpush3.bf16.msra.mxu1 %v5981_v0  ;;  %5758 = vmatprep.mubr.bf16.mxu1 %v2271_v36 }
 0x6b2   : > { %5756 = vmatprep.subr.bf16.mxu1 %v5982_v44 }
 0x6b4   : > { %3103 = vmatmul.mubr.bf16.gmra.mrb[68].mxu0 %v2256_v45 }
 0x6b5   : > { %5757 = vmatpush3.bf16.msra.mxu1 %v5982_v44 }
 0x6b8   : > { %5759 = vmatmul.mubr.bf16.vlgmr.msra.gmra.mrb[64].mxu1 %v2272_v9 }
 0x6b9   : > { %5762 = vmatprep.mubr.bf16.mxu1 %v2273_v42 }
 0x6ba   : > { %v3364_v43 = vpop.xlane.xlu0 %3363 }
 0x6bb   : > { %vm3365_vm6 = vcmp.eq.f32.partialorder %v7202_v55, %v3364_v43 }
 0x6bc   : > { %v3366_v31 = vsel %vm3365_vm6, %v6308_v3, 16  ;;  %v6241_v3 = vld [vmem:[%s8047_s3 + $0x10] ss:$0 sm:$0xff]  ;;  %vm8127_vm6 = vmmov %vm8111_vm4 }
 0x6bd   : > { %v3367_v11 = vsel %vm8118_vm15, %v3366_v31, 2147483647  ;;  %vm8128_vm15 = vmmov %vm8111_vm4 }
 0x6be   : > { %v3369_v29 = vshra.s32 %v3367_v11, 16  ;;  %v3368_v41 = vand.u32 65535, %v3367_v11 }
 0x6c0   : > { %v3371_v25 = vcvt.s32.f32 %v3369_v29  ;;  %5763 = vmatmul.mubr.bf16.gmra.mrb[68].mxu1 %v2274_v7  ;;  %v3370_v0 = vcvt.s32.f32 %v3368_v41 }
 0x6c2   : > { %3372 = vmin.xlane.f32.xlu1 %v3371_v25 }
 0x745   : > { %v5385_v6 = vpop.f32.mrb[32].mxu1 }
 0x746   : > { %v5386_v54 = vpop.f32.mrb[33].mxu1 }
 0x747   : > { %v5387_v62 = vadd.f32 %v5386_v54, %v5385_v6  ;;  %v5388_v48 = vpop.f32.mrb[34].mxu1 }
 0x748   : > { %v5389_v30 = vpop.f32.mrb[35].mxu1 }
 0x749   : > { %v5390_v38 = vadd.f32 %v5389_v30, %v5388_v48  ;;  %v2886_v28 = vadd.f32 %v6241_v3, %v5387_v62 }
 0x74b   : > { %v5425_v35 = vpop.f32.mrb[40].mxu0  ;;  %v2889_v21 = vadd.f32 %v6241_v3, %v5390_v38 }
 0x74c   : > { %v5426_v55 = vpop.f32.mrb[41].mxu0 }
 0x74d   : > { %v5427_v17 = vadd.f32 %v5426_v55, %v5425_v35  ;;  %v5428_v13 = vpop.f32.mrb[42].mxu0 }
 0x74e   : > { %v5391_v23 = vpop.f32.mrb[36].mxu1  ;;  %v5429_v49 = vpop.f32.mrb[43].mxu0 }
 0x74f   : > { %v2951_v47 = vadd.f32 %v5427_v17, %v2886_v28  ;;  %v5392_v4 = vpop.f32.mrb[37].mxu1  ;;  %v5430_v1 = vadd.f32 %v5429_v49, %v5428_v13  ;;  %v7371_v5 = vpop.xlane.xlu1 %3372 }
 0x750   : > { %v5393_v26 = vadd.f32 %v5392_v4, %v5391_v23  ;;  %v5394_v37 = vpop.f32.mrb[38].mxu1  ;;  %vm3374_vm1 = vcmp.eq.f32.partialorder %v3371_v25, %v7371_v5 }
 0x751   : > { %v2954_v22 = vadd.f32 %v5430_v1, %v2889_v21  ;;  %v5395_v33 = vpop.f32.mrb[39].mxu1  ;;  %v3375_v2 = vsel %vm3374_vm1, %v3370_v0, inf  ;;  %vm8129_vm1 = vmmov %vm8111_vm4 }
 0x752   : > { %v5396_v44 = vadd.f32 %v5395_v33, %v5394_v37  ;;  %3376 = vmin.xlane.f32.xlu0 %v3375_v2  ;;  %v2894_v40 = vadd.f32 %v6241_v3, %v5393_v26 }
 0x753   : > { %v5431_v36 = vpop.f32.mrb[44].mxu0 }
 0x754   : > { %v5432_v27 = vpop.f32.mrb[45].mxu0  ;;  %v2897_v15 = vadd.f32 %v6241_v3, %v5396_v44 }
 0x755   : > { %v5433_v45 = vadd.f32 %v5432_v27, %v5431_v36  ;;  %v5434_v50 = vpop.f32.mrb[46].mxu0 }
 0x756   : > { %v5435_v8 = vpop.f32.mrb[47].mxu0 }
 0x757   : > { %v2959_v9 = vadd.f32 %v5433_v45, %v2894_v40  ;;  %v5436_v63 = vadd.f32 %v5435_v8, %v5434_v50 }
 0x759   : > { %v2962_v42 = vadd.f32 %v5436_v63, %v2897_v15 }
 0x75b   : > { %v5397_v43 = vpop.f32.mrb[40].mxu1 }
 0x75c   : > { %v5437_v31 = vpop.f32.mrb[48].mxu0  ;;  %v5398_v32 = vpop.f32.mrb[41].mxu1 }
 0x75d   : > { %v5438_v57 = vpop.f32.mrb[49].mxu0  ;;  %v5399_v11 = vadd.f32 %v5398_v32, %v5397_v43  ;;  %v5400_v29 = vpop.f32.mrb[42].mxu1 }
 0x75e   : > { %v5439_v7 = vadd.f32 %v5438_v57, %v5437_v31  ;;  %v5440_v25 = vpop.f32.mrb[50].mxu0  ;;  %v5401_v6 = vpop.f32.mrb[43].mxu1 }
 0x75f   : > { %v5441_v54 = vpop.f32.mrb[51].mxu0  ;;  %v2902_v62 = vadd.f32 %v6241_v3, %v5399_v11  ;;  %v5402_v48 = vadd.f32 %v5401_v6, %v5400_v29 }
 0x760   : > { %v5442_v30 = vadd.f32 %v5441_v54, %v5440_v25 }
 0x761   : > { %v2905_v38 = vadd.f32 %v6241_v3, %v5402_v48  ;;  %v2967_v35 = vadd.f32 %v5439_v7, %v2902_v62 }
 0x763   : > { %v5403_v41 = vpop.f32.mrb[44].mxu1  ;;  %v2970_v55 = vadd.f32 %v5442_v30, %v2905_v38 }
 0x764   : > { %v5404_v28 = vpop.f32.mrb[45].mxu1 }
 0x765   : > { %v5405_v17 = vadd.f32 %v5404_v28, %v5403_v41  ;;  %v5406_v13 = vpop.f32.mrb[46].mxu1 }
 0x766   : > { %v5407_v23 = vpop.f32.mrb[47].mxu1 }
 0x767   : > { %v5408_v49 = vadd.f32 %v5407_v23, %v5406_v13  ;;  %v5443_v21 = vpop.f32.mrb[52].mxu0  ;;  %v2910_v1 = vadd.f32 %v6241_v3, %v5405_v17 }
 0x768   : > { %v5444_v4 = vpop.f32.mrb[53].mxu0 }
 0x769   : > { %v5445_v0 = vadd.f32 %v5444_v4, %v5443_v21  ;;  %v5446_v26 = vpop.f32.mrb[54].mxu0  ;;  %v2913_v33 = vadd.f32 %v6241_v3, %v5408_v49 }
 0x76a   : > { %v5447_v37 = vpop.f32.mrb[55].mxu0 }
 0x76b   : > { %v2975_v2 = vadd.f32 %v5445_v0, %v2910_v1  ;;  %v5465_v44 = vpop.f32.mrb[48].mxu1  ;;  %v5448_v36 = vadd.f32 %v5447_v37, %v5446_v26 }
 0x76c   : > { %v5466_v27 = vpop.f32.mrb[49].mxu1 }
 0x76d   : > { %v2978_v40 = vadd.f32 %v5448_v36, %v2913_v33  ;;  %v5467_v45 = vadd.f32 %v5466_v27, %v5465_v44  ;;  %v5468_v50 = vpop.f32.mrb[50].mxu1 }
 0x76e   : > { %v5469_v8 = vpop.f32.mrb[51].mxu1 }
 0x76f   : > { %v3016_v15 = vadd.f32 %v5467_v45, %v2951_v47  ;;  %v5470_v63 = vadd.f32 %v5469_v8, %v5468_v50  ;;  %v5505_v43 = vpop.f32.mrb[56].mxu0 }
 0x770   : > { %v5506_v31 = vpop.f32.mrb[57].mxu0 }
 0x771   : > { %v3019_v32 = vadd.f32 %v5470_v63, %v2954_v22  ;;  %v5507_v57 = vadd.f32 %v5506_v31, %v5505_v43  ;;  %v5508_v11 = vpop.f32.mrb[58].mxu0 }
 0x772   : > { %v5509_v29 = vpop.f32.mrb[59].mxu0 }
 0x773   : > { %v5471_v7 = vpop.f32.mrb[52].mxu1  ;;  %v5510_v25 = vadd.f32 %v5509_v29, %v5508_v11  ;;  %v3081_v6 = vadd.f32 %v5507_v57, %v3016_v15 }
 0x774   : > { %v5472_v3 = vpop.f32.mrb[53].mxu1 }
 0x775   : > { %v5473_v54 = vadd.f32 %v5472_v3, %v5471_v7  ;;  %v5474_v62 = vpop.f32.mrb[54].mxu1  ;;  %v3084_v48 = vadd.f32 %v5510_v25, %v3019_v32 }
 0x776   : > { %v5475_v30 = vpop.f32.mrb[55].mxu1 }
 0x777   : > { %v3024_v38 = vadd.f32 %v5473_v54, %v2959_v9  ;;  %v5476_v41 = vadd.f32 %v5475_v30, %v5474_v62  ;;  %v5511_v28 = vpop.f32.mrb[60].mxu0 }
 0x778   : > { %v5512_v17 = vpop.f32.mrb[61].mxu0 }
 0x779   : > { %v3027_v47 = vadd.f32 %v5476_v41, %v2962_v42  ;;  %v5513_v13 = vadd.f32 %v5512_v17, %v5511_v28  ;;  %v5514_v23 = vpop.f32.mrb[62].mxu0 }
 0x77a   : > { %v5515_v49 = vpop.f32.mrb[63].mxu0 }
 0x77b   : > { %v5477_v22 = vpop.f32.mrb[56].mxu1  ;;  %v5516_v21 = vadd.f32 %v5515_v49, %v5514_v23  ;;  %v3089_v4 = vadd.f32 %v5513_v13, %v3024_v38 }
 0x77c   : > { %v5478_v1 = vpop.f32.mrb[57].mxu1 }
 0x77d   : > { %v5479_v0 = vadd.f32 %v5478_v1, %v5477_v22  ;;  %v5480_v26 = vpop.f32.mrb[58].mxu1  ;;  %v3092_v37 = vadd.f32 %v5516_v21, %v3027_v47 }
 0x77e   : > { %v5481_v33 = vpop.f32.mrb[59].mxu1 }
 0x77f   : > { %v3032_v44 = vadd.f32 %v5479_v0, %v2967_v35  ;;  %v5482_v36 = vadd.f32 %v5481_v33, %v5480_v26  ;;  %v5517_v27 = vpop.f32.mrb[64].mxu0 }
 0x780   : > { %v5518_v45 = vpop.f32.mrb[65].mxu0 }
 0x781   : > { %v3035_v9 = vadd.f32 %v5482_v36, %v2970_v55  ;;  %v5519_v50 = vadd.f32 %v5518_v45, %v5517_v27  ;;  %v5520_v8 = vpop.f32.mrb[66].mxu0 }
 0x782   : > { %v5521_v15 = vpop.f32.mrb[67].mxu0 }
 0x783   : > { %v5483_v42 = vpop.f32.mrb[60].mxu1  ;;  %v5522_v63 = vadd.f32 %v5521_v15, %v5520_v8  ;;  %v3097_v43 = vadd.f32 %v5519_v50, %v3032_v44  ;;  %v7394_v50 = vld [vmem:[#allocation2] sm:$0xff] }
 0x784   : > { %v5484_v31 = vpop.f32.mrb[61].mxu1  ;;  %8119 = vst [vmem:[#allocation12_spill] sm:$0xff] %v7394_v50 }
 0x785   : > { %v5485_v32 = vadd.f32 %v5484_v31, %v5483_v42  ;;  %v5486_v57 = vpop.f32.mrb[62].mxu1  ;;  %v3100_v11 = vadd.f32 %v5522_v63, %v3035_v9 }
 0x786   : > { %v5487_v29 = vpop.f32.mrb[63].mxu1 }
 0x787   : > { %v3040_v7 = vadd.f32 %v5485_v32, %v2975_v2  ;;  %v5488_v25 = vadd.f32 %v5487_v29, %v5486_v57  ;;  %v5523_v3 = vpop.f32.mrb[68].mxu0 }
 0x788   : > { %v5524_v54 = vpop.f32.mrb[69].mxu0 }
 0x789   : > { %v3043_v35 = vadd.f32 %v5488_v25, %v2978_v40  ;;  %v5525_v62 = vadd.f32 %v5524_v54, %v5523_v3  ;;  %v5526_v30 = vpop.f32.mrb[70].mxu0  ;;  %v7410_v25 = vld [vmem:[%s6349_s28 + $0x110] sm:$0xff] }
 0x78a   : > { %v5527_v38 = vpop.f32.mrb[71].mxu0  ;;  %v7413_v54 = vld [vmem:[%s6349_s28 + $0x130] sm:$0xff] }
 0x78b   : > { %v5760_v55 = vpop.f32.mrb[64].mxu1  ;;  %v5528_v41 = vadd.f32 %v5527_v38, %v5526_v30  ;;  %v3105_v28 = vadd.f32 %v5525_v62, %v3040_v7  ;;  %v7407_v7 = vld [vmem:[%s6349_s28 + $0x170] sm:$0x1f] }
 0x78c   : > { %v7374_v17 = vadd.f32 %v5760_v55, %v3089_v4  ;;  %v3145_v47 = vpop.f32.mrb[65].mxu1  ;;  %8121 = vst [vmem:[#allocation13_spill] sm:$0xff] %v7407_v7 }
 0x78d   : > { %v7376_v13 = vadd.f32 %v3145_v47, %v3081_v6  ;;  %v5761_v23 = vpop.f32.mrb[66].mxu1  ;;  %v3108_v49 = vadd.f32 %v5528_v41, %v3043_v35  ;;  %v3379_v6 = vcvt.f32.s32 %v7371_v5  ;;  %v6243_v5 = vld [vmem:[%s8047_s3] sm:$0xff]  ;;  %v7425_v47 = vld [vmem:[%s6349_s28 + $0x150] sm:$0xff] }
 0x78e   : > { %v7378_v22 = vadd.f32 %v5761_v23, %v3092_v37  ;;  %v3148_v2 = vpop.f32.mrb[67].mxu1  ;;  %v7416_v35 = vld [vmem:[%s6349_s28 + $0x100] sm:$0xff] }
 0x78f   : > { %v7380_v21 = vadd.f32 %v3148_v2, %v3084_v48  ;;  %v3380_v37 = vshll.u32 %v3379_v6, 16  ;;  %v7428_v23 = vld [vmem:[%s6349_s28 + $0x120] sm:$0xff]  ;;  %v3178_v6 = vmul.f32 0.5, %v7374_v17 }
 0x793   : > { %v5764_v1 = vpop.f32.mrb[68].mxu1 }
 0x794   : > { %v7382_v40 = vadd.f32 %v5764_v1, %v3105_v28  ;;  %v3161_v0 = vpop.f32.mrb[69].mxu1 }
 0x795   : > { %v7384_v26 = vadd.f32 %v3161_v0, %v3097_v43  ;;  %v5765_v33 = vpop.f32.mrb[70].mxu1 }
 0x796   : > { %v7386_v44 = vadd.f32 %v5765_v33, %v3108_v49  ;;  %v3164_v4 = vpop.f32.mrb[71].mxu1  ;;  %v3176_v49 = vmul.f32 0.5, %v7376_v13 }
 0x797   : > { %v7388_v36 = vadd.f32 %v3164_v4, %v3100_v11  ;;  %v7436_v4 = vld [vmem:[%s6349_s28 + $0x140] sm:$0xff] }
 0x798   : > { %6139 = vtanh.f32 %v3176_v49 }
 0x799   : > { %6141 = vtanh.f32 %v3178_v6 }
 0x7df   : > { %v3377_v27 = vpop.xlane.xlu0 %3376 }
 0x7e0   : > { %v3378_v45 = vcvt.f32.s32 %v3377_v27 }
 0x7e2   : > { %v3381_v9 = vadd.s32 %v3380_v37, %v3378_v45 }
 0x7e4   : > { %v3385_v48 = vrot.slane %v3381_v9, %v6327_v18  ;;  %v7443_v9 = vld [vmem:[%s6349_s28 + $0x160] sm:$0xff] }
 0x7e6   : > { %vm3386_vm2 = vcmp.eq.s32.totalorder %v6324_v14, %v3385_v48  ;;  %vm3387_vm3 = vcmp.eq.s32.totalorder %v6330_v20, %v3385_v48  ;;  %v6244_v14 = vld [vmem:[%s8047_s3 + $0x8] sm:$0xff]  ;;  %v3177_v48 = vmul.f32 0.5, %v7380_v21 }
 0x7e7   : > { %v5120_v8 = vsel %vm3386_vm2, 1.0, %v7394_v50  ;;  %v5121_v15 = vsel %vm3387_vm3, 1.0, %v7394_v50 }
 0x7e8   : > { %v3392_v42 = vmul.f32 %v6243_v5, %v5120_v8  ;;  %v3393_v18 = vmul.f32 %v6244_v14, %v5121_v15  ;;  %6143 = vtanh.f32 %v3177_v48  ;;  %v3179_v14 = vmul.f32 0.5, %v7378_v22 }
 0x7ea   : > { %v3394_v20 = vsel %vm8111_vm4, %v3392_v42, 0.0  ;;  %v3395_v63 = vsel %vm8120_vm7, %v3393_v18, 0.0  ;;  %v6140_v42 = vpop.eup %6139  ;;  %6145 = vtanh.f32 %v3179_v14 }
 0x7eb   : > { %v3396_v43 = vadd.f32 %v3395_v63, %v3394_v20  ;;  %v3192_v18 = vmul.f32 0.5, %v6140_v42  ;;  %v6142_v20 = vpop.eup %6141  ;;  %v3180_v63 = vmul.f32 0.5, %v7384_v26 }
 0x7ed   : > { %v3397_v31 = vrot.slane %v3396_v43, 4  ;;  %6147 = vtanh.f32 %v3180_v63 }
 0x7ef   : > { %v3398_v32 = vadd.f32 %v3397_v31, %v3396_v43  ;;  %v7451_v43 = vadd.f32 0.5, %v3192_v18  ;;  %v3194_v31 = vmul.f32 0.5, %v6142_v20 }
 0x7f1   : > { %v3399_v57 = vrot.slane %v3398_v32, 2 }
 0x7f3   : > { %v3400_v11 = vadd.f32 %v3399_v57, %v3398_v32  ;;  %v6144_v32 = vpop.eup %6143  ;;  %v3181_v57 = vmul.f32 0.5, %v7388_v36 }
 0x7f5   : > { %v3401_v29 = vrot.slane %v3400_v11, 1  ;;  %6149 = vtanh.f32 %v3181_v57 }
 0x7f7   : > { %v3402_v3 = vadd.f32 %v3401_v29, %v3400_v11  ;;  %v7456_v11 = vadd.f32 0.5, %v3194_v31  ;;  %v3193_v29 = vmul.f32 0.5, %v6144_v32  ;;  %v8131_v32 = vld [vmem:[#allocation6_spill] sm:$0xff] }
 0x7f9   : > { %v3410_v62 = vmul.f32 %v7407_v7, %v3402_v3  ;;  %v3404_v30 = vmul.f32 %v7410_v25, %v3402_v3  ;;  %v3406_v41 = vmul.f32 %v7413_v54, %v3402_v3  ;;  %v3403_v28 = vmul.f32 %v7416_v35, %v3402_v3 }
 0x7fa   : > { %v3408_v0 = vmul.f32 %v7425_v47, %v3402_v3  ;;  %v3405_v33 = vmul.f32 %v7428_v23, %v3402_v3  ;;  %v3407_v45 = vmul.f32 %v7436_v4, %v3402_v3  ;;  %v3409_v15 = vmul.f32 %v7443_v9, %v3402_v3 }
 0x7fb   : > { %v3432_v38 = vsel %vm8122_vm8, %v3410_v62, 0.0  ;;  %v3414_v55 = vsel %vm8123_vm10, %v3404_v30, 0.0  ;;  %v3420_v2 = vsel %vm8124_vm11, %v3406_v41, 0.0  ;;  %v3411_v1 = vsel %vm8125_vm12, %v3403_v28, 0.0  ;;  %v6146_v30 = vpop.eup %6145 }
 0x7fc   : > { %3433 = vadd.xlane.f32.xlu0 %v3432_v38  ;;  %3415 = vadd.xlane.f32.xlu1 %v3414_v55  ;;  %v3426_v27 = vsel %vm8126_vm13, %v3408_v0, 0.0  ;;  %v3417_v37 = vsel %vm8127_vm6, %v3405_v33, 0.0  ;;  %v3423_v8 = vsel %vm8128_vm15, %v3407_v45, 0.0  ;;  %v3429_v5 = vsel %vm8129_vm1, %v3409_v15, 0.0  ;;  %v6148_v41 = vpop.eup %6147 }
 0x7fd   : > { %v3182_v3 = vmul.f32 0.5, %v7382_v40  ;;  %v7461_v62 = vadd.f32 0.5, %v3193_v29  ;;  %v3183_v38 = vmul.f32 0.5, %v7386_v44  ;;  %v3195_v55 = vmul.f32 0.5, %v6146_v30  ;;  %v8132_v29 = vld [vmem:[#allocation4_spill] sm:$0xff]  ;;  %v8133_v30 = vld [vmem:[#allocation5_spill] sm:$0xff] }
 0x7fe   : > { %vm8146_vm11 = vcmask 520192  }
 0x7ff   : > { %6151 = vtanh.f32 %v3182_v3  ;;  %v7470_v28 = vadd.f32 0.5, %v3195_v55  ;;  %v6150_v49 = vpop.eup %6149  ;;  %v8134_v55 = vld [vmem:[#allocation7_spill] sm:$0xff] }
 0x800   : > { %3421 = vadd.xlane.f32.xlu1 %v3420_v2  ;;  %3412 = vadd.xlane.f32.xlu0 %v3411_v1  ;;  %6153 = vtanh.f32 %v3183_v38  ;;  %v3196_v2 = vmul.f32 0.5, %v6148_v41  ;;  %v3197_v1 = vmul.f32 0.5, %v6150_v49  ;;  %v8135_v49 = vld [vmem:[#allocation10_spill] sm:$0xff] }
 0x801   : > { %6155 = vtanh.f32 %v7376_v13 }
 0x802   : > { %v7476_v0 = vadd.f32 0.5, %v3196_v2  ;;  %v7482_v6 = vadd.f32 0.5, %v3197_v1  ;;  %6157 = vtanh.f32 %v7374_v17  ;;  %v8136_v1 = vld [vmem:[#allocation8_spill] sm:$0xff] }
 0x803   : > { %6159 = vtanh.f32 %v7380_v21  ;;  %v8137_v21 = vld [vmem:[#allocation9_spill] sm:$0xff] }
 0x804   : > { %3427 = vadd.xlane.f32.xlu1 %v3426_v27  ;;  %3418 = vadd.xlane.f32.xlu0 %v3417_v37  ;;  %6161 = vtanh.f32 %v7378_v22 }
 0x805   : > { %6163 = vtanh.f32 %v7384_v26 }
 0x808   : > { %3424 = vadd.xlane.f32.xlu0 %v3423_v8 }
 0x809   : > { %v6152_v33 = vpop.eup %6151 }
 0x80a   : > { %v6154_v27 = vpop.eup %6153  ;;  %v3198_v37 = vmul.f32 0.5, %v6152_v33 }
 0x80b   : > { %v3199_v45 = vmul.f32 0.5, %v6154_v27 }
 0x80c   : > { %3430 = vadd.xlane.f32.xlu0 %v3429_v5  ;;  %v7488_v48 = vadd.f32 0.5, %v3198_v37 }
 0x80d   : > { %v7494_v8 = vadd.f32 0.5, %v3199_v45  ;;  %v8138_v45 = vld [vmem:[#allocation11_spill] sm:$0xff] }
 0x80f   : > { %8130 = vst [vmem:[#allocation14_spill] sm:$0xff] %v7494_v8 }
 0x815   : > { %3224 = vrot.lane.b32.xlu1 %v7451_v43, %s6258_s6 }
 0x819   : > { %3228 = vrot.lane.b32.xlu1 %v7456_v11, %s6258_s6 }
 0x81d   : > { %3226 = vrot.lane.b32.xlu1 %v7461_v62, %s6258_s6 }
 0x821   : > { %3258 = vrot.lane.b32.xlu1 %v7461_v62, %s6259_s12 }
 0x822   : > { %3256 = vrot.lane.b32.xlu0 %v7451_v43, %s6259_s12 }
 0x825   : > { %3230 = vrot.lane.b32.xlu1 %v7470_v28, %s6258_s6 }
 0x826   : > { %3260 = vrot.lane.b32.xlu0 %v7456_v11, %s6259_s12 }
 0x829   : > { %3262 = vrot.lane.b32.xlu1 %v7470_v28, %s6259_s12 }
 0x82a   : > { %3232 = vrot.lane.b32.xlu0 %v7476_v0, %s6258_s6 }
 0x82d   : > { %3234 = vrot.lane.b32.xlu1 %v7482_v6, %s6258_s6 }
 0x82e   : > { %3264 = vrot.lane.b32.xlu0 %v7476_v0, %s6259_s12 }
 0x831   : > { %3266 = vrot.lane.b32.xlu1 %v7482_v6, %s6259_s12 }
 0x832   : > { %3236 = vrot.lane.b32.xlu0 %v7488_v48, %s6258_s6 }
 0x835   : > { %3238 = vrot.lane.b32.xlu1 %v7494_v8, %s6258_s6 }
 0x836   : > { %3268 = vrot.lane.b32.xlu0 %v7488_v48, %s6259_s12 }
 0x83a   : > { %3270 = vrot.lane.b32.xlu0 %v7494_v8, %s6259_s12 }
 0x889   : > { %v3434_v15 = vpop.xlane.xlu0 %3433  ;;  %v3416_v5 = vpop.xlane.xlu1 %3415 }
 0x88a   : > { %v7509_v3 = vsub.f32 %v3434_v15, %v8132_v29  ;;  %v7521_v33 = vsub.f32 %v3416_v5, %v8136_v1 }
 0x88d   : > { %v3422_v42 = vpop.xlane.xlu1 %3421  ;;  %v3413_v14 = vpop.xlane.xlu0 %3412 }
 0x88e   : > { %v7512_v38 = vsub.f32 %v3422_v42, %v8133_v30  ;;  %v7515_v41 = vsub.f32 %v3413_v14, %v8134_v55  ;;  %v3446_v42 = vsel %vm586_vm0, %v7509_v3, -inf }
 0x890   : > { %v3447_v14 = vmax.f32 %v7512_v38, %v3446_v42 }
 0x891   : > { %v3428_v18 = vpop.xlane.xlu1 %3427  ;;  %v3419_v20 = vpop.xlane.xlu0 %3418 }
 0x892   : > { %v7518_v13 = vsub.f32 %v3428_v18, %v8135_v49  ;;  %v7524_v27 = vsub.f32 %v3419_v20, %v8137_v21 }
 0x894   : > { %v3444_v18 = vmax.f32 %v7521_v33, %v7518_v13 }
 0x895   : > { %v3225_v63 = vpop.permute.xlu1 %3224  ;;  %v3425_v31 = vpop.xlane.xlu0 %3424 }
 0x896   : > { %v7506_v57 = vsub.f32 %v3425_v31, %v8131_v32  ;;  %v6156_v31 = vpop.eup %6155 }
 0x897   : > { %v3248_v29 = vmul.f32 %v6156_v31, %v3225_v63 }
 0x898   : > { %v3443_v37 = vmax.f32 %v7515_v41, %v7506_v57 }
 0x899   : > { %v3229_v17 = vpop.permute.xlu1 %3228  ;;  %v3431_v2 = vpop.xlane.xlu0 %3430 }
 0x89a   : > { %v7529_v15 = vsub.f32 %v3431_v2, %v8138_v45  ;;  %v3448_v30 = vmax.f32 %v3443_v37, %v3444_v18  ;;  %v6158_v2 = vpop.eup %6157 }
 0x89b   : > { %v6160_v1 = vpop.eup %6159  ;;  %v3250_v42 = vmul.f32 %v6158_v2, %v3229_v17 }
 0x89c   : > { %v3445_v5 = vmax.f32 %v7524_v27, %v7529_v15  ;;  %v6162_v31 = vpop.eup %6161 }
 0x89d   : > { %v3227_v20 = vpop.permute.xlu1 %3226  ;;  %v3257_v32 = vpop.permute.xlu0 %3256 }
 0x89e   : > { %v3449_v55 = vmax.f32 %v3445_v5, %v3447_v14  ;;  %v3280_v49 = vmul.f32 %v3257_v32, %v6964_v16  ;;  %v3249_v50 = vmul.f32 %v6160_v1, %v3227_v20 }
 0x8a0   : > { %v3450_v21 = vmax.f32 %v3448_v30, %v3449_v55  ;;  %v7541_v45 = vadd.f32 %v3280_v49, %v3248_v29 }
 0x8a1   : > { %v3259_v46 = vpop.permute.xlu1 %3258  ;;  %v3261_v7 = vpop.permute.xlu0 %3260 }
 0x8a2   : > { %v3451_v8 = vrot.slane %v3450_v21, 4  ;;  %6165 = vtanh.f32 %v7541_v45  ;;  %v3281_v63 = vmul.f32 %v3259_v46, %v6968_v61  ;;  %v3282_v16 = vmul.f32 %v3261_v7, %v6974_v24  ;;  %v6164_v24 = vpop.eup %6163 }
 0x8a4   : > { %v3452_v37 = vmax.f32 %v3450_v21, %v3451_v8  ;;  %v7546_v14 = vadd.f32 %v3281_v63, %v3249_v50  ;;  %v7548_v22 = vadd.f32 %v3282_v16, %v3250_v42 }
 0x8a5   : > { %v3231_v26 = vpop.permute.xlu1 %3230  ;;  %v3233_v18 = vpop.permute.xlu0 %3232 }
 0x8a6   : > { %v3453_v5 = vrot.slane %v3452_v37, 2  ;;  %6167 = vtanh.f32 %v7546_v14  ;;  %v3251_v7 = vmul.f32 %v6162_v31, %v3231_v26  ;;  %v3252_v32 = vmul.f32 %v6164_v24, %v3233_v18 }
 0x8a7   : > { %6169 = vtanh.f32 %v7548_v22 }
 0x8a8   : > { %6171 = vtanh.f32 %v7382_v40  ;;  %v3454_v17 = vmax.f32 %v3452_v37, %v3453_v5 }
 0x8a9   : > { %6173 = vtanh.f32 %v7388_v36  ;;  %v3263_v46 = vpop.permute.xlu1 %3262  ;;  %v3265_v61 = vpop.permute.xlu0 %3264 }
 0x8aa   : > { %v3455_v50 = vrot.slane %v3454_v17, 1  ;;  %v3283_v8 = vmul.f32 %v3263_v46, %v6972_v39  ;;  %v3284_v20 = vmul.f32 %v3265_v61, %v6989_v12  ;;  %6175 = vtanh.f32 %v7386_v44 }
 0x8ac   : > { %v6166_v29 = vpop.eup %6165  ;;  %v3456_v30 = vmax.f32 %v3454_v17, %v3455_v50  ;;  %v7557_v55 = vadd.f32 %v3283_v8, %v3251_v7  ;;  %v7559_v40 = vadd.f32 %v3284_v20, %v3252_v32 }
 0x8ad   : > { %v3235_v49 = vpop.permute.xlu1 %3234  ;;  %3312 = vrot.lane.b32.xlu1 %v6166_v29, %s6259_s12  ;;  %v3237_v36 = vpop.permute.xlu0 %3236 }
 0x8ae   : > { %v3457_v2 = vsub.f32 %v7515_v41, %v3456_v30  ;;  %v3458_v1 = vsub.f32 %v7521_v33, %v3456_v30  ;;  %v3459_v39 = vsub.f32 %v7524_v27, %v3456_v30  ;;  %v3460_v12 = vsub.f32 %v7512_v38, %v3456_v30 }
 0x8af   : > { %v3461_v44 = vsub.f32 %v7506_v57, %v3456_v30  ;;  %v3462_v42 = vsub.f32 %v7518_v13, %v3456_v30  ;;  %6177 = vtanh.f32 %v7557_v55  ;;  %v3464_v26 = vsub.f32 %v7509_v3, %v3456_v30 }
 0x8b0   : > { %v6168_v21 = vpop.eup %6167  ;;  %v3465_v63 = vmul.f32 1.442695, %v3457_v2  ;;  %v3467_v16 = vmul.f32 1.442695, %v3458_v1  ;;  %v3469_v18 = vmul.f32 1.442695, %v3459_v39  ;;  %6179 = vtanh.f32 %v7559_v40 }
 0x8b1   : > { %v6170_v37 = vpop.eup %6169  ;;  %v3267_v41 = vpop.permute.xlu1 %3266  ;;  %3314 = vrot.lane.b32.xlu0 %v6168_v21, %s6259_s12  ;;  %v3471_v57 = vmul.f32 1.442695, %v3460_v12  ;;  %v3473_v27 = vmul.f32 1.442695, %v3461_v44  ;;  %v3475_v3 = vmul.f32 1.442695, %v3462_v42  ;;  %v3463_v61 = vsub.f32 %v7529_v15, %v3456_v30 }
 0x8b2   : > { %v3269_v33 = vpop.permute.xlu0 %3268  ;;  %v6172_v38 = vpop.eup %6171  ;;  %6181 = vpow2.f32 %v3465_v63  ;;  %3316 = vrot.lane.b32.xlu1 %v6170_v37, %s6259_s12  ;;  %v3285_v5 = vmul.f32 %v3267_v41, %v6987_v19  ;;  %v3479_v24 = vmul.f32 1.442695, %v3464_v26 }
 0x8b3   : > { %v6174_v13 = vpop.eup %6173  ;;  %6183 = vpow2.f32 %v3467_v16  ;;  %v3286_v17 = vmul.f32 %v3269_v33, %v6994_v10  ;;  %v3254_v50 = vmul.f32 %v6172_v38, %v3237_v36 }
 0x8b4   : > { %v3253_v31 = vmul.f32 %v6174_v13, %v3235_v49  ;;  %v6176_v46 = vpop.eup %6175  ;;  %6185 = vpow2.f32 %v3469_v18  ;;  %v3477_v49 = vmul.f32 1.442695, %v3463_v61  ;;  %v5983_v61 = vld [vmem:[%s8046_s2 + $0x40] sm:$0xff]  }
 0x8b5   : > { %v3239_v7 = vpop.permute.xlu1 %3238  ;;  %6187 = vpow2.f32 %v3471_v57  ;;  %v7579_v19 = vadd.f32 %v3286_v17, %v3254_v50  ;;  %v5985_v50 = vld [vmem:[%s8046_s2 + $0x48] sm:$0xff]   ;;  %5541 = vmatprep.subr.bf16.mxu0 %v5983_v61  ;;  %v5117_v61 = vld [vmem:[%s6349_s28 + $0x158] sm:$0xff] }
 0x8b6   : > { %v3271_v8 = vpop.permute.xlu0 %3270  ;;  %v7576_v20 = vadd.f32 %v3285_v5, %v3253_v31  ;;  %v3255_v32 = vmul.f32 %v6176_v46, %v3239_v7  ;;  %6189 = vpow2.f32 %v3473_v27  ;;  %v5987_v7 = vld [vmem:[%s8046_s2 + $0xc0] sm:$0xff]  }
 0x8b7   : > { %v3287_v29 = vmul.f32 %v3271_v8, %v6998_v34  ;;  %6191 = vpow2.f32 %v3475_v3  ;;  %v5988_v8 = vld [vmem:[%s8046_s2 + $0x80] sm:$0xff]   ;;  %5581 = vmatprep.subr.bf16.mxu1 %v5987_v7 }
 0x8b8   : > { %6193 = vpow2.f32 %v3479_v24  ;;  %v5984_v24 = vld [vmem:[%s8046_s2] sm:$0xff]   ;;  %5582 = vmatpush3.bf16.msra.mxu1 %v5988_v8 }
 0x8b9   : > { %v7581_v10 = vadd.f32 %v3287_v29, %v3255_v32  ;;  %v6178_v15 = vpop.eup %6177  ;;  %6195 = vtanh.f32 %v7576_v20  ;;  %v5991_v32 = vld [vmem:[%s8046_s2 + $0xc8] sm:$0xff]   ;;  %5542 = vmatpush3.bf16.msra.mxu0 %v5984_v24  ;;  %v5999_v24 = vld [vmem:[%s8046_s2 + $0xd8] sm:$0xff]  }
 0x8ba   : > { %v6180_v30 = vpop.eup %6179  ;;  %6197 = vtanh.f32 %v7579_v19  ;;  %3318 = vrot.lane.b32.xlu0 %v6178_v15, %s6259_s12  ;;  %v5986_v29 = vld [vmem:[%s8046_s2 + $0x8] sm:$0xff]   ;;  %5543 = vmatprep.subr.bf16.mxu0 %v5985_v50 }
 0x8bb   : > { %6199 = vtanh.f32 %v7581_v10  ;;  %3320 = vrot.lane.b32.xlu1 %v6180_v30, %s6259_s12  ;;  %v5112_v15 = vld [vmem:[%s6349_s28 + $0x108] sm:$0xff]  ;;  %v5113_v30 = vld [vmem:[%s6349_s28 + $0x118] sm:$0xff]  ;;  %5583 = vmatprep.subr.bf16.mxu1 %v5991_v32 }
 0x8bc   : > { %v6182_v36 = vpop.eup %6181  ;;  %6201 = vpow2.f32 %v3477_v49  ;;  %v5994_v32 = vld [vmem:[%s8046_s2 + $0x18] sm:$0xff]  }
 0x8bd   : > { %v6184_v34 = vpop.eup %6183  ;;  %5544 = vmatpush3.bf16.msra.mxu0 %v5986_v29 }
 0x8be   : > { %v3481_v2 = vadd.f32 %v6184_v34, %v6182_v36  ;;  %v6186_v1 = vpop.eup %6185 }
 0x8bf   : > { %v6188_v39 = vpop.eup %6187 }
 0x8c0   : > { %v3482_v12 = vadd.f32 %v6186_v1, %v3481_v2  ;;  %v6190_v44 = vpop.eup %6189  ;;  %v5989_v2 = vld [vmem:[%s8046_s2 + $0x50] sm:$0xff]  }
 0x8c1   : > { %v6192_v21 = vpop.eup %6191  ;;  %5545 = vmatprep.subr.bf16.mxu0 %v5989_v2 }
 0x8c2   : > { %v3483_v42 = vadd.f32 %v6188_v39, %v3482_v12  ;;  %v7588_v63 = vpop.eup %6193 }
 0x8c3   : > { %v6196_v16 = vpop.eup %6195  ;;  %v3487_v57 = vsel %vm586_vm0, %v7588_v63, 0.0  ;;  %vm8139_vm0 = vmmov %vm8129_vm1 }
 0x8c4   : > { %v3484_v37 = vadd.f32 %v6190_v44, %v3483_v42  ;;  %v6198_v26 = vpop.eup %6197  ;;  %3322 = vrot.lane.b32.xlu0 %v6196_v16, %s6259_s12  ;;  %v5114_v16 = vld [vmem:[%s6349_s28 + $0x128] sm:$0xff]  ;;  %vm8140_vm2 = vmmov %vm8139_vm0 }
 0x8c5   : > { %v6200_v18 = vpop.eup %6199  ;;  %3324 = vrot.lane.b32.xlu1 %v6198_v26, %s6259_s12  ;;  %vm8141_vm3 = vmmov %vm8139_vm0 }
 0x8c6   : > { %v3485_v41 = vadd.f32 %v6192_v21, %v3484_v37  ;;  %v6202_v33 = vpop.eup %6201  ;;  %vm8142_vm4 = vmmov %vm8139_vm0 }
 0x8c7   : > { %vm8143_vm7 = vmmov %vm8139_vm0 }
 0x8c8   : > { %v3486_v38 = vadd.f32 %v6202_v33, %v3485_v41  ;;  %3326 = vrot.lane.b32.xlu0 %v6200_v18, %s6259_s12  ;;  %v5992_v18 = vld [vmem:[%s8046_s2 + $0x88] sm:$0xff]   ;;  %v5115_v41 = vld [vmem:[%s6349_s28 + $0x138] sm:$0xff]  ;;  %vm8144_vm8 = vmmov %vm8139_vm0 }
 0x8c9   : > { %5584 = vmatpush3.bf16.msra.mxu1 %v5992_v18  ;;  %v6003_v18 = vld [vmem:[%s8046_s2 + $0xe0] sm:$0xff]   ;;  %vm8145_vm10 = vmmov %vm8139_vm0 }
 0x8ca   : > { %v3488_v13 = vadd.f32 %v3487_v57, %v3486_v38  ;;  %v5995_v38 = vld [vmem:[%s8046_s2 + $0xd0] sm:$0xff]   ;;  %vm8151_vm12 = vmmov %vm8139_vm0 }
 0x8cb   : > { %5585 = vmatprep.subr.bf16.mxu1 %v5995_v38  ;;  %vm8152_vm13 = vmmov %vm8139_vm0 }
 0x8cc   : > { %v3489_v27 = vrot.slane %v3488_v13, 4  ;;  %vm8153_vm6 = vmmov %vm8139_vm0 }
 0x8cd   : > { %vm8154_vm15 = vmmov %vm8139_vm0 }
 0x8ce   : > { %v3490_v5 = vadd.f32 %v3489_v27, %v3488_v13  ;;  %v5116_v27 = vld [vmem:[%s6349_s28 + $0x148] sm:$0xff]  ;;  %vm8156_vm1 = vmmov %vm8139_vm0 }
 0x8d0   : > { %v3491_v17 = vrot.slane %v3490_v5, 2 }
 0x8d2   : > { %v3492_v3 = vadd.f32 %v3491_v17, %v3490_v5  ;;  %v5993_v5 = vld [vmem:[%s8046_s2 + $0x58] sm:$0xff]  }
 0x8d4   : > { %v3493_v31 = vrot.slane %v3492_v3, 1 }
 0x8d6   : > { %v3494_v46 = vadd.f32 %v3493_v31, %v3492_v3  ;;  %v5996_v31 = vld [vmem:[%s8046_s2 + $0x90] sm:$0xff]  }
 0x8d7   : > { %5586 = vmatpush3.bf16.msra.mxu1 %v5996_v31 }
 0x8d8   : > { %6203 = vrcp.f32 %v3494_v46  ;;  %5587 = vmatprep.subr.bf16.mxu1 %v5999_v24 }
 0x8e2   : > { %v6204_v49 = vpop.eup %6203 }
 0x8e3   : > { %v3496_v12 = vmul.f32 %v6204_v49, %v6182_v36  ;;  %v3497_v42 = vmul.f32 %v6204_v49, %v6184_v34  ;;  %v7622_v37 = vmul.f32 %v6204_v49, %v6186_v1  ;;  %v7624_v26 = vmul.f32 %v6204_v49, %v6188_v39  ;;  %v5990_v1 = vld [vmem:[%s8046_s2 + $0x10] sm:$0xff]  }
 0x8e4   : > { %v7634_v34 = vmul.f32 %v6204_v49, %v6190_v44  ;;  %v7648_v3 = vmul.f32 %v6204_v49, %v6192_v21  ;;  %v7660_v8 = vmul.f32 %v6204_v49, %v6202_v33  ;;  %5546 = vmatpush3.bf16.msra.mxu0 %v5990_v1  ;;  %v7673_v33 = vmul.f32 %v6204_v49, %v7588_v63  ;;  %v5998_v63 = vld [vmem:[%s8046_s2 + $0x20] sm:$0xff]  }
 0x8e5   : > { %v3504_v57 = vmul.f32 %v5112_v15, %v3496_v12  ;;  %v3535_v36 = vmul.f32 %v7416_v35, %v3496_v12  ;;  %v3505_v13 = vmul.f32 %v5113_v30, %v3497_v42  ;;  %v3506_v39 = vmul.f32 %v5114_v16, %v7622_v37  ;;  %v5118_v15 = vld [vmem:[%s6349_s28 + $0x168] sm:$0xff]  ;;  %5547 = vmatprep.subr.bf16.mxu0 %v5993_v5  ;;  %v5997_v30 = vld [vmem:[%s8046_s2 + $0x60] sm:$0xff]   ;;  %v6000_v12 = vld [vmem:[%s8046_s2 + $0x98] sm:$0xff]  }
 0x8e6   : > { %v3507_v44 = vmul.f32 %v5115_v41, %v7624_v26  ;;  %v3536_v50 = vmul.f32 %v7410_v25, %v3497_v42  ;;  %v3508_v21 = vmul.f32 %v5116_v27, %v7634_v34  ;;  %v3509_v2 = vmul.f32 %v5117_v61, %v7648_v3  ;;  %v5119_v16 = vld [vmem:[%s6349_s28 + $0x178] sm:$0x1f]  ;;  %5588 = vmatpush3.bf16.msra.mxu1 %v6000_v12  ;;  %v6002_v27 = vld [vmem:[%s8046_s2 + $0x28] sm:$0xff]  }
 0x8e7   : > { %v3512_v17 = vsel %vm8139_vm0, %v3504_v57, 0.0  ;;  %3551 = vrot.lane.b32.xlu1 %v3535_v36, %s6258_s6  ;;  %v3513_v35 = vsel %vm8140_vm2, %v3505_v13, 0.0  ;;  %v3515_v7 = vsel %vm8141_vm3, %v3506_v39, 0.0  ;;  %v3510_v38 = vmul.f32 %v5118_v15, %v7660_v8  ;;  %v6001_v57 = vld [vmem:[%s8046_s2 + $0x68] sm:$0xff]   ;;  %5589 = vmatprep.subr.bf16.mxu1 %v6003_v18  ;;  %v6006_v15 = vld [vmem:[%s8046_s2 + $0x30] sm:$0xff]   ;;  %v6010_v12 = vld [vmem:[%s8046_s2 + $0x38] sm:$0xff]  }
 0x8e8   : > { %v3514_v46 = vadd.f32 %v3513_v35, %v3512_v17  ;;  %v3517_v25 = vsel %vm8142_vm4, %v3507_v44, 0.0  ;;  %v3519_v41 = vsel %vm8143_vm7, %v3508_v21, 0.0  ;;  %5548 = vmatpush3.bf16.msra.mxu0 %v5994_v32  ;;  %v3521_v36 = vsel %vm8144_vm8, %v3509_v2, 0.0  ;;  %v6004_v32 = vld [vmem:[%s8046_s2 + $0xa0] sm:$0xff]   ;;  %v6009_v2 = vld [vmem:[%s8046_s2 + $0x78] sm:$0xff]   ;;  %v6012_v18 = vld [vmem:[%s8046_s2 + $0xb0] sm:$0xff]  }
 0x8e9   : > { %5549 = vmatprep.subr.bf16.mxu0 %v5997_v30  ;;  %v3511_v13 = vmul.f32 %v5119_v16, %v7673_v33  ;;  %v3523_v39 = vsel %vm8145_vm10, %v3510_v38, 0.0  ;;  %v6007_v30 = vld [vmem:[%s8046_s2 + $0xe8] sm:$0xff]   ;;  %v6013_v38 = vld [vmem:[%s8046_s2 + $0x140] sm:$0xff]   ;;  %vm8157_vm2 = vmmov %vm8146_vm11  ;;  %vm6262_vm3 = vmmov 0   ;;  %vm4847_vm4 = vcmask 253952  }
 0x8ea   : > { %v3516_v29 = vadd.f32 %v3515_v7, %v3514_v46  ;;  %v6245_v7 = vld [vmem:[%s8047_s3 + $0x11] sm:$0x1]  ;;  %5590 = vmatpush3.bf16.msra.mxu1 %v6004_v32  ;;  %vm4772_vm7 = vcmask 261120  }
 0x8eb   : > { %3553 = vrot.lane.b32.xlu1 %v3536_v50, %s6258_s6  ;;  %v3525_v17 = vsel %vm8146_vm11, %v3511_v13, 0.0  ;;  %5591 = vmatprep.subr.bf16.mxu1 %v6007_v30  ;;  %v3631_v30 = vld [vmem:[#allocation2 + $0x16] sm:$0xff] }
 0x8ec   : > { %v3518_v42 = vadd.f32 %v3517_v25, %v3516_v29  ;;  %5550 = vmatpush3.bf16.msra.mxu0 %v5998_v63  ;;  %v6005_v29 = vld [vmem:[%s8046_s2 + $0x70] sm:$0xff]   ;;  %v6008_v25 = vld [vmem:[%s8046_s2 + $0xa8] sm:$0xff]   ;;  %v6014_v63 = vld [vmem:[%s8046_s2 + $0xf8] sm:$0xff]  }
 0x8ed   : > { %5551 = vmatprep.subr.bf16.mxu0 %v6001_v57 }
 0x8ee   : > { %v3520_v49 = vadd.f32 %v3519_v41, %v3518_v42  ;;  %v6011_v42 = vld [vmem:[%s8046_s2 + $0xf0] sm:$0xff]   ;;  %5592 = vmatpush3.bf16.msra.mxu1 %v6008_v25 }
 0x8ef   : > { %5593 = vmatprep.subr.bf16.mxu1 %v6011_v42 }
 0x8f0   : > { %v3522_v1 = vadd.f32 %v3521_v36, %v3520_v49  ;;  %5552 = vmatpush3.bf16.msra.mxu0 %v6002_v27  ;;  %v3537_v27 = vmul.f32 %v7428_v23, %v7622_v37 }
 0x8f1   : > { %5553 = vmatprep.subr.bf16.mxu0 %v6005_v29 }
 0x8f2   : > { %v3524_v5 = vadd.f32 %v3523_v39, %v3522_v1  ;;  %5594 = vmatpush3.bf16.msra.mxu1 %v6012_v18 }
 0x8f3   : > { %5595 = vmatprep.subr.bf16.mxu1 %v6014_v63 }
 0x8f4   : > { %v3526_v35 = vadd.f32 %v3525_v17, %v3524_v5  ;;  %5554 = vmatpush3.bf16.msra.mxu0 %v6006_v15  ;;  %v6018_v5 = vld [vmem:[%s8046_s2 + $0x1c0] sm:$0xff]  }
 0x8f5   : > { %5555 = vmatprep.subr.bf16.mxu0 %v6009_v2 }
 0x8f6   : > { %v3527_v44 = vrot.slane %v3526_v35, 4 }
 0x8f8   : > { %v3528_v31 = vadd.f32 %v3527_v44, %v3526_v35  ;;  %5556 = vmatpush3.bf16.msra.mxu0 %v6010_v12  ;;  %v3539_v35 = vmul.f32 %v7436_v4, %v7634_v34  ;;  %v3541_v4 = vmul.f32 %v7443_v9, %v7660_v8  ;;  %v8148_v9 = vld [vmem:[#allocation13_spill] sm:$0xff]  ;;  %v8149_v8 = vld [vmem:[#allocation3_spill] sm:$0xff] }
 0x8f9   : > { %5621 = vmatprep.subr.bf16.mxu0 %v6013_v38  ;;  %v6017_v38 = vld [vmem:[%s8046_s2 + $0x148] sm:$0xff]  }
 0x8fa   : > { %v3529_v46 = vrot.slane %v3528_v31, 2 }
 0x8fc   : > { %v3530_v61 = vadd.f32 %v3529_v46, %v3528_v31 }
 0x8fe   : > { %v3531_v24 = vrot.slane %v3530_v61, 1 }
 0x900   : > { %v3532_v50 = vadd.f32 %v3531_v24, %v3530_v61 }
 0x902   : > { %v3533_v21 = vadd.f32 %v6245_v7, %v3532_v50  ;;  %v8147_v7 = vld [vmem:[#allocation14_spill] sm:$0xff] }
 0x904   : > { %3534 = vst.msk [vmem:[%s6417_s5 + $0x2] sm:$0x1] %vm675_vm14, %v3533_v21  ;;  %vm8150_vm14 = vmmov %vm8139_vm0 }
 0x91f   : > { %v3313_v16 = vpop.permute.xlu1 %3312 }
 0x920   : > { %v3336_v41 = vmul.f32 %v3313_v16, %v7451_v43  ;;  %v6016_v43 = vld [vmem:[%s8046_s2 + $0xb8] sm:$0xff]  }
 0x921   : > { %5596 = vmatpush3.bf16.msra.mxu1 %v6016_v43  ;;  %v6020_v43 = vld [vmem:[%s8046_s2 + $0x180] sm:$0xff]  }
 0x922   : > { %v3583_v49 = vmul.f32 %v6420_v53, %v3336_v41  ;;  %5661 = vmatprep.subr.bf16.mxu1 %v6018_v5  ;;  %v6015_v41 = vld [vmem:[%s8046_s2 + $0x100] sm:$0xff]   ;;  %v6021_v5 = vld [vmem:[%s8046_s2 + $0x150] sm:$0xff]  }
 0x923   : > { %v3315_v57 = vpop.permute.xlu0 %3314 }
 0x924   : > { %v3317_v36 = vpop.permute.xlu1 %3316  ;;  %v3337_v13 = vmul.f32 %v3315_v57, %v7461_v62  ;;  %3599 = vrot.lane.b32.xlu0 %v3583_v49, %s6260_s18 }
 0x925   : > { %v3338_v1 = vmul.f32 %v3317_v36, %v7456_v11  ;;  %v3538_v11 = vmul.f32 %v7413_v54, %v7624_v26  ;;  %v3540_v54 = vmul.f32 %v7425_v47, %v7648_v3  ;;  %v3542_v3 = vmul.f32 %v8148_v9, %v7673_v33  ;;  %v3643_v33 = vld [vmem:[#allocation2 + $0x17] sm:$0xff] }
 0x926   : > { %v3584_v39 = vmul.f32 %v6423_v56, %v3337_v13  ;;  %v6019_v13 = vld [vmem:[%s8046_s2 + $0x108] sm:$0xff]   ;;  %v6031_v9 = vld [vmem:[%s8046_s2 + $0x1d8] sm:$0xff]  }
 0x927   : > { %v3585_v62 = vmul.f32 %v6429_v58, %v3338_v1 }
 0x928   : > { %3555 = vrot.lane.b32.xlu0 %v3537_v27, %s6258_s6  ;;  %3601 = vrot.lane.b32.xlu1 %v3584_v39, %s6260_s18  ;;  %v8155_v39 = vld [vmem:[#allocation12_spill] sm:$0xff] }
 0x92c   : > { %3603 = vrot.lane.b32.xlu0 %v3585_v62, %s6260_s18  ;;  %3557 = vrot.lane.b32.xlu1 %v3538_v11, %s6258_s6  ;;  %v3319_v23 = vpop.permute.xlu0 %3318  ;;  %v6023_v62 = vld [vmem:[%s8046_s2 + $0x1c8] sm:$0xff]  }
 0x92d   : > { %v3321_v37 = vpop.permute.xlu1 %3320  ;;  %v3339_v17 = vmul.f32 %v3319_v23, %v7470_v28 }
 0x92e   : > { %v3340_v44 = vmul.f32 %v3321_v37, %v7476_v0 }
 0x92f   : > { %v3586_v31 = vmul.f32 %v6407_v51, %v3339_v17 }
 0x930   : > { %3559 = vrot.lane.b32.xlu0 %v3539_v35, %s6258_s6  ;;  %v3587_v46 = vmul.f32 %v6410_v52, %v3340_v44 }
 0x931   : > { %3605 = vrot.lane.b32.xlu1 %v3586_v31, %s6260_s18  ;;  %v6022_v31 = vld [vmem:[%s8046_s2 + $0x110] sm:$0xff]  }
 0x934   : > { %3607 = vrot.lane.b32.xlu0 %v3587_v46, %s6260_s18  ;;  %v6024_v46 = vld [vmem:[%s8046_s2 + $0x188] sm:$0xff]  }
 0x935   : > { %3561 = vrot.lane.b32.xlu1 %v3540_v54, %s6258_s6 }
 0x936   : > { %v3323_v28 = vpop.permute.xlu0 %3322 }
 0x937   : > { %v3325_v0 = vpop.permute.xlu1 %3324  ;;  %v3341_v26 = vmul.f32 %v3323_v28, %v7482_v6  ;;  %v6027_v28 = vld [vmem:[%s8046_s2 + $0x1d0] sm:$0xff]  }
 0x938   : > { %3563 = vrot.lane.b32.xlu0 %v3541_v4, %s6258_s6  ;;  %v3342_v34 = vmul.f32 %v3325_v0, %v7488_v48  ;;  %v6025_v4 = vld [vmem:[%s8046_s2 + $0x158] sm:$0xff]  }
 0x939   : > { %v3588_v61 = vmul.f32 %v6432_v59, %v3341_v26 }
 0x93a   : > { %v3589_v24 = vmul.f32 %v6435_v60, %v3342_v34  ;;  %v3327_v50 = vpop.permute.xlu0 %3326  ;;  %v6026_v34 = vld [vmem:[%s8046_s2 + $0x118] sm:$0xff]  }
 0x93b   : > { %v3343_v47 = vmul.f32 %v3327_v50, %v8147_v7  ;;  %3609 = vrot.lane.b32.xlu1 %v3588_v61, %s6260_s18 }
 0x93c   : > { %3611 = vrot.lane.b32.xlu0 %v3589_v24, %s6260_s18  ;;  %v6029_v24 = vld [vmem:[%s8046_s2 + $0x160] sm:$0xff]  }
 0x93d   : > { %v3590_v6 = vmul.f32 %v8149_v8, %v3343_v47  ;;  %v6028_v47 = vld [vmem:[%s8046_s2 + $0x190] sm:$0xff]  }
 0x93f   : > { %3565 = vrot.lane.b32.xlu1 %v3542_v3, %s6258_s6 }
 0x940   : > { %3613 = vrot.lane.b32.xlu0 %v3590_v6, %s6260_s18 }
 0x959   : > { %v3552_v48 = vpop.permute.xlu1 %3551 }
 0x95a   : > { %3575 = vst.msk [vmem:[#allocation2 + $0x20] sm:$0xff] %vm8150_vm14, %v3552_v48 }
 0x95d   : > { %v3554_v21 = vpop.permute.xlu1 %3553 }
 0x95e   : > { %3576 = vst.msk [vmem:[#allocation2 + $0x28] sm:$0xff] %vm8151_vm12, %v3554_v21 }
 0x996   : > { %v3600_v32 = vpop.permute.xlu0 %3599 }
 0x997   : > { %3623 = vst.msk [vmem:[#allocation2 + $0x20] sm:$0xff] %vm733_vm9, %v3600_v32 }
 0x99a   : > { %v3602_v29 = vpop.permute.xlu1 %3601  ;;  %v3556_v15 = vpop.permute.xlu0 %3555 }
 0x99b   : > { %3624 = vst.msk [vmem:[#allocation2 + $0x28] sm:$0xff] %vm733_vm9, %v3602_v29 }
 0x99c   : > { %3577 = vst.msk [vmem:[#allocation2 + $0x30] sm:$0xff] %vm8152_vm13, %v3556_v15 }
 0x99e   : > { %v3558_v25 = vpop.permute.xlu1 %3557  ;;  %v3604_v2 = vpop.permute.xlu0 %3603  ;;  %v3644_v12 = vld [vmem:[#allocation2 + $0x1f] sm:$0xff] }
 0x99f   : > { %v3632_v42 = vld [vmem:[#allocation2 + $0x1e] sm:$0xff]  ;;  %3578 = vst.msk [vmem:[#allocation2 + $0x38] sm:$0xff] %vm8153_vm6, %v3558_v25  ;;  %v3651_v16 = vpack.c.bf16 %v3644_v12, %v3643_v33  ;;  %v6033_v25 = vld [vmem:[%s8046_s2 + $0x168] sm:$0xff]  }
 0x9a0   : > { %3625 = vst.msk [vmem:[#allocation2 + $0x30] sm:$0xff] %vm733_vm9, %v3604_v2  ;;  %v3639_v18 = vpack.c.bf16 %v3632_v42, %v3631_v30  ;;  %v7796_v63 = vld [vmem:[#allocation2 + $0x20] sm:$0xff]  ;;  %v6032_v2 = vld [vmem:[%s8046_s2 + $0x198] sm:$0xff]  }
 0x9a1   : > { %4321 = vmatprep.mubr.bf16.mxu0 %v3651_v16  ;;  %v3663_v27 = vpack.c.bf16 %v7796_v63, %v8155_v39  ;;  %v6030_v30 = vld [vmem:[%s8046_s2 + $0x120] sm:$0xff]  }
 0x9a2   : > { %4322 = vmatmul.mubr.bf16.vlgmr.msra.gmra.mrb[72].mxu0 %v3639_v18  ;;  %v3560_v49 = vpop.permute.xlu0 %3559  ;;  %v3645_v57 = vld [vmem:[#allocation2 + $0x27] sm:$0xff] }
 0x9a3   : > { %5622 = vmatpush3.bf16.msra.mxu0 %v6015_v41  ;;  %3579 = vst.msk [vmem:[#allocation2 + $0x40] sm:$0xff] %vm8154_vm15, %v3560_v49  ;;  %v3669_v36 = vpack.c.bf16 %v3645_v57, %v3644_v12  ;;  %v3606_v1 = vpop.permute.xlu1 %3605  ;;  %v3633_v37 = vld [vmem:[#allocation2 + $0x26] sm:$0xff]  ;;  %v6037_v41 = vld [vmem:[%s8046_s2 + $0x170] sm:$0xff]  }
 0x9a4   : > { %5623 = vmatprep.subr.bf16.mxu0 %v6017_v38  ;;  %3626 = vst.msk [vmem:[#allocation2 + $0x38] sm:$0xff] %vm733_vm9, %v3606_v1  ;;  %v7837_v7 = vld [vmem:[#allocation2 + $0x28] sm:$0xff]  ;;  %v6035_v42 = vld [vmem:[%s8046_s2 + $0x1e0] sm:$0xff]  }
 0x9a5   : > { %4386 = vmatprep.mubr.bf16.mxu1 %v3669_v36  ;;  %v6034_v18 = vld [vmem:[%s8046_s2 + $0x128] sm:$0xff]   ;;  %v6036_v49 = vld [vmem:[%s8046_s2 + $0x1a0] sm:$0xff]  }
 0x9a6   : > { %4387 = vmatmul.mubr.bf16.vlgmr.msra.gmra.mrb[72].mxu1 %v3663_v27  ;;  %v3608_v11 = vpop.permute.xlu0 %3607 }
 0x9a7   : > { %v3646_v23 = vld [vmem:[#allocation2 + $0x2f] sm:$0xff]  ;;  %5624 = vmatpush3.bf16.msra.mxu0 %v6019_v13  ;;  %3627 = vst.msk [vmem:[#allocation2 + $0x40] sm:$0xff] %vm733_vm9, %v3608_v11  ;;  %5662 = vmatpush3.bf16.msra.mxu1 %v6020_v43  ;;  %v3562_v54 = vpop.permute.xlu1 %3561 }
 0x9a8   : > { %v3634_v17 = vld [vmem:[#allocation2 + $0x2e] sm:$0xff]  ;;  %v3652_v35 = vpack.c.bf16 %v3646_v23, %v3645_v57  ;;  %5625 = vmatprep.subr.bf16.mxu0 %v6021_v5  ;;  %5663 = vmatprep.subr.bf16.mxu1 %v6023_v62  ;;  %3580 = vst.msk [vmem:[#allocation2 + $0x48] sm:$0xff] %vm8156_vm1, %v3562_v54 }
 0x9a9   : > { %v3640_v44 = vpack.c.bf16 %v3634_v17, %v3633_v37  ;;  %v7829_v26 = vld [vmem:[#allocation2 + $0x30] sm:$0xff]  ;;  %v6039_v57 = vld [vmem:[%s8046_s2 + $0x1e8] sm:$0xff]  }
 0x9aa   : > { %4329 = vmatprep.mubr.bf16.mxu0 %v3652_v35  ;;  %v3564_v0 = vpop.permute.xlu0 %3563  ;;  %v7847_v6 = vpack.c.bf16 %v7829_v26, %v7837_v7  ;;  %v3680_v43 = vld [vmem:[#allocation2 + $0x29] sm:$0xff]  ;;  %v3679_v17 = vld [vmem:[#allocation2 + $0x21] sm:$0xff] }
 0x9ab   : > { %4330 = vmatmul.mubr.bf16.gmra.mrb[76].mxu0 %v3640_v44  ;;  %3581 = vst.msk [vmem:[#allocation2 + $0x50] sm:$0xff] %vm8139_vm0, %v3564_v0  ;;  %5664 = vmatpush3.bf16.msra.mxu1 %v6024_v46  ;;  %v3647_v61 = vld [vmem:[#allocation2 + $0x37] sm:$0xff]  ;;  %v6040_v35 = vld [vmem:[%s8046_s2 + $0x1a8] sm:$0xff]  }
 0x9ac   : > { %5626 = vmatpush3.bf16.msra.mxu0 %v6022_v31  ;;  %5665 = vmatprep.subr.bf16.mxu1 %v6027_v28  ;;  %v3670_v50 = vpack.c.bf16 %v3647_v61, %v3646_v23  ;;  %v3635_v21 = vld [vmem:[#allocation2 + $0x36] sm:$0xff]  ;;  %v3687_v31 = vpack.c.bf16 %v3680_v43, %v3679_v17 }
 0x9ad   : > { %5627 = vmatprep.subr.bf16.mxu0 %v6025_v4  ;;  %v3610_v3 = vpop.permute.xlu1 %3609  ;;  %v7880_v13 = vld [vmem:[#allocation2 + $0x38] sm:$0xff]  ;;  %v6038_v37 = vld [vmem:[%s8046_s2 + $0x130] sm:$0xff]  }
 0x9ae   : > { %v3648_v48 = vld [vmem:[#allocation2 + $0x3f] sm:$0xff]  ;;  %3628 = vst.msk [vmem:[#allocation2 + $0x48] sm:$0xff] %vm733_vm9, %v3610_v3  ;;  %4394 = vmatprep.mubr.bf16.mxu1 %v3670_v50  ;;  %v3612_v29 = vpop.permute.xlu0 %3611  ;;  %v6043_v46 = vld [vmem:[%s8046_s2 + $0x1f0] sm:$0xff]  }
 0x9af   : > { %v3636_v32 = vld [vmem:[#allocation2 + $0x3e] sm:$0xff]  ;;  %v3653_v15 = vpack.c.bf16 %v3648_v48, %v3647_v61  ;;  %4395 = vmatmul.mubr.bf16.gmra.mrb[76].mxu1 %v7847_v6  ;;  %3629 = vst.msk [vmem:[#allocation2 + $0x50] sm:$0xff] %vm733_vm9, %v3612_v29  ;;  %v6044_v61 = vld [vmem:[%s8046_s2 + $0x1b0] sm:$0xff]  }
 0x9b0   : > { %5628 = vmatpush3.bf16.msra.mxu0 %v6026_v34  ;;  %v3641_v33 = vpack.c.bf16 %v3636_v32, %v3635_v21  ;;  %5666 = vmatpush3.bf16.msra.mxu1 %v6028_v47  ;;  %v7872_v38 = vld [vmem:[#allocation2 + $0x40] sm:$0xff]  ;;  %v6041_v44 = vld [vmem:[%s8046_s2 + $0x178] sm:$0xff]   ;;  %v3675_v21 = vpack.c.bf16 %v7837_v7, %v7796_v63  ;;  %v6049_v63 = vld [vmem:[%s8046_s2 + $0x210] sm:$0xff]  }
 0x9b1   : > { %5629 = vmatprep.subr.bf16.mxu0 %v6029_v24  ;;  %4337 = vmatprep.mubr.bf16.mxu0 %v3653_v15  ;;  %v3566_v12 = vpop.permute.xlu1 %3565  ;;  %v7884_v62 = vpack.c.bf16 %v7872_v38, %v7880_v13  ;;  %v6042_v0 = vld [vmem:[%s8046_s2 + $0x138] sm:$0xff]   ;;  %v6045_v24 = vld [vmem:[%s8046_s2 + $0x200] sm:$0xff]   ;;  %v6048_v15 = vld [vmem:[%s8046_s2 + $0x208] sm:$0xff]  }
 0x9b2   : > { %5667 = vmatprep.subr.bf16.mxu1 %v6031_v9  ;;  %3582 = vst.msk [vmem:[#allocation2 + $0x58] sm:$0x1f] %vm8157_vm2, %v3566_v12  ;;  %v3614_v16 = vpop.permute.xlu0 %3613  ;;  %v3681_v50 = vld [vmem:[#allocation2 + $0x31] sm:$0xff]  ;;  %v3682_v3 = vld [vmem:[#allocation2 + $0x39] sm:$0xff] }
 0x9b3   : > { %4338 = vmatmul.mubr.bf16.gmra.mrb[80].mxu0 %v3641_v33  ;;  %3630 = vst.msk [vmem:[#allocation2 + $0x58] sm:$0x1f] %vm741_vm5, %v3614_v16  ;;  %v6046_v47 = vld [vmem:[%s8046_s2 + $0x1f8] sm:$0xff]   ;;  %v3697_v32 = vpack.c.bf16 %v3681_v50, %v3680_v43  ;;  %v3688_v33 = vpack.c.bf16 %v3682_v3, %v3681_v50  ;;  %v3696_v43 = vld [vmem:[#allocation2 + $0x61] sm:$0x1f] }
 0x9b4   : > { %5630 = vmatpush3.bf16.msra.mxu0 %v6030_v30  ;;  %5668 = vmatpush3.bf16.msra.mxu1 %v6032_v2  ;;  %v6047_v29 = vld [vmem:[%s8046_s2 + $0x1b8] sm:$0xff]   ;;  %v3676_v2 = vpack.c.bf16 %v7880_v13, %v7829_v26 }
 0x9b5   : > { %5631 = vmatprep.subr.bf16.mxu0 %v6033_v25  ;;  %v3649_v36 = vld [vmem:[#allocation2 + $0x47] sm:$0xff]  ;;  %5669 = vmatprep.subr.bf16.mxu1 %v6035_v42  ;;  %v6050_v12 = vld [vmem:[%s8046_s2 + $0x218] sm:$0xff]  }
 0x9b6   : > { %v3671_v1 = vpack.c.bf16 %v3649_v36, %v3648_v48  ;;  %v3650_v39 = vld [vmem:[#allocation2 + $0x4f] sm:$0x1f]  ;;  %v3637_v27 = vld [vmem:[#allocation2 + $0x46] sm:$0xff] }
 0x9b7   : > { %v3638_v5 = vld [vmem:[#allocation2 + $0x4e] sm:$0x1f]  ;;  %v3654_v11 = vpack.c.bf16 %v3650_v39, %v3649_v36  ;;  %v3683_v7 = vld [vmem:[#allocation2 + $0x41] sm:$0xff] }
 0x9b8   : > { %5632 = vmatpush3.bf16.msra.mxu0 %v6034_v18  ;;  %v3642_v23 = vpack.c.bf16 %v3638_v5, %v3637_v27  ;;  %4402 = vmatprep.mubr.bf16.mxu1 %v3671_v1  ;;  %v3667_v54 = vld [vmem:[#allocation2 + $0x4f] sm:$0xff]  ;;  %v3698_v25 = vpack.c.bf16 %v3683_v7, %v3682_v3 }
 0x9b9   : > { %5633 = vmatprep.subr.bf16.mxu0 %v6037_v41  ;;  %5670 = vmatpush3.bf16.msra.mxu1 %v6036_v49  ;;  %v3662_v34 = vld [vmem:[#allocation2 + $0x50] sm:$0x1f]  ;;  %v7911_v9 = vld [vmem:[#allocation2 + $0x48] sm:$0xff] }
 0x9ba   : > { %4403 = vmatmul.mubr.bf16.gmra.mrb[80].mxu1 %v7884_v62  ;;  %4345 = vmatprep.mubr.bf16.mxu0 %v3654_v11  ;;  %v3668_v4 = vld [vmem:[#allocation2 + $0x57] sm:$0x1f]  ;;  %v3666_v48 = vpack.c.bf16 %v3662_v34, %v7911_v9  ;;  %v3684_v30 = vld [vmem:[#allocation2 + $0x49] sm:$0xff]  ;;  %v3677_v41 = vpack.c.bf16 %v7911_v9, %v7872_v38 }
 0x9bb   : > { %4346 = vmatmul.mubr.bf16.gmra.mrb[84].mxu0 %v3642_v23  ;;  %5671 = vmatprep.subr.bf16.mxu1 %v6039_v57  ;;  %v3672_v28 = vpack.c.bf16 %v3668_v4, %v3667_v54  ;;  %v3689_v42 = vpack.c.bf16 %v3684_v30, %v3683_v7  ;;  %v3685_v16 = vld [vmem:[#allocation2 + $0x51] sm:$0xff]  ;;  %v3686_v26 = vld [vmem:[#allocation2 + $0x59] sm:$0x1f]  ;;  %v6052_v49 = vld [vmem:[%s8046_s2 + $0x228] sm:$0xff]  }
 0x9bc   : > { %5634 = vmatpush3.bf16.msra.mxu0 %v6038_v37  ;;  %4451 = vmatprep.mubr.bf16.mxu0 %v3687_v31  ;;  %v3699_v18 = vpack.c.bf16 %v3685_v16, %v3684_v30  ;;  %v3690_v57 = vpack.c.bf16 %v3686_v26, %v3685_v16  ;;  %v3673_v36 = vld [vmem:[#allocation2 + $0x50] sm:$0xff]  ;;  %v3695_v13 = vld [vmem:[#allocation2 + $0x59] sm:$0xff]  ;;  %v3704_v31 = vld [vmem:[#allocation2 + $0x42] sm:$0xff] }
 0x9bd   : > { %5672 = vmatpush3.bf16.msra.mxu1 %v6040_v35  ;;  %5635 = vmatprep.subr.bf16.mxu0 %v6041_v44  ;;  %v6053_v1 = vld [vmem:[%s8046_s2 + $0x230] sm:$0xff]   ;;  %v3674_v38 = vld [vmem:[#allocation2 + $0x58] sm:$0x1f]  ;;  %v3693_v39 = vpack.c.bf16 %v3673_v36, %v7911_v9  ;;  %v3700_v5 = vpack.c.bf16 %v3696_v43, %v3695_v13  ;;  %v3692_v35 = vld [vmem:[#allocation2 + $0x60] sm:$0x1f] }
 0x9be   : > { %4410 = vmatprep.mubr.bf16.mxu1 %v3672_v28  ;;  %5673 = vmatprep.subr.bf16.mxu1 %v6043_v46  ;;  %v3702_v27 = vld [vmem:[#allocation2 + $0x32] sm:$0xff]  ;;  %v3701_v11 = vld [vmem:[#allocation2 + $0x2a] sm:$0xff]  ;;  %v3703_v28 = vld [vmem:[#allocation2 + $0x3a] sm:$0xff] }
 0x9bf   : > { %v6054_v23 = vld [vmem:[%s8046_s2 + $0x238] sm:$0xff]   ;;  %v3709_v37 = vpack.c.bf16 %v3702_v27, %v3701_v11  ;;  %v3705_v54 = vld [vmem:[#allocation2 + $0x4a] sm:$0xff] }
 0x9c0   : > { %5636 = vmatpush3.bf16.msra.mxu0 %v6042_v0  ;;  %v3691_v17 = vld [vmem:[#allocation2 + $0x58] sm:$0xff]  ;;  %v3710_v0 = vpack.c.bf16 %v3704_v31, %v3703_v28 }
 0x9c1   : > { %5674 = vmatpush3.bf16.msra.mxu1 %v6044_v61  ;;  %5766 = vmatprep.subr.bf16.mxu0 %v6045_v24  ;;  %v3706_v44 = vld [vmem:[#allocation2 + $0x52] sm:$0xff]  ;;  %v3694_v46 = vpack.c.bf16 %v3692_v35, %v3691_v17  ;;  %v3707_v34 = vld [vmem:[#allocation2 + $0x5a] sm:$0xff]  ;;  %v3708_v61 = vld [vmem:[#allocation2 + $0x62] sm:$0x1f] }
 0x9c2   : > { %4411 = vmatmul.mubr.bf16.gmra.mrb[84].mxu1 %v3666_v48  ;;  %5675 = vmatprep.subr.bf16.mxu1 %v6046_v47  ;;  %v3711_v4 = vpack.c.bf16 %v3706_v44, %v3705_v54 }
 0x9c3   : > { %4516 = vmatprep.mubr.bf16.mxu1 %v3697_v32  ;;  %4452 = vmatmul.mubr.bf16.vlgmr.msra.gmra.mrb[88].mxu0 %v3675_v21 }
 0x9c4   : > { %5767 = vmatpush3.bf16.msra.mxu0 %v6045_v24  ;;  %4459 = vmatprep.mubr.bf16.mxu0 %v3688_v33 }
 0x9c5   : > { %5676 = vmatpush3.bf16.msra.mxu1 %v6047_v29  ;;  %5768 = vmatprep.subr.bf16.mxu0 %v6048_v15 }
 0x9c6   : > { %5807 = vmatprep.subr.bf16.mxu1 %v6045_v24 }
 0x9c8   : > { %5769 = vmatpush3.bf16.msra.mxu0 %v6048_v15 }
 0x9c9   : > { %5770 = vmatprep.subr.bf16.mxu0 %v6049_v63 }
 0x9ca   : > { %4517 = vmatmul.mubr.bf16.vlgmr.msra.gmra.mrb[88].mxu1 %v7847_v6  ;;  %v6051_v6 = vld [vmem:[%s8046_s2 + $0x220] sm:$0xff]  }
 0x9cb   : > { %4524 = vmatprep.mubr.bf16.mxu1 %v3698_v25  ;;  %5815 = vmatpush3.bf16.msra.mxu1 %v6045_v24  ;;  %v3712_v24 = vpack.c.bf16 %v3708_v61, %v3707_v34 }
 0x9cc   : > { %4460 = vmatmul.mubr.bf16.gmra.mrb[92].mxu0 %v3676_v2  ;;  %5808 = vmatprep.subr.bf16.mxu1 %v6048_v15 }
 0x9cd   : > { %5771 = vmatpush3.bf16.msra.mxu0 %v6049_v63  ;;  %4467 = vmatprep.mubr.bf16.mxu0 %v3689_v42 }
 0x9ce   : > { %5772 = vmatprep.subr.bf16.mxu0 %v6050_v12 }
 0x9cf   : > { %5816 = vmatpush3.bf16.msra.mxu1 %v6048_v15  ;;  %v6246_v15 = vld [vmem:[%s8047_s3 + $0x10] ss:$0 sm:$0xff] }
 0x9d0   : > { %5809 = vmatprep.subr.bf16.mxu1 %v6049_v63 }
 0x9d1   : > { %5773 = vmatpush3.bf16.msra.mxu0 %v6050_v12 }
 0x9d2   : > { %4525 = vmatmul.mubr.bf16.gmra.mrb[92].mxu1 %v7884_v62  ;;  %5774 = vmatprep.subr.bf16.mxu0 %v6051_v6  ;;  %v3678_v62 = vpack.c.bf16 %v3674_v38, %v3673_v36 }
 0x9d3   : > { %4532 = vmatprep.mubr.bf16.mxu1 %v3699_v18  ;;  %5817 = vmatpush3.bf16.msra.mxu1 %v6049_v63 }
 0x9d4   : > { %4468 = vmatmul.mubr.bf16.gmra.mrb[96].mxu0 %v3677_v41  ;;  %5810 = vmatprep.subr.bf16.mxu1 %v6050_v12 }
 0x9d5   : > { %5775 = vmatpush3.bf16.msra.mxu0 %v6051_v6  ;;  %4475 = vmatprep.mubr.bf16.mxu0 %v3690_v57 }
 0x9d6   : > { %5776 = vmatprep.subr.bf16.mxu0 %v6052_v49 }
 0x9d7   : > { %5818 = vmatpush3.bf16.msra.mxu1 %v6050_v12 }
 0x9d8   : > { %5811 = vmatprep.subr.bf16.mxu1 %v6051_v6 }
 0x9d9   : > { %5777 = vmatpush3.bf16.msra.mxu0 %v6052_v49 }
 0x9da   : > { %4533 = vmatmul.mubr.bf16.gmra.mrb[96].mxu1 %v3693_v39  ;;  %5778 = vmatprep.subr.bf16.mxu0 %v6053_v1 }
 0x9db   : > { %4540 = vmatprep.mubr.bf16.mxu1 %v3700_v5  ;;  %5819 = vmatpush3.bf16.msra.mxu1 %v6051_v6 }
 0x9dc   : > { %4476 = vmatmul.mubr.bf16.gmra.mrb[100].mxu0 %v3678_v62  ;;  %5812 = vmatprep.subr.bf16.mxu1 %v6052_v49 }
 0x9dd   : > { %5779 = vmatpush3.bf16.msra.mxu0 %v6053_v1  ;;  %5782 = vmatprep.mubr.bf16.mxu0 %v3709_v37 }
 0x9de   : > { %5780 = vmatprep.subr.bf16.mxu0 %v6054_v23 }
 0x9df   : > { %5820 = vmatpush3.bf16.msra.mxu1 %v6052_v49 }
 0x9e0   : > { %5813 = vmatprep.subr.bf16.mxu1 %v6053_v1 }
 0x9e1   : > { %5781 = vmatpush3.bf16.msra.mxu0 %v6054_v23 }
 0x9e2   : > { %4541 = vmatmul.mubr.bf16.gmra.mrb[100].mxu1 %v3694_v46 }
 0x9e3   : > { %5821 = vmatpush3.bf16.msra.mxu1 %v6053_v1  ;;  %5786 = vmatprep.mubr.bf16.mxu1 %v3711_v4 }
 0x9e4   : > { %5814 = vmatprep.subr.bf16.mxu1 %v6054_v23  ;;  %5783 = vmatmul.mubr.bf16.vlgmr.msra.gmra.mrb[104].mxu0 %v3710_v0 }
 0x9e7   : > { %5822 = vmatpush3.bf16.msra.mxu1 %v6054_v23 }
 0x9ea   : > { %5787 = vmatmul.mubr.bf16.vlgmr.msra.gmra.mrb[104].mxu1 %v3712_v24 }
 0xa75   : > { %v5557_v50 = vpop.f32.mrb[72].mxu0 }
 0xa76   : > { %v5558_v47 = vpop.f32.mrb[73].mxu0 }
 0xa77   : > { %v5559_v9 = vadd.f32 %v5558_v47, %v5557_v50  ;;  %v5560_v3 = vpop.f32.mrb[74].mxu0 }
 0xa78   : > { %v5561_v48 = vpop.f32.mrb[75].mxu0 }
 0xa79   : > { %v5562_v21 = vadd.f32 %v5561_v48, %v5560_v3  ;;  %v5597_v32 = vpop.f32.mrb[72].mxu1  ;;  %v4324_v33 = vadd.f32 %v6246_v15, %v5559_v9 }
 0xa7a   : > { %v5598_v29 = vpop.f32.mrb[73].mxu1 }
 0xa7b   : > { %v5599_v63 = vadd.f32 %v5598_v29, %v5597_v32  ;;  %v5600_v7 = vpop.f32.mrb[74].mxu1  ;;  %v4327_v25 = vadd.f32 %v6246_v15, %v5562_v21 }
 0xa7c   : > { %v5601_v30 = vpop.f32.mrb[75].mxu1 }
 0xa7d   : > { %v4389_v2 = vadd.f32 %v5599_v63, %v4324_v33  ;;  %v5602_v12 = vadd.f32 %v5601_v30, %v5600_v7 }
 0xa7e   : > { %v5563_v42 = vpop.f32.mrb[76].mxu0 }
 0xa7f   : > { %v5564_v16 = vpop.f32.mrb[77].mxu0  ;;  %v4392_v6 = vadd.f32 %v5602_v12, %v4327_v25 }
 0xa80   : > { %v5565_v26 = vadd.f32 %v5564_v16, %v5563_v42  ;;  %v5566_v18 = vpop.f32.mrb[78].mxu0 }
 0xa81   : > { %v5567_v41 = vpop.f32.mrb[79].mxu0 }
 0xa82   : > { %v5568_v49 = vadd.f32 %v5567_v41, %v5566_v18  ;;  %v5603_v57 = vpop.f32.mrb[76].mxu1  ;;  %v4332_v13 = vadd.f32 %v6246_v15, %v5565_v26 }
 0xa83   : > { %v5604_v36 = vpop.f32.mrb[77].mxu1 }
 0xa84   : > { %v5605_v43 = vadd.f32 %v5604_v36, %v5603_v57  ;;  %v5606_v1 = vpop.f32.mrb[78].mxu1  ;;  %v4335_v5 = vadd.f32 %v6246_v15, %v5568_v49 }
 0xa85   : > { %v5607_v39 = vpop.f32.mrb[79].mxu1 }
 0xa86   : > { %v5569_v38 = vpop.f32.mrb[80].mxu0  ;;  %v4397_v62 = vadd.f32 %v5605_v43, %v4332_v13  ;;  %v5608_v11 = vadd.f32 %v5607_v39, %v5606_v1 }
 0xa87   : > { %v5570_v27 = vpop.f32.mrb[81].mxu0 }
 0xa88   : > { %v5571_v23 = vadd.f32 %v5570_v27, %v5569_v38  ;;  %v5572_v37 = vpop.f32.mrb[82].mxu0  ;;  %v4400_v35 = vadd.f32 %v5608_v11, %v4335_v5 }
 0xa89   : > { %v5573_v17 = vpop.f32.mrb[83].mxu0 }
 0xa8a   : > { %v5574_v44 = vadd.f32 %v5573_v17, %v5572_v37  ;;  %v4340_v4 = vadd.f32 %v6246_v15, %v5571_v23 }
 0xa8c   : > { %v4343_v47 = vadd.f32 %v6246_v15, %v5574_v44 }
 0xa8d   : > { %v5609_v31 = vpop.f32.mrb[80].mxu1 }
 0xa8e   : > { %v5610_v46 = vpop.f32.mrb[81].mxu1  ;;  %v5575_v54 = vpop.f32.mrb[84].mxu0 }
 0xa8f   : > { %v5611_v28 = vadd.f32 %v5610_v46, %v5609_v31  ;;  %v5612_v0 = vpop.f32.mrb[82].mxu1  ;;  %v5576_v34 = vpop.f32.mrb[85].mxu0 }
 0xa90   : > { %v5613_v61 = vpop.f32.mrb[83].mxu1  ;;  %v5577_v24 = vadd.f32 %v5576_v34, %v5575_v54  ;;  %v5578_v50 = vpop.f32.mrb[86].mxu0 }
 0xa91   : > { %v4405_v9 = vadd.f32 %v5611_v28, %v4340_v4  ;;  %v5614_v3 = vadd.f32 %v5613_v61, %v5612_v0  ;;  %v5579_v48 = vpop.f32.mrb[87].mxu0 }
 0xa92   : > { %v5580_v21 = vadd.f32 %v5579_v48, %v5578_v50  ;;  %v4348_v7 = vadd.f32 %v6246_v15, %v5577_v24 }
 0xa93   : > { %v4408_v32 = vadd.f32 %v5614_v3, %v4343_v47 }
 0xa94   : > { %v4351_v18 = vadd.f32 %v6246_v15, %v5580_v21 }
 0xa95   : > { %v5615_v29 = vpop.f32.mrb[84].mxu1 }
 0xa96   : > { %v5616_v33 = vpop.f32.mrb[85].mxu1  ;;  %v5637_v63 = vpop.f32.mrb[88].mxu0 }
 0xa97   : > { %v5617_v30 = vadd.f32 %v5616_v33, %v5615_v29  ;;  %v5618_v25 = vpop.f32.mrb[86].mxu1  ;;  %v5638_v12 = vpop.f32.mrb[89].mxu0 }
 0xa98   : > { %v5619_v42 = vpop.f32.mrb[87].mxu1  ;;  %v5639_v16 = vadd.f32 %v5638_v12, %v5637_v63  ;;  %v5640_v26 = vpop.f32.mrb[90].mxu0 }
 0xa99   : > { %v4413_v41 = vadd.f32 %v5617_v30, %v4348_v7  ;;  %v5620_v49 = vadd.f32 %v5619_v42, %v5618_v25  ;;  %v5641_v57 = vpop.f32.mrb[91].mxu0 }
 0xa9a   : > { %v4454_v36 = vadd.f32 %v5639_v16, %v4389_v2  ;;  %v5642_v13 = vadd.f32 %v5641_v57, %v5640_v26 }
 0xa9b   : > { %v4416_v43 = vadd.f32 %v5620_v49, %v4351_v18 }
 0xa9c   : > { %v4457_v1 = vadd.f32 %v5642_v13, %v4392_v6 }
 0xa9d   : > { %v5677_v38 = vpop.f32.mrb[88].mxu1 }
 0xa9e   : > { %v5678_v39 = vpop.f32.mrb[89].mxu1 }
 0xa9f   : > { %v5679_v27 = vadd.f32 %v5678_v39, %v5677_v38  ;;  %v5680_v5 = vpop.f32.mrb[90].mxu1  ;;  %v5643_v11 = vpop.f32.mrb[92].mxu0 }
 0xaa0   : > { %v5681_v23 = vpop.f32.mrb[91].mxu1  ;;  %v5644_v37 = vpop.f32.mrb[93].mxu0 }
 0xaa1   : > { %v5682_v17 = vadd.f32 %v5681_v23, %v5680_v5  ;;  %v5645_v44 = vadd.f32 %v5644_v37, %v5643_v11  ;;  %v5646_v31 = vpop.f32.mrb[94].mxu0  ;;  %v4519_v46 = vadd.f32 %v5679_v27, %v4454_v36 }
 0xaa2   : > { %v5647_v54 = vpop.f32.mrb[95].mxu0 }
 0xaa3   : > { %v4462_v15 = vadd.f32 %v5645_v44, %v4397_v62  ;;  %v5648_v4 = vadd.f32 %v5647_v54, %v5646_v31  ;;  %v4522_v28 = vadd.f32 %v5682_v17, %v4457_v1 }
 0xaa5   : > { %v4465_v0 = vadd.f32 %v5648_v4, %v4400_v35  ;;  %v5683_v2 = vpop.f32.mrb[92].mxu1 }
 0xaa6   : > { %v5684_v34 = vpop.f32.mrb[93].mxu1 }
 0xaa7   : > { %v5685_v61 = vadd.f32 %v5684_v34, %v5683_v2  ;;  %v5686_v6 = vpop.f32.mrb[94].mxu1  ;;  %v5649_v24 = vpop.f32.mrb[96].mxu0 }
 0xaa8   : > { %v5687_v50 = vpop.f32.mrb[95].mxu1  ;;  %v5650_v47 = vpop.f32.mrb[97].mxu0 }
 0xaa9   : > { %v5688_v3 = vadd.f32 %v5687_v50, %v5686_v6  ;;  %v5651_v48 = vadd.f32 %v5650_v47, %v5649_v24  ;;  %v5652_v21 = vpop.f32.mrb[98].mxu0  ;;  %v4527_v29 = vadd.f32 %v5685_v61, %v4462_v15 }
 0xaaa   : > { %v5653_v33 = vpop.f32.mrb[99].mxu0 }
 0xaab   : > { %v4470_v63 = vadd.f32 %v5651_v48, %v4405_v9  ;;  %v5654_v7 = vadd.f32 %v5653_v33, %v5652_v21  ;;  %v4530_v30 = vadd.f32 %v5688_v3, %v4465_v0 }
 0xaad   : > { %v4473_v25 = vadd.f32 %v5654_v7, %v4408_v32  ;;  %v5689_v62 = vpop.f32.mrb[96].mxu1 }
 0xaae   : > { %v5690_v12 = vpop.f32.mrb[97].mxu1 }
 0xaaf   : > { %v5691_v42 = vadd.f32 %v5690_v12, %v5689_v62  ;;  %v5692_v35 = vpop.f32.mrb[98].mxu1  ;;  %v5655_v16 = vpop.f32.mrb[100].mxu0 }
 0xab0   : > { %v5693_v26 = vpop.f32.mrb[99].mxu1  ;;  %v5656_v18 = vpop.f32.mrb[101].mxu0 }
 0xab1   : > { %v5694_v49 = vadd.f32 %v5693_v26, %v5692_v35  ;;  %v5657_v57 = vadd.f32 %v5656_v18, %v5655_v16  ;;  %v5658_v36 = vpop.f32.mrb[102].mxu0  ;;  %v4535_v13 = vadd.f32 %v5691_v42, %v4470_v63 }
 0xab2   : > { %v5659_v1 = vpop.f32.mrb[103].mxu0 }
 0xab3   : > { %v4478_v38 = vadd.f32 %v5657_v57, %v4413_v41  ;;  %v5660_v39 = vadd.f32 %v5659_v1, %v5658_v36  ;;  %v4538_v27 = vadd.f32 %v5694_v49, %v4473_v25 }
 0xab5   : > { %v4481_v5 = vadd.f32 %v5660_v39, %v4416_v43  ;;  %v5695_v9 = vpop.f32.mrb[100].mxu1 }
 0xab6   : > { %v5696_v11 = vpop.f32.mrb[101].mxu1 }
 0xab7   : > { %v5697_v23 = vadd.f32 %v5696_v11, %v5695_v9  ;;  %v5698_v32 = vpop.f32.mrb[102].mxu1  ;;  %v5784_v37 = vpop.f32.mrb[104].mxu0 }
 0xab8   : > { %v5699_v17 = vpop.f32.mrb[103].mxu1  ;;  %v7950_v44 = vadd.f32 %v5784_v37, %v4527_v29  ;;  %v4583_v31 = vpop.f32.mrb[105].mxu0 }
 0xab9   : > { %v5700_v54 = vadd.f32 %v5699_v17, %v5698_v32  ;;  %v7952_v15 = vadd.f32 %v4583_v31, %v4519_v46  ;;  %v5785_v4 = vpop.f32.mrb[106].mxu0  ;;  %v4543_v0 = vadd.f32 %v5697_v23, %v4478_v38 }
 0xaba   : > { %v4616_v2 = vmul.f32 0.5, %v7950_v44  ;;  %v7955_v41 = vadd.f32 %v5785_v4, %v4530_v30  ;;  %v4586_v34 = vpop.f32.mrb[107].mxu0  ;;  %v4764_v4 = vld [vmem:[%s8047_s3 + $0x18] sm:$0xff] }
 0xabb   : > { %v4614_v43 = vmul.f32 0.5, %v7952_v15  ;;  %v7958_v61 = vadd.f32 %v4586_v34, %v4522_v28  ;;  %v4546_v6 = vadd.f32 %v5700_v54, %v4481_v5  ;;  %v6261_v34 = vmov 0.0|0.0  }
 0xabc   : > { %6205 = vtanh.f32 %v4616_v2  ;;  %v4617_v24 = vmul.f32 0.5, %v7955_v41  ;;  %v4766_v2 = vld [vmem:[%s8047_s3 + $0x28] sm:$0xff]  ;;  %5801 = vmatprep.subr.bf16.mxu1 %v6261_v34 }
 0xabd   : > { %6207 = vtanh.f32 %v4614_v43  ;;  %v5788_v50 = vpop.f32.mrb[104].mxu1  ;;  %v4615_v21 = vmul.f32 0.5, %v7958_v61 }
 0xabe   : > { %6209 = vtanh.f32 %v4617_v24  ;;  %v7961_v46 = vadd.f32 %v5788_v50, %v4543_v0  ;;  %v4599_v47 = vpop.f32.mrb[105].mxu1  ;;  %v4765_v0 = vld [vmem:[%s8047_s3 + $0x20] sm:$0xff] }
 0xabf   : > { %v7963_v3 = vadd.f32 %v4599_v47, %v4535_v13  ;;  %v5789_v48 = vpop.f32.mrb[106].mxu1  ;;  %v5802_v43 = vpack.c.bf16 %v4765_v0, %v4764_v4  ;;  %v6247_v24 = vld [vmem:[#allocation2] sm:$0xff] }
 0xac0   : > { %v4620_v29 = vmul.f32 0.5, %v7961_v46  ;;  %v7967_v33 = vadd.f32 %v5789_v48, %v4546_v6  ;;  %v4602_v28 = vpop.f32.mrb[107].mxu1  ;;  %v4767_v6 = vld [vmem:[%s8047_s3 + $0x30] sm:$0xff]  ;;  %5798 = vmatprep.mubr.msk.f32.mxu1 %vm6262_vm3, %v6247_v24 }
 0xac1   : > { %v7969_v63 = vadd.f32 %v4602_v28, %v4538_v27  ;;  %v4618_v12 = vmul.f32 0.5, %v7963_v3  ;;  %5803 = vmatpush3.bf16.msra.mxu1 %v5802_v43  ;;  %v5805_v50 = vpack.c.bf16 %v4767_v6, %v4766_v2 }
 0xac2   : > { %6211 = vtanh.f32 %v4620_v29  ;;  %v4621_v1 = vmul.f32 0.5, %v7967_v33  ;;  %5804 = vmatprep.subr.bf16.mxu1 %v6261_v34 }
 0xac3   : > { %6213 = vtanh.f32 %v4615_v21  ;;  %v4619_v18 = vmul.f32 0.5, %v7969_v63 }
 0xac4   : > { %6215 = vtanh.f32 %v4618_v12 }
 0xac5   : > { %6217 = vtanh.f32 %v4619_v18  ;;  %5806 = vmatpush3.bf16.msra.mxu1 %v5805_v50 }
 0xac6   : > { %v6206_v7 = vpop.eup %6205  ;;  %6219 = vtanh.f32 %v4621_v1 }
 0xac7   : > { %v6208_v30 = vpop.eup %6207  ;;  %v4632_v25 = vmul.f32 0.5, %v6206_v7  ;;  %6221 = vtanh.f32 %v7950_v44 }
 0xac8   : > { %v6210_v62 = vpop.eup %6209  ;;  %v4630_v35 = vmul.f32 0.5, %v6208_v30  ;;  %6223 = vtanh.f32 %v7952_v15 }
 0xac9   : > { %v4640_v42 = vadd.f32 0.5, %v4632_v25  ;;  %v4633_v16 = vmul.f32 0.5, %v6210_v62  ;;  %6225 = vtanh.f32 %v7955_v41 }
 0xaca   : > { %v4638_v49 = vadd.f32 0.5, %v4630_v35  ;;  %6227 = vtanh.f32 %v7958_v61 }
 0xacb   : > { %4698 = vrot.lane.b32.xlu0 %v4640_v42, %s6259_s12  ;;  %4666 = vrot.lane.b32.xlu1 %v4640_v42, %s6258_s6  ;;  %v4641_v57 = vadd.f32 0.5, %v4633_v16  ;;  %6229 = vtanh.f32 %v7961_v46 }
 0xacc   : > { %v6212_v26 = vpop.eup %6211  ;;  %6231 = vtanh.f32 %v7963_v3 }
 0xacd   : > { %v4636_v36 = vmul.f32 0.5, %v6212_v26  ;;  %v6214_v13 = vpop.eup %6213  ;;  %6233 = vtanh.f32 %v7969_v63 }
 0xace   : > { %v4631_v38 = vmul.f32 0.5, %v6214_v13  ;;  %v6216_v5 = vpop.eup %6215  ;;  %6235 = vtanh.f32 %v7967_v33 }
 0xacf   : > { %4700 = vrot.lane.b32.xlu0 %v4641_v57, %s6259_s12  ;;  %4662 = vrot.lane.b32.xlu1 %v4638_v49, %s6258_s6  ;;  %v4644_v39 = vadd.f32 0.5, %v4636_v36  ;;  %v4634_v9 = vmul.f32 0.5, %v6216_v5  ;;  %v6218_v11 = vpop.eup %6217 }
 0xad0   : > { %v4639_v27 = vadd.f32 0.5, %v4631_v38  ;;  %v4635_v32 = vmul.f32 0.5, %v6218_v11  ;;  %v6220_v37 = vpop.eup %6219 }
 0xad1   : > { %v4642_v23 = vadd.f32 0.5, %v4634_v9  ;;  %v4637_v17 = vmul.f32 0.5, %v6220_v37  ;;  %v6222_v30 = vpop.eup %6221 }
 0xad2   : > { %v4643_v31 = vadd.f32 0.5, %v4635_v32  ;;  %v6224_v62 = vpop.eup %6223 }
 0xad3   : > { %4694 = vrot.lane.b32.xlu1 %v4638_v49, %s6259_s12  ;;  %4706 = vrot.lane.b32.xlu0 %v4644_v39, %s6259_s12  ;;  %v4645_v54 = vadd.f32 0.5, %v4637_v17  ;;  %v6226_v35 = vpop.eup %6225 }
 0xad4   : > { %v6228_v26 = vpop.eup %6227 }
 0xad5   : > { %v6230_v36 = vpop.eup %6229 }
 0xad6   : > { %v6232_v38 = vpop.eup %6231 }
 0xad7   : > { %4668 = vrot.lane.b32.xlu1 %v4641_v57, %s6258_s6  ;;  %4664 = vrot.lane.b32.xlu0 %v4639_v27, %s6258_s6  ;;  %v6234_v37 = vpop.eup %6233 }
 0xadb   : > { %4696 = vrot.lane.b32.xlu0 %v4639_v27, %s6259_s12  ;;  %4674 = vrot.lane.b32.xlu1 %v4644_v39, %s6258_s6 }
 0xadf   : > { %4702 = vrot.lane.b32.xlu0 %v4642_v23, %s6259_s12  ;;  %4670 = vrot.lane.b32.xlu1 %v4642_v23, %s6258_s6 }
 0xae3   : > { %4704 = vrot.lane.b32.xlu0 %v4643_v31, %s6259_s12  ;;  %4672 = vrot.lane.b32.xlu1 %v4643_v31, %s6258_s6 }
 0xae7   : > { %4708 = vrot.lane.b32.xlu0 %v4645_v54, %s6259_s12  ;;  %4676 = vrot.lane.b32.xlu1 %v4645_v54, %s6258_s6 }
 0xb3d   : > { %v4699_v47 = vpop.permute.xlu0 %4698  ;;  %v4667_v48 = vpop.permute.xlu1 %4666 }
 0xb3e   : > { %v4720_v15 = vmul.f32 %v4699_v47, %v7548_v22  ;;  %v4688_v42 = vmul.f32 %v6222_v30, %v4667_v48 }
 0xb40   : > { %v4728_v49 = vadd.f32 %v4720_v15, %v4688_v42 }
 0xb41   : > { %v4701_v21 = vpop.permute.xlu0 %4700  ;;  %v4663_v29 = vpop.permute.xlu1 %4662 }
 0xb42   : > { %v4686_v41 = vmul.f32 %v6224_v62, %v4663_v29  ;;  %v4721_v3 = vmul.f32 %v4701_v21, %v7557_v55  ;;  %v4736_v5 = vmul.f32 %v6429_v58, %v4728_v49 }
 0xb44   : > { %v4745_v58 = vsel %vm733_vm9, %v4736_v5, 0.0 }
 0xb45   : > { %v4695_v28 = vpop.permute.xlu1 %4694  ;;  %v4707_v7 = vpop.permute.xlu0 %4706 }
 0xb46   : > { %v4718_v25 = vmul.f32 %v4695_v28, %v7541_v45 }
 0xb48   : > { %v4726_v61 = vadd.f32 %v4718_v25, %v4686_v41 }
 0xb49   : > { %v4669_v12 = vpop.permute.xlu1 %4668  ;;  %v4665_v44 = vpop.permute.xlu0 %4664 }
 0xb4a   : > { %v4689_v16 = vmul.f32 %v6226_v35, %v4669_v12  ;;  %v4687_v57 = vmul.f32 %v6228_v26, %v4665_v44  ;;  %v4734_v22 = vmul.f32 %v6420_v53, %v4726_v61 }
 0xb4c   : > { %v4729_v13 = vadd.f32 %v4721_v3, %v4689_v16  ;;  %v4742_v33 = vsel %vm733_vm9, %v4734_v22, 0.0 }
 0xb4d   : > { %v4697_v18 = vpop.permute.xlu0 %4696  ;;  %v4675_v46 = vpop.permute.xlu1 %4674 }
 0xb4e   : > { %v4719_v45 = vmul.f32 %v4697_v18, %v7546_v14  ;;  %v4692_v63 = vmul.f32 %v6230_v36, %v4675_v46  ;;  %v4724_v14 = vmul.f32 %v4707_v7, %v7579_v19  ;;  %v4737_v23 = vmul.f32 %v6407_v51, %v4729_v13  ;;  %v6236_v51 = vpop.eup %6235 }
 0xb50   : > { %v4727_v1 = vadd.f32 %v4719_v45, %v4687_v57  ;;  %v4732_v31 = vadd.f32 %v4724_v14, %v4692_v63  ;;  %v4747_v2 = vsel %vm733_vm9, %v4737_v23, 0.0 }
 0xb51   : > { %v4703_v39 = vpop.permute.xlu0 %4702  ;;  %v4671_v27 = vpop.permute.xlu1 %4670 }
 0xb52   : > { %v4735_v9 = vmul.f32 %v6423_v56, %v4727_v1  ;;  %v4722_v55 = vmul.f32 %v4703_v39, %v7559_v40  ;;  %v4690_v11 = vmul.f32 %v6232_v38, %v4671_v27  ;;  %v4740_v43 = vmul.f32 %v6435_v60, %v4732_v31 }
 0xb54   : > { %v4743_v53 = vsel %vm733_vm9, %v4735_v9, 0.0  ;;  %v4730_v32 = vadd.f32 %v4722_v55, %v4690_v11  ;;  %v4753_v30 = vsel %vm733_vm9, %v4740_v43, 0.0 }
 0xb55   : > { %v4744_v17 = vadd.f32 %v4743_v53, %v4742_v33  ;;  %v4705_v54 = vpop.permute.xlu0 %4704  ;;  %v4673_v4 = vpop.permute.xlu1 %4672 }
 0xb56   : > { %v4738_v56 = vmul.f32 %v6410_v52, %v4730_v32  ;;  %v4723_v40 = vmul.f32 %v4705_v54, %v7576_v20  ;;  %v4691_v0 = vmul.f32 %v6234_v37, %v4673_v4 }
 0xb57   : > { %v4746_v19 = vadd.f32 %v4745_v58, %v4744_v17 }
 0xb58   : > { %v4731_v34 = vadd.f32 %v4723_v40, %v4691_v0  ;;  %v4749_v47 = vsel %vm733_vm9, %v4738_v56, 0.0 }
 0xb59   : > { %v4748_v6 = vadd.f32 %v4747_v2, %v4746_v19  ;;  %v4709_v24 = vpop.permute.xlu0 %4708  ;;  %v4677_v50 = vpop.permute.xlu1 %4676 }
 0xb5a   : > { %v4739_v48 = vmul.f32 %v6432_v59, %v4731_v34  ;;  %v4725_v21 = vmul.f32 %v4709_v24, %v7581_v10  ;;  %v4693_v52 = vmul.f32 %v6236_v51, %v4677_v50 }
 0xb5b   : > { %v4750_v29 = vadd.f32 %v4749_v47, %v4748_v6 }
 0xb5c   : > { %v4751_v20 = vsel %vm733_vm9, %v4739_v48, 0.0  ;;  %v4733_v28 = vadd.f32 %v4725_v21, %v4693_v52  ;;  %vm4853_vm9 = vcmask 352512  }
 0xb5d   : > { %v4752_v7 = vadd.f32 %v4751_v20, %v4750_v29 }
 0xb5e   : > { %v4741_v60 = vmul.f32 %v8149_v8, %v4733_v28  ;;  %v4768_v8 = vld [vmem:[%s8047_s3 + $0x12] sm:$0x1] }
 0xb5f   : > { %v4754_v25 = vadd.f32 %v4753_v30, %v4752_v7 }
 0xb60   : > { %v4755_v62 = vsel %vm741_vm5, %v4741_v60, 0.0 }
 0xb61   : > { %v4756_v12 = vadd.f32 %v4755_v62, %v4754_v25 }
 0xb63   : > { %v4757_v44 = vrot.slane %v4756_v12, 4 }
 0xb65   : > { %v4758_v15 = vadd.f32 %v4757_v44, %v4756_v12 }
 0xb67   : > { %v4759_v59 = vrot.slane %v4758_v15, 2 }
 0xb69   : > { %v4760_v42 = vadd.f32 %v4759_v59, %v4758_v15 }
 0xb6b   : > { %v4761_v10 = vrot.slane %v4760_v42, 1 }
 0xb6d   : > { %v4762_v41 = vadd.f32 %v4761_v10, %v4760_v42 }
 0xb6f   : > { %v4763_v35 = vmul.f32 0.020408163, %v4762_v41 }
 0xb71   : > { %4770 = vrot.lane.b32.xlu1 %v4763_v35, %s6258_s6 }
 0xbe3   : > { %v4771_v61 = vpop.permute.xlu1 %4770 }
 0xbe4   : > { %4848 = vst.msk [vmem:[%s6417_s5 + $0x3] sm:$0x1] %vm4847_vm4, %v4771_v61  ;;  %5799 = vmatmul.mubr.msk.f32.vlgmr.msra.gmra.mrb[108].mxu1 %vm4772_vm7, %v4771_v61 }
 0xcb7   : > { %v4841_v16 = vpop.f32.mrb[108].mxu1 }
 0xcb8   : > { %v4842_v26 = vadd.f32 %v4841_v16, %v4768_v8  ;;  %v5800_v18 = vpop.f32.mrb[109].mxu1 }
 0xcba   : > { %4850 = vrot.lane.b32.xlu0 %v4842_v26, %s6259_s12 }
 0xd2c   : > { %v4851_v46 = vpop.permute.xlu0 %4850 }
 0xd2d   : > { %4854 = vst.msk [vmem:[%s6417_s5 + $0x3] sm:$0x1] %vm4853_vm9, %v4851_v46 }
 0xd2e PF: > { %s14_s15 = sadd.s32 1, %s6254_s15  }
 0xd2f   : > { %p11_p4 = scmp.ge.s32.totalorder %s14_s15, 4  }
 0xd31   :  { %13 = sbr.rel (!%p11_p4) target bundleno = 1 (0x1), region = 71 }

</bundles_post_ra>
